<compile_context>
chip_gen: v5e
topology: v5e:2x2
jax: 0.10.0
libtpu: 0.0.40
codegen_flags: <defaults>
</compile_context>

<pallas_src>
import functools

import jax
import jax.numpy as jnp
from jax import lax
from jax.experimental import pallas as pl
from jax.experimental.pallas import tpu as pltpu


def attention_kernel(x_ref, gamma_ref, beta_ref, wqkv_ref, wout_ref, bout_ref,
                     o_ref, *, tb, n, num_head, ch_head, eps, attn_bf16):
    TB, N, H, D = tb, n, num_head, ch_head
    R = TB * N               # rows handled this grid step
    HB = H * TB              # independent (head, sample) attention problems

    x3 = x_ref[...]          # (TB, N, C) f32
    C = x3.shape[-1]

    # ---- GroupNorm(num_groups=1, C) per sample, two-pass stats ----
    inv_nc = 1.0 / (N * C)
    mean = jnp.sum(jnp.sum(x3, axis=2, keepdims=True), axis=1, keepdims=True) * inv_nc
    xc = x3 - mean
    var = jnp.sum(jnp.sum(xc * xc, axis=2, keepdims=True), axis=1, keepdims=True) * inv_nc
    xn = (xc * lax.rsqrt(var + eps)).reshape(R, C)        # leading-dim merge only
    xn = xn * gamma_ref[...] + beta_ref[...]              # per-channel affine

    # ---- fused q/k/v projection: one batched dot, stacked (3H, C, D) weight ----
    # (q-scale ch_head**-0.5 folded into the q block wrapper-side)
    xnb = jnp.broadcast_to(xn, (3 * H, R, C))
    qkv = lax.dot_general(xnb, wqkv_ref[...], (((2,), (1,)), ((0,), (0,))),
                          preferred_element_type=jnp.float32)     # (3H, R, D)

    # Leading-dim slices + leading-only reshapes (no lane relayout).
    qh = qkv[:H].reshape(HB, N, D)
    kh = qkv[H:2 * H].reshape(HB, N, D)
    vh = qkv[2 * H:].reshape(HB, N, D)

    if attn_bf16:
        qh = qh.astype(jnp.bfloat16)
        kh = kh.astype(jnp.bfloat16)

    # ---- softmax attention, batched over (head, sample) ----
    s = lax.dot_general(qh, kh, (((2,), (2,)), ((0,), (0,))),
                        preferred_element_type=jnp.float32)       # (HB, N, N)
    s = s - jnp.max(s, axis=-1, keepdims=True)
    p = jnp.exp(s)
    p = p * pl.reciprocal(jnp.sum(p, axis=-1, keepdims=True), approx=True)

    pv = p.astype(jnp.bfloat16) if attn_bf16 else p
    vv = vh if not attn_bf16 else vh.astype(jnp.bfloat16)
    o = lax.dot_general(pv, vv, (((2,), (1,)), ((0,), (0,))),
                        preferred_element_type=jnp.float32)       # (HB, N, D)

    # ---- output projection (== concat-over-heads @ Wout) + bias ----
    # Running (R, C) accumulator over heads: no (H, R, C) intermediate.
    oh = o.reshape(H, R, D)
    out = jnp.zeros((R, C), jnp.float32)
    for h in range(H):       # H is small & static; unrolled
        out = out + jnp.dot(oh[h], wout_ref[h],
                            preferred_element_type=jnp.float32)
    out = out + bout_ref[...]

    # ---- residual + store ----
    o_ref[...] = (out.reshape(TB, N, C) + x3).astype(o_ref.dtype)


def _min_grid_steps():
    """>=2 grid steps only buys anything on multi-TensorCore chips (v4/v5p/v7x);
    on single-core v5e/v6e it just doubles the fixed per-step overhead."""
    try:
        kind = jax.devices()[0].device_kind.lower()
    except Exception:
        return 1
    single_core = any(t in kind for t in ("v5e", "v6e", "lite"))
    return 1 if single_core else 2


def _vmem_bytes_estimate(tb, n, c, h, d):
    """Rough f32 VMEM footprint of one grid step, including the quadratic
    (HB, N, N) score/prob intermediates and the projection temporaries."""
    f32 = 4
    r, hb = tb * n, h * tb
    est = 2 * 2 * tb * n * c * f32                          # x-in + out blocks (double-buffered)
    est += 2 * (3 * h * c * d + h * d * c + 3 * c) * f32    # weights + affine (double-buffered)
    est += 3 * h * r * c * f32                              # broadcast xn feeding the fused qkv dot
    est += 2 * 3 * h * r * d * f32                          # qkv result + q/k/v head views
    est += 2 * hb * n * n * f32                             # scores + probs  (O(N^2))
    est += h * r * d * f32 + 2 * r * c * f32                # attention out + projection/output
    return est


def _pick_batch_block(batch, n, c, h, d, min_steps, vmem_budget=24 << 20):
    """Largest divisor of `batch` whose VMEM estimate fits the budget and that
    keeps at least `min_steps` grid steps when possible."""
    divisors = sorted((tb for tb in range(1, batch + 1) if batch % tb == 0),
                      reverse=True)
    fits = [tb for tb in divisors if _vmem_bytes_estimate(tb, n, c, h, d) <= vmem_budget]
    multi = [tb for tb in fits if batch // tb >= min_steps]
    if multi:
        return multi[0]
    if fits:
        return fits[0]
    return 1


def attention_forward(x, gamma, beta, wqkv, wout, bout, *, num_head, ch_head,
                      attn_bf16=False):
    """x: (B, N, C). Weights follow PyTorch conventions:
       wqkv (3*H*D, C), wout (C, H*D), bout (C,), gamma/beta (C,)."""
    B, N, C = x.shape
    H, D = num_head, ch_head
    hd = H * D
    TB = _pick_batch_block(B, N, C, H, D, _min_grid_steps())

    # ---- one-time parameter prep (outside the hot loop) ----
    w = jnp.asarray(wqkv)

    def head_major(block, scale=1.0):
        # rows of `block` are indexed h*D + d  ->  (H, C, D)
        return block.reshape(H, D, C).transpose(0, 2, 1) * scale

    wqkv_h = jnp.concatenate(
        [head_major(w[:hd], D ** -0.5),          # q (scale folded into weights)
         head_major(w[hd:2 * hd]),               # k
         head_major(w[2 * hd:])],                # v
        axis=0)                                  # (3H, C, D)
    wout_h = jnp.asarray(wout).T.reshape(H, D, C)           # (H, D, C)
    gamma2 = jnp.asarray(gamma).reshape(1, C)
    beta2 = jnp.asarray(beta).reshape(1, C)
    bout2 = jnp.asarray(bout).reshape(1, C)

    kern = functools.partial(attention_kernel, tb=TB, n=N, num_head=H,
                             ch_head=D, eps=1e-5, attn_bf16=attn_bf16)

    return pl.pallas_call(
        kern,
        out_shape=jax.ShapeDtypeStruct((B, N, C), x.dtype),
        grid=(B // TB,),
        in_specs=[
            pl.BlockSpec((TB, N, C), lambda b: (b, 0, 0)),        # x (TB samples)
            pl.BlockSpec((1, C), lambda b: (0, 0)),               # gamma
            pl.BlockSpec((1, C), lambda b: (0, 0)),               # beta
            pl.BlockSpec((3 * H, C, D), lambda b: (0, 0, 0)),     # stacked Wqkv (head-major)
            pl.BlockSpec((H, D, C), lambda b: (0, 0, 0)),         # Wout (head-split)
            pl.BlockSpec((1, C), lambda b: (0, 0)),               # bout
        ],
        out_specs=pl.BlockSpec((TB, N, C), lambda b: (b, 0, 0)),
        compiler_params=pltpu.CompilerParams(
            dimension_semantics=("parallel",),
            vmem_limit_bytes=32 * 1024 * 1024),
    )(x, gamma2, beta2, wqkv_h, wout_h, bout2)


def attention_reference(x, gamma, beta, wqkv, wout, bout, *, num_head, ch_head):
    """Pure-JAX reference mirroring the PyTorch forward exactly."""
    B, N, C = x.shape
    eps = 1e-5
    mean = x.mean(axis=(1, 2), keepdims=True)
    var = ((x - mean) ** 2).mean(axis=(1, 2), keepdims=True)
    xn = (x - mean) / jnp.sqrt(var + eps) * gamma[None, None, :] + beta[None, None, :]
    qkv = jnp.einsum('bnc,oc->bno', xn, wqkv)
    q, k, v = jnp.split(qkv, 3, axis=-1)
    q = q.reshape(B, N, num_head, ch_head) * (ch_head ** -0.5)
    k = k.reshape(B, N, num_head, ch_head)
    v = v.reshape(B, N, num_head, ch_head)
    attn = jax.nn.softmax(jnp.einsum('bihd,bjhd->bhij', q, k), axis=-1)
    out = jnp.einsum('bhij,bjhd->bihd', attn, v).reshape(B, N, num_head * ch_head)
    out = jnp.einsum('bnf,cf->bnc', out, wout) + bout[None, None, :]
    return out + x


if __name__ == "__main__":
    # Module config (Attention defaults): num_head=4, ch_head=32.
    ch, num_head, ch_head = 32, 4, 32
    B, N = 16, 16            # 16 decompositions of 16 points each

    key = jax.random.PRNGKey(0)
    kx, kg, kb, kq, kw, kbo = jax.random.split(key, 6)

    x = jax.random.normal(kx, (B, N, ch), dtype=jnp.float32)

    # Deterministic synthetic parameters (shapes from __init__).
    gamma = 1.0 + 0.1 * jax.random.normal(kg, (ch,), dtype=jnp.float32)
    beta = 0.1 * jax.random.normal(kb, (ch,), dtype=jnp.float32)
    wqkv = 0.05 * jax.random.normal(kq, (3 * num_head * ch_head, ch), jnp.float32)
    wout = 0.05 * jax.random.normal(kw, (ch, num_head * ch_head), jnp.float32)
    bout = 0.05 * jax.random.normal(kbo, (ch,), dtype=jnp.float32)

    out = attention_forward(x, gamma, beta, wqkv, wout, bout,
                            num_head=num_head, ch_head=ch_head)
    out = jax.block_until_ready(out)

    ref = attention_reference(x, gamma, beta, wqkv, wout, bout,
                              num_head=num_head, ch_head=ch_head)
    assert out.shape == (B, N, ch)
    # Tolerance loosened slightly (2e-3) for the approximate EUP reciprocal in the
    # softmax normalization; everything else is exact f32 math.
    assert jnp.allclose(out, ref, atol=2e-3, rtol=2e-3), (
        f"max abs err {jnp.max(jnp.abs(out - ref))}")

    print("KERNEL_OK")
</pallas_src>

<mosaic_0001>
module attributes {stable_mosaic.version = 11 : i64} {
  func.func @attention_kernel(%arg0: i32, %arg1: memref<8x16x32xf32, #tpu.memory_space<vmem>>, %arg2: memref<1x32xf32, #tpu.memory_space<vmem>>, %arg3: memref<1x32xf32, #tpu.memory_space<vmem>>, %arg4: memref<12x32x32xf32, #tpu.memory_space<vmem>>, %arg5: memref<4x32x32xf32, #tpu.memory_space<vmem>>, %arg6: memref<1x32xf32, #tpu.memory_space<vmem>>, %arg7: memref<8x16x32xf32, #tpu.memory_space<vmem>>) attributes {dimension_semantics = [#tpu.dimension_semantics<parallel>], iteration_bounds = array<i64: 2>, scalar_prefetch = 0 : i64, scratch_operands = 0 : i64, tpu.core_type = #tpu.core_type<tc>, window_params = [{transform_indices = @transform_0, window_bounds = array<i64: 8, 16, 32>}, {pipeline_mode = #tpu.pipeline_mode<synchronous>, transform_indices = @transform_1, window_bounds = array<i64: 1, 32>}, {pipeline_mode = #tpu.pipeline_mode<synchronous>, transform_indices = @transform_2, window_bounds = array<i64: 1, 32>}, {pipeline_mode = #tpu.pipeline_mode<synchronous>, transform_indices = @transform_3, window_bounds = array<i64: 12, 32, 32>}, {pipeline_mode = #tpu.pipeline_mode<synchronous>, transform_indices = @transform_4, window_bounds = array<i64: 4, 32, 32>}, {pipeline_mode = #tpu.pipeline_mode<synchronous>, transform_indices = @transform_5, window_bounds = array<i64: 1, 32>}, {transform_indices = @transform_6, window_bounds = array<i64: 8, 16, 32>}]} {
    %c0 = arith.constant 0 : index
    %c0_0 = arith.constant 0 : index
    %c0_1 = arith.constant 0 : index
    %0 = vector.load %arg1[%c0, %c0_0, %c0_1] : memref<8x16x32xf32, #tpu.memory_space<vmem>>, vector<8x16x32xf32>
    %cst = arith.constant dense<0.000000e+00> : vector<8x16xf32>
    %1 = vector.multi_reduction <add>, %0, %cst [2] : vector<8x16x32xf32> to vector<8x16xf32>
    %2 = vector.shape_cast %1 : vector<8x16xf32> to vector<8x16x1xf32>
    %cst_2 = arith.constant dense<0.000000e+00> : vector<8x1xf32>
    %3 = vector.multi_reduction <add>, %2, %cst_2 [1] : vector<8x16x1xf32> to vector<8x1xf32>
    %4 = vector.shape_cast %3 : vector<8x1xf32> to vector<8x1x1xf32>
    %cst_3 = arith.constant 0.001953125 : f32
    %5 = vector.broadcast %cst_3 : f32 to vector<8x1x1xf32>
    %6 = arith.mulf %4, %5 : vector<8x1x1xf32>
    %7 = vector.broadcast %6 : vector<8x1x1xf32> to vector<8x16x32xf32>
    %8 = arith.subf %0, %7 : vector<8x16x32xf32>
    %9 = arith.mulf %8, %8 : vector<8x16x32xf32>
    %cst_4 = arith.constant dense<0.000000e+00> : vector<8x16xf32>
    %10 = vector.multi_reduction <add>, %9, %cst_4 [2] : vector<8x16x32xf32> to vector<8x16xf32>
    %11 = vector.shape_cast %10 : vector<8x16xf32> to vector<8x16x1xf32>
    %cst_5 = arith.constant dense<0.000000e+00> : vector<8x1xf32>
    %12 = vector.multi_reduction <add>, %11, %cst_5 [1] : vector<8x16x1xf32> to vector<8x1xf32>
    %13 = vector.shape_cast %12 : vector<8x1xf32> to vector<8x1x1xf32>
    %cst_6 = arith.constant 0.001953125 : f32
    %14 = vector.broadcast %cst_6 : f32 to vector<8x1x1xf32>
    %15 = arith.mulf %13, %14 : vector<8x1x1xf32>
    %cst_7 = arith.constant 9.99999974E-6 : f32
    %16 = vector.broadcast %cst_7 : f32 to vector<8x1x1xf32>
    %17 = arith.addf %15, %16 : vector<8x1x1xf32>
    %18 = math.rsqrt %17 : vector<8x1x1xf32>
    %19 = vector.broadcast %18 : vector<8x1x1xf32> to vector<8x16x32xf32>
    %20 = arith.mulf %8, %19 : vector<8x16x32xf32>
    %21 = vector.shape_cast %20 : vector<8x16x32xf32> to vector<128x32xf32>
    %c0_8 = arith.constant 0 : index
    %c0_9 = arith.constant 0 : index
    %22 = vector.load %arg2[%c0_8, %c0_9] : memref<1x32xf32, #tpu.memory_space<vmem>>, vector<1x32xf32>
    %23 = vector.broadcast %22 : vector<1x32xf32> to vector<128x32xf32>
    %24 = arith.mulf %21, %23 : vector<128x32xf32>
    %c0_10 = arith.constant 0 : index
    %c0_11 = arith.constant 0 : index
    %25 = vector.load %arg3[%c0_10, %c0_11] : memref<1x32xf32, #tpu.memory_space<vmem>>, vector<1x32xf32>
    %26 = vector.broadcast %25 : vector<1x32xf32> to vector<128x32xf32>
    %27 = arith.addf %24, %26 : vector<128x32xf32>
    %28 = vector.shape_cast %27 : vector<128x32xf32> to vector<1x128x32xf32>
    %29 = vector.broadcast %28 : vector<1x128x32xf32> to vector<12x128x32xf32>
    %c0_12 = arith.constant 0 : index
    %c0_13 = arith.constant 0 : index
    %c0_14 = arith.constant 0 : index
    %30 = vector.load %arg4[%c0_12, %c0_13, %c0_14] : memref<12x32x32xf32, #tpu.memory_space<vmem>>, vector<12x32x32xf32>
    %cst_15 = arith.constant dense<0.000000e+00> : vector<12x128x32xf32>
    %31 = tpu.matmul %29, %30, %cst_15 {dimension_numbers = #tpu.dot_dimension_numbers<[2], [1], [1], [2], [0, 0, 0, 1, 1, 2], [0], [0]>} : vector<12x128x32xf32>, vector<12x32x32xf32>, vector<12x128x32xf32> -> vector<12x128x32xf32>
    %32 = vector.extract_strided_slice %31 {offsets = [0, 0, 0], sizes = [4, 128, 32], strides = [1, 1, 1]} : vector<12x128x32xf32> to vector<4x128x32xf32>
    %33 = vector.shape_cast %32 : vector<4x128x32xf32> to vector<32x16x32xf32>
    %34 = vector.extract_strided_slice %31 {offsets = [4, 0, 0], sizes = [4, 128, 32], strides = [1, 1, 1]} : vector<12x128x32xf32> to vector<4x128x32xf32>
    %35 = vector.shape_cast %34 : vector<4x128x32xf32> to vector<32x16x32xf32>
    %36 = vector.extract_strided_slice %31 {offsets = [8, 0, 0], sizes = [4, 128, 32], strides = [1, 1, 1]} : vector<12x128x32xf32> to vector<4x128x32xf32>
    %37 = vector.shape_cast %36 : vector<4x128x32xf32> to vector<32x16x32xf32>
    %cst_16 = arith.constant dense<0.000000e+00> : vector<32x16x16xf32>
    %38 = tpu.matmul %33, %35, %cst_16 {dimension_numbers = #tpu.dot_dimension_numbers<[2], [2], [1], [1], [0, 0, 0, 1, 1, 1], [0], [0]>} : vector<32x16x32xf32>, vector<32x16x32xf32>, vector<32x16x16xf32> -> vector<32x16x16xf32>
    %cst_17 = arith.constant dense<0xFF800000> : vector<32x16xf32>
    %39 = vector.multi_reduction <maximumf>, %38, %cst_17 [2] : vector<32x16x16xf32> to vector<32x16xf32>
    %40 = vector.shape_cast %39 : vector<32x16xf32> to vector<32x16x1xf32>
    %41 = vector.broadcast %40 : vector<32x16x1xf32> to vector<32x16x16xf32>
    %42 = arith.subf %38, %41 : vector<32x16x16xf32>
    %43 = math.exp %42 : vector<32x16x16xf32>
    %cst_18 = arith.constant dense<0.000000e+00> : vector<32x16xf32>
    %44 = vector.multi_reduction <add>, %43, %cst_18 [2] : vector<32x16x16xf32> to vector<32x16xf32>
    %45 = vector.shape_cast %44 : vector<32x16xf32> to vector<32x16x1xf32>
    %46 = tpu.reciprocal %45 {approx = true} : vector<32x16x1xf32> -> vector<32x16x1xf32>
    %47 = vector.broadcast %46 : vector<32x16x1xf32> to vector<32x16x16xf32>
    %48 = arith.mulf %43, %47 : vector<32x16x16xf32>
    %cst_19 = arith.constant dense<0.000000e+00> : vector<32x16x32xf32>
    %49 = tpu.matmul %48, %37, %cst_19 {dimension_numbers = #tpu.dot_dimension_numbers<[2], [1], [1], [2], [0, 0, 0, 1, 1, 2], [0], [0]>} : vector<32x16x16xf32>, vector<32x16x32xf32>, vector<32x16x32xf32> -> vector<32x16x32xf32>
    %50 = vector.shape_cast %49 : vector<32x16x32xf32> to vector<4x128x32xf32>
    %cst_20 = arith.constant 0.000000e+00 : f32
    %51 = vector.broadcast %cst_20 : f32 to vector<128x32xf32>
    %52 = vector.extract_strided_slice %50 {offsets = [0, 0, 0], sizes = [1, 128, 32], strides = [1, 1, 1]} : vector<4x128x32xf32> to vector<1x128x32xf32>
    %53 = vector.shape_cast %52 : vector<1x128x32xf32> to vector<128x32xf32>
    %c0_21 = arith.constant 0 : index
    %c0_22 = arith.constant 0 : index
    %c0_23 = arith.constant 0 : index
    %54 = vector.load %arg5[%c0_21, %c0_22, %c0_23] : memref<4x32x32xf32, #tpu.memory_space<vmem>>, vector<1x32x32xf32>
    %55 = vector.shape_cast %54 : vector<1x32x32xf32> to vector<32x32xf32>
    %cst_24 = arith.constant dense<0.000000e+00> : vector<128x32xf32>
    %56 = tpu.matmul %53, %55, %cst_24 {dimension_numbers = #tpu.dot_dimension_numbers<[1], [0], [0], [1], [0, 0, 1, 1], [], []>} : vector<128x32xf32>, vector<32x32xf32>, vector<128x32xf32> -> vector<128x32xf32>
    %57 = arith.addf %51, %56 : vector<128x32xf32>
    %58 = vector.extract_strided_slice %50 {offsets = [1, 0, 0], sizes = [1, 128, 32], strides = [1, 1, 1]} : vector<4x128x32xf32> to vector<1x128x32xf32>
    %59 = vector.shape_cast %58 : vector<1x128x32xf32> to vector<128x32xf32>
    %c1 = arith.constant 1 : index
    %c0_25 = arith.constant 0 : index
    %c0_26 = arith.constant 0 : index
    %60 = vector.load %arg5[%c1, %c0_25, %c0_26] : memref<4x32x32xf32, #tpu.memory_space<vmem>>, vector<1x32x32xf32>
    %61 = vector.shape_cast %60 : vector<1x32x32xf32> to vector<32x32xf32>
    %cst_27 = arith.constant dense<0.000000e+00> : vector<128x32xf32>
    %62 = tpu.matmul %59, %61, %cst_27 {dimension_numbers = #tpu.dot_dimension_numbers<[1], [0], [0], [1], [0, 0, 1, 1], [], []>} : vector<128x32xf32>, vector<32x32xf32>, vector<128x32xf32> -> vector<128x32xf32>
    %63 = arith.addf %57, %62 : vector<128x32xf32>
    %64 = vector.extract_strided_slice %50 {offsets = [2, 0, 0], sizes = [1, 128, 32], strides = [1, 1, 1]} : vector<4x128x32xf32> to vector<1x128x32xf32>
    %65 = vector.shape_cast %64 : vector<1x128x32xf32> to vector<128x32xf32>
    %c2 = arith.constant 2 : index
    %c0_28 = arith.constant 0 : index
    %c0_29 = arith.constant 0 : index
    %66 = vector.load %arg5[%c2, %c0_28, %c0_29] : memref<4x32x32xf32, #tpu.memory_space<vmem>>, vector<1x32x32xf32>
    %67 = vector.shape_cast %66 : vector<1x32x32xf32> to vector<32x32xf32>
    %cst_30 = arith.constant dense<0.000000e+00> : vector<128x32xf32>
    %68 = tpu.matmul %65, %67, %cst_30 {dimension_numbers = #tpu.dot_dimension_numbers<[1], [0], [0], [1], [0, 0, 1, 1], [], []>} : vector<128x32xf32>, vector<32x32xf32>, vector<128x32xf32> -> vector<128x32xf32>
    %69 = arith.addf %63, %68 : vector<128x32xf32>
    %70 = vector.extract_strided_slice %50 {offsets = [3, 0, 0], sizes = [1, 128, 32], strides = [1, 1, 1]} : vector<4x128x32xf32> to vector<1x128x32xf32>
    %71 = vector.shape_cast %70 : vector<1x128x32xf32> to vector<128x32xf32>
    %c3 = arith.constant 3 : index
    %c0_31 = arith.constant 0 : index
    %c0_32 = arith.constant 0 : index
    %72 = vector.load %arg5[%c3, %c0_31, %c0_32] : memref<4x32x32xf32, #tpu.memory_space<vmem>>, vector<1x32x32xf32>
    %73 = vector.shape_cast %72 : vector<1x32x32xf32> to vector<32x32xf32>
    %cst_33 = arith.constant dense<0.000000e+00> : vector<128x32xf32>
    %74 = tpu.matmul %71, %73, %cst_33 {dimension_numbers = #tpu.dot_dimension_numbers<[1], [0], [0], [1], [0, 0, 1, 1], [], []>} : vector<128x32xf32>, vector<32x32xf32>, vector<128x32xf32> -> vector<128x32xf32>
    %75 = arith.addf %69, %74 : vector<128x32xf32>
    %c0_34 = arith.constant 0 : index
    %c0_35 = arith.constant 0 : index
    %76 = vector.load %arg6[%c0_34, %c0_35] : memref<1x32xf32, #tpu.memory_space<vmem>>, vector<1x32xf32>
    %77 = vector.broadcast %76 : vector<1x32xf32> to vector<128x32xf32>
    %78 = arith.addf %75, %77 : vector<128x32xf32>
    %79 = vector.shape_cast %78 : vector<128x32xf32> to vector<8x16x32xf32>
    %80 = arith.addf %79, %0 : vector<8x16x32xf32>
    %c0_36 = arith.constant 0 : index
    %c0_37 = arith.constant 0 : index
    %c0_38 = arith.constant 0 : index
    %81 = vector.load %arg7[%c0_36, %c0_37, %c0_38] : memref<8x16x32xf32, #tpu.memory_space<vmem>>, vector<8x16x32xf32>
    tpu.vector_store %arg7[%c0_36, %c0_37, %c0_38], %80 {strides = array<i32>} : memref<8x16x32xf32, #tpu.memory_space<vmem>>, vector<8x16x32xf32>,
    return
  }
  func.func @transform_0(%arg0: i32) -> (i32, i32, i32) {
    %c0_i32 = arith.constant 0 : i32
    %c0_i32_0 = arith.constant 0 : i32
    %c0_i32_1 = arith.constant 0 : i32
    return %arg0, %c0_i32, %c0_i32_0 : i32, i32, i32
  }
  func.func @transform_1(%arg0: i32) -> (i32, i32) {
    %c0_i32 = arith.constant 0 : i32
    %c0_i32_0 = arith.constant 0 : i32
    %c0_i32_1 = arith.constant 0 : i32
    return %c0_i32, %c0_i32_0 : i32, i32
  }
  func.func @transform_2(%arg0: i32) -> (i32, i32) {
    %c0_i32 = arith.constant 0 : i32
    %c0_i32_0 = arith.constant 0 : i32
    %c0_i32_1 = arith.constant 0 : i32
    return %c0_i32, %c0_i32_0 : i32, i32
  }
  func.func @transform_3(%arg0: i32) -> (i32, i32, i32) {
    %c0_i32 = arith.constant 0 : i32
    %c0_i32_0 = arith.constant 0 : i32
    %c0_i32_1 = arith.constant 0 : i32
    %c0_i32_2 = arith.constant 0 : i32
    return %c0_i32, %c0_i32_0, %c0_i32_1 : i32, i32, i32
  }
  func.func @transform_4(%arg0: i32) -> (i32, i32, i32) {
    %c0_i32 = arith.constant 0 : i32
    %c0_i32_0 = arith.constant 0 : i32
    %c0_i32_1 = arith.constant 0 : i32
    %c0_i32_2 = arith.constant 0 : i32
    return %c0_i32, %c0_i32_0, %c0_i32_1 : i32, i32, i32
  }
  func.func @transform_5(%arg0: i32) -> (i32, i32) {
    %c0_i32 = arith.constant 0 : i32
    %c0_i32_0 = arith.constant 0 : i32
    %c0_i32_1 = arith.constant 0 : i32
    return %c0_i32, %c0_i32_0 : i32, i32
  }
  func.func @transform_6(%arg0: i32) -> (i32, i32, i32) {
    %c0_i32 = arith.constant 0 : i32
    %c0_i32_0 = arith.constant 0 : i32
    %c0_i32_1 = arith.constant 0 : i32
    return %arg0, %c0_i32, %c0_i32_0 : i32, i32, i32
  }
}

</mosaic_0001>

<bundles_post_ra>
// kernel: tpu_custom_call.1
= control target key start
LH: loop header
LB: loop body
LE: loop exit
PB: predicated region body
PF: predicated region fallthrough
CT: control target
= control target key end

     0   :  { %11 = vsyncpa [#allocation3], 0  ;;  %s8518_s0 = inlined_call_operand.hbm [shape: f32[16,16,32], index: 0, kind: input, shape index: {}]   ;;  %s8519_s1 = inlined_call_operand.hbm [shape: f32[1,32], index: 1, kind: input, shape index: {}]   ;;  %s8520_s2 = inlined_call_operand.vmem [shape: f32[1,32], index: 2, kind: input, shape index: {}]   ;;  %s8521_s3 = inlined_call_operand.hbm [shape: f32[12,32,32], index: 3, kind: input, shape index: {}]   ;;  %s8522_s4 = inlined_call_operand.hbm [shape: f32[4,32,32], index: 4, kind: input, shape index: {}]   ;;  %s8523_s5 = inlined_call_operand.vmem [shape: f32[1,32], index: 5, kind: input, shape index: {}]   ;;  %s8524_s6 = inlined_call_operand.hbm [shape: f32[16,16,32], index: 6, kind: output, shape index: {}]  }
   0x1   :  { %13 = vsyncpa [#allocation3 + $0x1], 0 }
   0x2   :  { %14 = vsyncpa [#allocation6], 0 }
   0x3   :  { %15 = vsyncpa [#allocation9], 0 }
   0x4   :  { %16 = vsyncpa [#allocation4], 0 }
   0x5   :  { %18 = vsyncpa [#allocation4 + $0x1], 0  ;;  %s6127_s21 = smov 0   ;;  %s6129_s22 = smov 0  }
   0x6   :  { %s6131_s23 = smov 0   ;;  %s6133_s24 = smov 0  }
   0x7 LB: > { %s6148_s25 = sadd.s32 4294967295, %s6083_s24   ;;  %s5043_s26 = sadd.s32 4294967294, %s6083_s24   ;;  %s6083_s24 = sphi %s6133_s24, %s8773_s24   ;;  %s6079_s23 = sphi %s6131_s23, %s8772_s23   ;;  %s6075_s22 = sphi %s6129_s22, %s8771_s22   ;;  %s6071_s21 = sphi %s6127_s21, %s8770_s21  }
   0x8   : > { %p44_p0 = scmp.ne.s32.totalorder %s6075_s22, %s6071_s21  ;;  %p45_p1 = scmp.eq.s32.totalorder %s6148_s25, 0 }
   0x9   : > { %p173_p2 = scmp.eq.s32.totalorder %s6148_s25, 1  ;;  %p179_p3 = scmp.eq.s32.totalorder %s5043_s26, 1 }
   0xa   : > { %p6157_p4 = por %p45_p1, %p44_p0  ;;  %p5044_p5 = scmp.ge.s32.totalorder %s6083_s24, 1 }
   0xb   : > { %p6162_p6 = por %p179_p3, %p44_p0  ;;  %p186_p7 = scmp.lt.s32.totalorder %s6083_s24, 3 }
   0xc   : > { %s198_s7 = sshll.u32 %s8519_s1, 4  ;;  %s6085_s9 = smov [#allocation5]   ;;  %s199_s7 = int_to_ptr.hbm [resolvable:$true] %s198_s7 }
   0xd   : > { %p6170_p8 = pnand %p5044_p5, %p186_p7  ;;  %s200_s10 = sshll.u32 %s6085_s9, 4  ;;  %s201_s10 = int_to_ptr.vmem [resolvable:$true] %s200_s10 }
   0xe   : > { %s212_s13 = sshll.u32 %s8521_s3, 4  ;;  %s6086_s15 = smov [#allocation7]   ;;  %s213_s13 = int_to_ptr.hbm [resolvable:$true] %s212_s13 }
   0xf   : > { %p5533_p10 = pneg %p6170_p8  ;;  %s214_s16 = sshll.u32 %s6086_s15, 4  ;;  %s215_s16 = int_to_ptr.vmem [resolvable:$true] %s214_s16 }
  0x10   : > { %s8525_s17 = smov 128   ;;  %s8526_s18 = smov 8  }
  0x11   : > { %p6182_p11 = pnand %p5533_p10, %p45_p1  ;;  %s226_s26 = sshll.u32 %s8522_s4, 4  ;;  %s227_s26 = int_to_ptr.hbm [resolvable:$true] %s226_s26 }
  0x12   : > { %s6089_s29 = smov [#allocation8]   ;;  %p38_p13 = scmp.ne.s32.totalorder %s6079_s23, %s6075_s22 }
  0x13   : > { %5536 = dma.hbm_to_vmem [thread:$0]  (!%p6182_p11), %s199_s7, 16, %s201_s10, [#allocation6]  }
  0x14   : > { %5539 = dma.hbm_to_vmem [thread:$0]  (!%p6182_p11), %s213_s13, 6144, %s215_s16, [#allocation6], %s8525_s17, %s8525_s17, %s8526_s18  }
  0x15   : > { %s228_s30 = sshll.u32 %s6089_s29, 4  ;;  %s6202_s7 = sadd.s32 1, %s6083_s24   ;;  %s229_s30 = int_to_ptr.vmem [resolvable:$true] %s228_s30 }
  0x16   : > { %5542 = dma.hbm_to_vmem [thread:$0]  (!%p6182_p11), %s227_s26, 2048, %s229_s30, [#allocation9], %s8525_s17, %s8525_s17, %s8526_s18  }
  0x17   : > { %s28_s9 = ssub.s32 %s6083_s24, %s6202_s7  ;;  %s31_s10 = sadd.s32 1, %s6079_s23 }
  0x18   : > { %p29_p12 = scmp.eq.s32.totalorder %s28_s9, 0  ;;  %p39_p0 = scmp.eq.s32.totalorder %s6083_s24, 0 }
  0x19   : > { %p6215_p3 = por %p173_p2, %p38_p13  ;;  %p5554_p5 = scmp.lt.s32.totalorder %s6083_s24, 2 }
  0x1a   : > { %s6211_s11 = scalar_select %p29_p12, %s6079_s23, %s31_s10  }
  0x1b   : > { %s245_s13 = sand.u32 1, %s6079_s23   ;;  %s5514_s14 = sshll.u32 %s6083_s24, 7 }
  0x1c   : > { %p40_p7 = por %p39_p0, %p38_p13  ;;  %s5049_s15 = sshll.u32 %s245_s13, 7 }
  0x1d   : > { %s255_s20 = scalar_lea.hbm %s8518_s0, %s5514_s14  ;;  %s249_s29 = scalar_lea.vmem [#allocation2], %s5049_s15 }
  0x1e   : > { %s256_s26 = sshll.u32 %s255_s20, 4  ;;  %s258_s30 = sshll.u32 %s249_s29, 4  ;;  %s257_s26 = int_to_ptr.hbm [resolvable:$true] %s256_s26  ;;  %s259_s30 = int_to_ptr.vmem [resolvable:$true] %s258_s30 }
  0x1f   : > { %p6225_p10 = pnand %p5554_p5, %p40_p7  ;;  %s246_s10 = scalar_lea.sflag [#allocation3], %s245_s13 }
  0x20   : > { %s5979_s17 = sshra.s32 %s257_s26, 4  ;;  %s5986_s15 = scalar_lea.hbm %s8518_s0, 256  ;;  %s5980_s17 = int_to_ptr.hbm [resolvable:$true] %s5979_s17 }
  0x21   : > { %s5981_s18 = scalar_lea.hbm %s5980_s17, 128  ;;  %p5983_p11 = pneg %p6225_p10 }
  0x22   : > { %p5982_p2 = scmp.ne.s32.totalorder %s5980_s17, %s5981_s18  ;;  %p5987_p0 = scmp.lt.s32.totalorder %s5980_s17, %s8518_s0 }
  0x23   : > { %p5988_p5 = scmp.lt.s32.totalorder %s5986_s15, %s5981_s18 }
  0x24   : > { %p5984_p12 = pnand %p5983_p11, %p5982_p2 }
  0x25   : > { %p5989_p7 = por %p5988_p5, %p5987_p0 }
  0x26   : > { %p5985_p13 = pneg %p5984_p12 }
  0x28   : > { %p5990_p9 = pnand %p5989_p7, %p5985_p13 }
  0x2a   : > { %5993 = shalt.err (!%p5990_p9)
}
  0x2b   : > { %s8545_s13 = smov 8   ;;  %s8546_s29 = smov 128  }
  0x2c   : > { %5546 = dma.hbm_to_vmem [thread:$0]  (!%p6225_p10), %s257_s26, 2048, %s259_s30, %s246_s10, %s8546_s29, %s8546_s29, %s8545_s13  }
  0x2d   : > { %270 = sbr.rel (%p6170_p8) target bundleno = 1852 (0x73c), region = 44 }
  0x32   : > { %s6245_s14 = sand.u32 1, %s6075_s22  }
  0x33   : > { %s5054_s17 = sshll.u32 %s6245_s14, 7  ;;  %s273_s18 = scalar_lea.sflag [#allocation3], %s6245_s14 }
  0x34   : > { %s6251_s16 = scalar_lea.vmem [#allocation2], %s5054_s17 }
  0x35   : > { %6054 = dma.done.wait (%p6157_p4), %s273_s18, 2048  }
  0x36   : > { %6056 = vsyncadd (%p6157_p4), %s273_s18, 4294965248 }
  0x37   : > { %6058 = dma.done.wait (%p45_p1), [#allocation6], 6160  }
  0x38   : > { %6060 = vsyncadd (%p45_p1), [#allocation6], 4294961136 }
  0x39   : > { %6062 = dma.done.wait (%p45_p1), [#allocation9], 2048  }
  0x3a   : > { %6064 = vsyncadd (%p45_p1), [#allocation9], 4294965248  ;;  %vm339_vm0 = vcmask 261120   ;;  %v323_v0 = vld [vmem:[%s6251_s16] sm:$0xff]  ;;  %v6267_v1 = vld [vmem:[%s6251_s16 + $0x10] sm:$0xff]  ;;  %s8420_s9 = scalar_lea.vmem [#allocation10], %s5054_s17 }
  0x3b   : > { %v340_v2 = vsel %vm339_vm0, %v323_v0, 0.0  ;;  %v346_v3 = vsel %vm339_vm0, %v6267_v1, 0.0  ;;  %v6273_v4 = vld [vmem:[%s6251_s16 + $0x20] sm:$0xff]  ;;  %v324_v6 = vld [vmem:[%s6251_s16 + $0x8] sm:$0xff]  ;;  %v326_v7 = vld [vmem:[%s6251_s16 + $0x18] sm:$0xff]  ;;  %s5516_s10 = sshll.u32 %s6148_s25, 7 }
  0x3c   : > { %341 = vadd.xlane.f32.xlu0 %v340_v2  ;;  %347 = vadd.xlane.f32.xlu1 %v346_v3  ;;  %v352_v5 = vsel %vm339_vm0, %v6273_v4, 0.0  ;;  %v6280_v8 = vld [vmem:[%s6251_s16 + $0x28] sm:$0xff]  ;;  %v343_v9 = vsel %vm339_vm0, %v324_v6, 0.0  ;;  %v349_v10 = vsel %vm339_vm0, %v326_v7, 0.0  ;;  %v6287_v12 = vld [vmem:[%s6251_s16 + $0x38] sm:$0xff]  ;;  %v6290_v13 = vld [vmem:[%s6251_s16 + $0x30] sm:$0xff]  ;;  %s4937_s20 = scalar_lea.hbm %s8524_s6, %s5516_s10 }
  0x3d   : > { %353 = vadd.xlane.f32.xlu2 %v352_v5  ;;  %v355_v11 = vsel %vm339_vm0, %v6280_v8, 0.0  ;;  %v361_v14 = vsel %vm339_vm0, %v6287_v12, 0.0  ;;  %v358_v15 = vsel %vm339_vm0, %v6290_v13, 0.0  ;;  %v6297_v16 = vld [vmem:[%s6251_s16 + $0x40] sm:$0xff]  ;;  %v6323_v2 = vld [vmem:[%s6251_s16 + $0x48] sm:$0xff]  ;;  %s4938_s13 = sshll.u32 %s8420_s9, 4  ;;  %s4939_s13 = int_to_ptr.vmem [resolvable:$true] %s4938_s13 }
  0x3e   : > { %v364_v17 = vsel %vm339_vm0, %v6297_v16, 0.0  ;;  %v367_v5 = vsel %vm339_vm0, %v6323_v2, 0.0  ;;  %s4940_s25 = sshll.u32 %s4937_s20, 4  ;;  %s4925_s29 = scalar_lea.sflag [#allocation4], %s6245_s14  ;;  %s4941_s25 = int_to_ptr.hbm [resolvable:$true] %s4940_s25 }
  0x3f   : > { %s6023_s17 = sshra.s32 %s4941_s25, 4  ;;  %s6029_s26 = scalar_lea.hbm %s8524_s6, 256  ;;  %s6024_s17 = int_to_ptr.hbm [resolvable:$true] %s6023_s17 }
  0x40   : > { %s6025_s18 = scalar_lea.hbm %s6024_s17, 128  ;;  %p6030_p9 = scmp.lt.s32.totalorder %s6024_s17, %s8524_s6 }
  0x41   : > { %p6026_p1 = scmp.ne.s32.totalorder %s6024_s17, %s6025_s18  ;;  %p6031_p10 = scmp.lt.s32.totalorder %s6029_s26, %s6025_s18 }
  0x43   : > { %p6027_p4 = pnand %p6026_p1, %p6215_p3  ;;  %p6032_p2 = por %p6031_p10, %p6030_p9 }
  0x44   : > { %344 = vadd.xlane.f32.xlu0 %v343_v9  ;;  %350 = vadd.xlane.f32.xlu1 %v349_v10  ;;  %v6334_v10 = vld [vmem:[%s6251_s16 + $0x58] sm:$0xff] }
  0x45   : > { %356 = vadd.xlane.f32.xlu2 %v355_v11  ;;  %v6337_v11 = vld [vmem:[%s6251_s16 + $0x50] sm:$0xff]  ;;  %p6028_p8 = pneg %p6027_p4 }
  0x47   : > { %p6033_p11 = pnand %p6032_p2, %p6028_p8 }
  0x4c   : > { %362 = vadd.xlane.f32.xlu1 %v361_v14  ;;  %359 = vadd.xlane.f32.xlu0 %v358_v15  ;;  %v6340_v14 = vld [vmem:[%s6251_s16 + $0x68] sm:$0xff]  ;;  %v373_v15 = vsel %vm339_vm0, %v6334_v10, 0.0 }
  0x54   : > { %365 = vadd.xlane.f32.xlu1 %v364_v17  ;;  %v370_v17 = vsel %vm339_vm0, %v6337_v11, 0.0 }
  0xaf   : > { %v342_v18 = vpop.xlane.xlu0 %341  ;;  %v348_v19 = vpop.xlane.xlu1 %347 }
  0xb0   : > { %v354_v20 = vpop.xlane.xlu2 %353 }
  0xb7   : > { %v345_v21 = vpop.xlane.xlu0 %344  ;;  %v351_v22 = vpop.xlane.xlu1 %350 }
  0xb8   : > { %v388_v23 = vadd.f32 %v345_v21, %v342_v18  ;;  %v395_v24 = vadd.f32 %v351_v22, %v348_v19  ;;  %v357_v25 = vpop.xlane.xlu2 %356  ;;  %v379_v19 = vsel %vm339_vm0, %v6340_v14, 0.0  ;;  %v6352_v22 = vld [vmem:[%s6251_s16 + $0x60] sm:$0xff] }
  0xb9   : > { %v402_v26 = vadd.f32 %v357_v25, %v354_v20  ;;  %v376_v25 = vsel %vm339_vm0, %v6352_v22, 0.0 }
  0xba   : > { %v389_v27 = vrot.slane %v388_v23, 4  ;;  %v396_v28 = vrot.slane %v395_v24, 4 }
  0xbb   : > { %v403_v29 = vrot.slane %v402_v26, 4 }
  0xbc   : > { %v390_v30 = vadd.f32 %v389_v27, %v388_v23  ;;  %v397_v31 = vadd.f32 %v396_v28, %v395_v24  ;;  %v6357_v24 = vld [vmem:[%s6251_s16 + $0x70] sm:$0xff] }
  0xbd   : > { %v404_v32 = vadd.f32 %v403_v29, %v402_v26  ;;  %v382_v27 = vsel %vm339_vm0, %v6357_v24, 0.0 }
  0xbe   : > { %v391_v33 = vrot.slane %v390_v30, 2  ;;  %v398_v34 = vrot.slane %v397_v31, 2 }
  0xbf   : > { %v405_v35 = vrot.slane %v404_v32, 2  ;;  %v363_v36 = vpop.xlane.xlu1 %362  ;;  %v360_v37 = vpop.xlane.xlu0 %359 }
  0xc0   : > { %v392_v38 = vadd.f32 %v391_v33, %v390_v30  ;;  %v399_v39 = vadd.f32 %v398_v34, %v397_v31  ;;  %v409_v43 = vadd.f32 %v363_v36, %v360_v37 }
  0xc1   : > { %v406_v40 = vadd.f32 %v405_v35, %v404_v32 }
  0xc2   : > { %v393_v41 = vrot.slane %v392_v38, 1  ;;  %v400_v42 = vrot.slane %v399_v39, 1  ;;  %v410_v50 = vrot.slane %v409_v43, 4 }
  0xc3   : > { %v407_v44 = vrot.slane %v406_v40, 1 }
  0xc4   : > { %v394_v45 = vadd.f32 %v393_v41, %v392_v38  ;;  %v401_v46 = vadd.f32 %v400_v42, %v399_v39  ;;  %v411_v58 = vadd.f32 %v410_v50, %v409_v43  ;;  %v743_v39 = vld [vmem:[#allocation7 + $0x18] sm:$0xff] }
  0xc5   : > { %v408_v47 = vadd.f32 %v407_v44, %v406_v40  ;;  %v747_v40 = vld [vmem:[#allocation7 + $0x38] sm:$0xff]  ;;  %848 = vmatpush.msra.mxu0 %v743_v39  ;;  %v742_v44 = vld [vmem:[#allocation7 + $0x10] sm:$0xff] }
  0xc6   : > { %v444_v48 = vmul.f32 0.001953125, %v394_v45  ;;  %v445_v49 = vmul.f32 0.001953125, %v401_v46  ;;  %v751_v41 = vld [vmem:[#allocation7 + $0x58] sm:$0xff]  ;;  %913 = vmatpush.msra.mxu1 %v747_v40  ;;  %v746_v45 = vld [vmem:[#allocation7 + $0x30] sm:$0xff] }
  0xc7   : > { %v446_v51 = vmul.f32 0.001953125, %v408_v47  ;;  %v366_v33 = vpop.xlane.xlu1 %365  ;;  %v755_v43 = vld [vmem:[#allocation7 + $0x78] sm:$0xff]  ;;  %978 = vmatpush.msra.mxu2 %v751_v41  ;;  %v750_v46 = vld [vmem:[#allocation7 + $0x50] sm:$0xff]  ;;  %849 = vmatpush.msra.mxu0 %v742_v44 }
  0xc8   : > { %v6301_v52 = vsub.f32 %v324_v6, %v444_v48  ;;  %v6303_v53 = vsub.f32 %v323_v0, %v444_v48  ;;  %v6305_v54 = vsub.f32 %v326_v7, %v445_v49  ;;  %v6320_v63 = vsub.f32 %v6267_v1, %v445_v49  ;;  %1043 = vmatpush.msra.mxu3 %v755_v43  ;;  %v754_v48 = vld [vmem:[#allocation7 + $0x70] sm:$0xff] }
  0xc9   : > { %v6314_v59 = vsub.f32 %v6273_v4, %v446_v51  ;;  %v412_v0 = vrot.slane %v411_v58, 2  ;;  %v6349_v20 = vsub.f32 %v6280_v8, %v446_v51  ;;  %914 = vmatpush.msra.mxu1 %v746_v45  ;;  %979 = vmatpush.msra.mxu2 %v750_v46 }
  0xca   : > { %v469_v55 = vmul.f32 %v6301_v52, %v6301_v52  ;;  %v468_v56 = vmul.f32 %v6303_v53, %v6303_v53  ;;  %v471_v57 = vmul.f32 %v6305_v54, %v6305_v54  ;;  %v470_v4 = vmul.f32 %v6320_v63, %v6320_v63  ;;  %1044 = vmatpush.msra.mxu3 %v754_v48 }
  0xcb   : > { %v472_v3 = vmul.f32 %v6314_v59, %v6314_v59  ;;  %v413_v1 = vadd.f32 %v412_v0, %v411_v58  ;;  %v473_v23 = vmul.f32 %v6349_v20, %v6349_v20  ;;  %v745_v58 = vld [vmem:[#allocation7 + $0x28] sm:$0xff] }
  0xcc   : > { %v487_v60 = vsel %vm339_vm0, %v469_v55, 0.0  ;;  %v484_v61 = vsel %vm339_vm0, %v468_v56, 0.0  ;;  %v493_v62 = vsel %vm339_vm0, %v471_v57, 0.0  ;;  %v490_v7 = vsel %vm339_vm0, %v470_v4, 0.0  ;;  %v741_v57 = vld [vmem:[#allocation7 + $0x8] sm:$0xff]  ;;  %915 = vmatpush.msra.mxu1 %v745_v58 }
  0xcd   : > { %488 = vadd.xlane.f32.xlu0 %v487_v60  ;;  %485 = vadd.xlane.f32.xlu2 %v484_v61  ;;  %v496_v6 = vsel %vm339_vm0, %v472_v3, 0.0  ;;  %v414_v9 = vrot.slane %v413_v1, 1  ;;  %v499_v28 = vsel %vm339_vm0, %v473_v23, 0.0  ;;  %v749_v60 = vld [vmem:[#allocation7 + $0x48] sm:$0xff] }
  0xce   : > { %494 = vadd.xlane.f32.xlu1 %v493_v62  ;;  %850 = vmatpush.msra.mxu0 %v741_v57  ;;  %v753_v3 = vld [vmem:[#allocation7 + $0x68] sm:$0xff] }
  0xcf   : > { %v415_v18 = vadd.f32 %v414_v9, %v413_v1  ;;  %980 = vmatpush.msra.mxu2 %v749_v60  ;;  %1045 = vmatpush.msra.mxu3 %v753_v3  ;;  %v744_v1 = vld [vmem:[#allocation7 + $0x20] sm:$0xff] }
  0xd0   : > { %916 = vmatpush.msra.mxu1 %v744_v1 }
  0xd1   : > { %v447_v21 = vmul.f32 0.001953125, %v415_v18 }
  0xd3   : > { %v6362_v26 = vsub.f32 %v6287_v12, %v447_v21  ;;  %v6365_v8 = vsub.f32 %v6290_v13, %v447_v21  ;;  %v6377_v13 = vld [vmem:[%s6251_s16 + $0x78] sm:$0xff] }
  0xd4   : > { %v385_v32 = vsel %vm339_vm0, %v6377_v13, 0.0 }
  0xd5   : > { %491 = vadd.xlane.f32.xlu0 %v490_v7  ;;  %368 = vadd.xlane.f32.xlu2 %v367_v5  ;;  %v475_v29 = vmul.f32 %v6362_v26, %v6362_v26  ;;  %v474_v30 = vmul.f32 %v6365_v8, %v6365_v8  ;;  %v740_v5 = vld [vmem:[#allocation7] sm:$0xff] }
  0xd6   : > { %497 = vadd.xlane.f32.xlu1 %v496_v6  ;;  %v748_v6 = vld [vmem:[#allocation7 + $0x40] sm:$0xff]  ;;  %851 = vmatpush.msra.mxu0 %v740_v5 }
  0xd7   : > { %v505_v12 = vsel %vm339_vm0, %v475_v29, 0.0  ;;  %v502_v31 = vsel %vm339_vm0, %v474_v30, 0.0  ;;  %981 = vmatpush.msra.mxu2 %v748_v6 }
  0xdd   : > { %374 = vadd.xlane.f32.xlu0 %v373_v15  ;;  %371 = vadd.xlane.f32.xlu2 %v370_v17  ;;  %v752_v17 = vld [vmem:[#allocation7 + $0x60] sm:$0xff] }
  0xde   : > { %380 = vadd.xlane.f32.xlu1 %v379_v19  ;;  %1046 = vmatpush.msra.mxu3 %v752_v17 }
  0xe5   : > { %377 = vadd.xlane.f32.xlu0 %v376_v25  ;;  %500 = vadd.xlane.f32.xlu2 %v499_v28 }
  0xe6   : > { %383 = vadd.xlane.f32.xlu1 %v382_v27 }
  0xed   : > { %506 = vadd.xlane.f32.xlu0 %v505_v12  ;;  %503 = vadd.xlane.f32.xlu2 %v502_v31 }
  0xf5   : > { %386 = vadd.xlane.f32.xlu2 %v385_v32 }
 0x140   : > { %v486_v34 = vpop.xlane.xlu2 %485  ;;  %v489_v35 = vpop.xlane.xlu0 %488 }
 0x141   : > { %v532_v36 = vadd.f32 %v489_v35, %v486_v34  ;;  %v495_v38 = vpop.xlane.xlu1 %494 }
 0x143   : > { %v533_v37 = vrot.slane %v532_v36, 4 }
 0x145   : > { %v534_v42 = vadd.f32 %v533_v37, %v532_v36 }
 0x147   : > { %v535_v47 = vrot.slane %v534_v42, 2 }
 0x148   : > { %v369_v49 = vpop.xlane.xlu2 %368  ;;  %v492_v50 = vpop.xlane.xlu0 %491 }
 0x149   : > { %v536_v51 = vadd.f32 %v535_v47, %v534_v42  ;;  %v416_v55 = vadd.f32 %v369_v49, %v366_v33  ;;  %v539_v56 = vadd.f32 %v495_v38, %v492_v50  ;;  %v498_v4 = vpop.xlane.xlu1 %497 }
 0x14b   : > { %v537_v61 = vrot.slane %v536_v51, 1  ;;  %v417_v62 = vrot.slane %v416_v55, 4  ;;  %v540_v0 = vrot.slane %v539_v56, 4 }
 0x14d   : > { %v538_v7 = vadd.f32 %v537_v61, %v536_v51  ;;  %v418_v9 = vadd.f32 %v417_v62, %v416_v55  ;;  %v541_v15 = vadd.f32 %v540_v0, %v539_v56 }
 0x14f   : > { %v588_v18 = vmul.f32 0.001953125, %v538_v7  ;;  %v419_v19 = vrot.slane %v418_v9, 2  ;;  %v542_v21 = vrot.slane %v541_v15, 2 }
 0x150   : > { %v372_v23 = vpop.xlane.xlu2 %371  ;;  %v375_v25 = vpop.xlane.xlu0 %374 }
 0x151   : > { %v596_v27 = vadd.f32 1e-05, %v588_v18  ;;  %v420_v28 = vadd.f32 %v419_v19, %v418_v9  ;;  %v543_v29 = vadd.f32 %v542_v21, %v541_v15  ;;  %v423_v30 = vadd.f32 %v375_v25, %v372_v23  ;;  %v381_v36 = vpop.xlane.xlu1 %380  ;;  %v6400_v25 = vld [vmem:[#allocation5] ss:$0 sm:$0xff] }
 0x153   : > { %5601 = vrsqrt.f32 %v596_v27  ;;  %v421_v12 = vrot.slane %v420_v28, 1  ;;  %v544_v31 = vrot.slane %v543_v29, 1  ;;  %v424_v32 = vrot.slane %v423_v30, 4 }
 0x154   : > { %vm610_vm2 = vweird.f32 %v596_v27 }
 0x155   : > { %v545_v33 = vadd.f32 %v544_v31, %v543_v29  ;;  %v422_v34 = vadd.f32 %v421_v12, %v420_v28  ;;  %v425_v35 = vadd.f32 %v424_v32, %v423_v30 }
 0x157   : > { %v589_v37 = vmul.f32 0.001953125, %v545_v33  ;;  %v448_v38 = vmul.f32 0.001953125, %v422_v34  ;;  %v426_v39 = vrot.slane %v425_v35, 2 }
 0x158   : > { %v501_v40 = vpop.xlane.xlu2 %500  ;;  %v378_v41 = vpop.xlane.xlu0 %377 }
 0x159   : > { %v5602_v42 = vpop.eup %5601  ;;  %v6381_v43 = vadd.f32 1e-05, %v589_v37  ;;  %v546_v44 = vadd.f32 %v501_v40, %v498_v4  ;;  %v430_v45 = vadd.f32 %v381_v36, %v378_v41  ;;  %v6384_v46 = vsub.f32 %v6323_v2, %v448_v38 }
 0x15a   : > { %v605_v47 = vmul.f32 %v5602_v42, %v596_v27  ;;  %v427_v48 = vadd.f32 %v426_v39, %v425_v35  ;;  %v6387_v49 = vsub.f32 %v6297_v16, %v448_v38  ;;  %vm611_vm1 = vweird.f32 %v5602_v42  ;;  %v6410_v27 = vld [vmem:[%s8520_s2] ss:$0 sm:$0xff]  ;;  %v384_v39 = vpop.xlane.xlu1 %383 }
 0x15b   : > { %5603 = vrsqrt.f32 %v6381_v43  ;;  %v547_v50 = vrot.slane %v546_v44, 4  ;;  %v431_v51 = vrot.slane %v430_v45, 4  ;;  %v477_v57 = vmul.f32 %v6384_v46, %v6384_v46  ;;  %vm612_vm3 = vmor %vm610_vm2, %vm611_vm1 }
 0x15c   : > { %v606_v55 = vmul.f32 %v5602_v42, %v605_v47  ;;  %v428_v56 = vrot.slane %v427_v48, 1  ;;  %v476_v58 = vmul.f32 %v6387_v49, %v6387_v49  ;;  %vm620_vm5 = vweird.f32 %v6381_v43 }
 0x15d   : > { %v548_v60 = vadd.f32 %v547_v50, %v546_v44  ;;  %v432_v2 = vadd.f32 %v431_v51, %v430_v45  ;;  %v511_v0 = vsel %vm339_vm0, %v477_v57, 0.0 }
 0x15e   : > { %v607_v61 = vmul.f32 0.5, %v606_v55  ;;  %v429_v62 = vadd.f32 %v428_v56, %v427_v48  ;;  %v508_v16 = vsel %vm339_vm0, %v476_v58, 0.0  ;;  %512 = vadd.xlane.f32.xlu1 %v511_v0 }
 0x15f   : > { %v549_v3 = vrot.slane %v548_v60, 2  ;;  %v433_v4 = vrot.slane %v432_v2, 2  ;;  %509 = vadd.xlane.f32.xlu0 %v508_v16 }
 0x160   : > { %v608_v5 = vsub.f32 1.5, %v607_v61  ;;  %v504_v1 = vpop.xlane.xlu2 %503  ;;  %v507_v6 = vpop.xlane.xlu0 %506  ;;  %v449_v7 = vmul.f32 0.001953125, %v429_v62 }
 0x161   : > { %v5604_v9 = vpop.eup %5603  ;;  %v550_v15 = vadd.f32 %v549_v3, %v548_v60  ;;  %v434_v17 = vadd.f32 %v433_v4, %v432_v2  ;;  %v553_v18 = vadd.f32 %v507_v6, %v504_v1 }
 0x162   : > { %v609_v19 = vmul.f32 %v5602_v42, %v608_v5  ;;  %v615_v21 = vmul.f32 %v5604_v9, %v6381_v43  ;;  %v6398_v23 = vsub.f32 %v6334_v10, %v449_v7  ;;  %v6403_v12 = vsub.f32 %v6337_v11, %v449_v7 }
 0x163   : > { %v551_v28 = vrot.slane %v550_v15, 1  ;;  %v435_v29 = vrot.slane %v434_v17, 1  ;;  %v554_v30 = vrot.slane %v553_v18, 4  ;;  %vm621_vm4 = vweird.f32 %v5604_v9 }
 0x164   : > { %v613_v31 = vsel %vm612_vm3, %v5602_v42, %v609_v19  ;;  %v616_v32 = vmul.f32 %v5604_v9, %v615_v21  ;;  %v479_v33 = vmul.f32 %v6398_v23, %v6398_v23  ;;  %v478_v11 = vmul.f32 %v6403_v12, %v6403_v12  ;;  %vm622_vm6 = vmor %vm620_vm5, %vm621_vm4 }
 0x165   : > { %v684_v10 = vmul.f32 %v613_v31, %v6303_v53  ;;  %v552_v34 = vadd.f32 %v551_v28, %v550_v15  ;;  %v436_v35 = vadd.f32 %v435_v29, %v434_v17  ;;  %v555_v37 = vadd.f32 %v554_v30, %v553_v18 }
 0x166   : > { %v617_v36 = vmul.f32 0.5, %v616_v32  ;;  %v517_v38 = vsel %vm339_vm0, %v479_v33, 0.0  ;;  %v514_v53 = vsel %vm339_vm0, %v478_v11, 0.0  ;;  %v685_v48 = vmul.f32 %v613_v31, %v6301_v52 }
 0x167   : > { %v704_v40 = vmul.f32 %v6400_v25, %v684_v10  ;;  %v590_v41 = vmul.f32 0.001953125, %v552_v34  ;;  %518 = vadd.xlane.f32.xlu0 %v517_v38  ;;  %v450_v42 = vmul.f32 0.001953125, %v436_v35  ;;  %v556_v45 = vrot.slane %v555_v37, 2  ;;  %515 = vadd.xlane.f32.xlu2 %v514_v53 }
 0x168   : > { %v618_v44 = vsub.f32 1.5, %v617_v36  ;;  %v387_v47 = vpop.xlane.xlu2 %386  ;;  %v705_v61 = vmul.f32 %v6400_v25, %v685_v48 }
 0x169   : > { %v6420_v50 = vadd.f32 %v6410_v27, %v704_v40  ;;  %v598_v51 = vadd.f32 1e-05, %v590_v41  ;;  %v437_v55 = vadd.f32 %v387_v47, %v384_v39  ;;  %v557_v57 = vadd.f32 %v556_v45, %v555_v37 }
 0x16a   : > { %v619_v56 = vmul.f32 %v5604_v9, %v618_v44  ;;  %v6423_v58 = vsub.f32 %v6340_v14, %v450_v42  ;;  %v6426_v60 = vsub.f32 %v6352_v22, %v450_v42  ;;  %v6446_v6 = vadd.f32 %v6410_v27, %v705_v61 }
 0x16b   : > { %5605 = vrsqrt.f32 %v598_v51  ;;  %v438_v2 = vrot.slane %v437_v55, 4  ;;  %5059 = vmatmul.msk.f32.vlgmr.msra.gmra.mxu0 %vm339_vm0, %v6420_v50  ;;  %5075 = vmatmul.msk.f32.vlgmr.msra.gmra.mxu1 %vm339_vm0, %v6420_v50  ;;  %v558_v52 = vrot.slane %v557_v57, 1  ;;  %vm630_vm8 = vweird.f32 %v598_v51 }
 0x16c   : > { %5091 = vmatmul.msk.f32.vlgmr.msra.gmra.mxu2 %vm339_vm0, %v6420_v50  ;;  %5107 = vmatmul.msk.f32.vlgmr.msra.gmra.mxu3 %vm339_vm0, %v6420_v50  ;;  %v481_v14 = vmul.f32 %v6423_v58, %v6423_v58  ;;  %v480_v22 = vmul.f32 %v6426_v60, %v6426_v60  ;;  %v623_v0 = vsel %vm622_vm6, %v5604_v9, %v619_v56 }
 0x16d   : > { %v439_v62 = vadd.f32 %v438_v2, %v437_v55  ;;  %v559_v43 = vadd.f32 %v558_v52, %v557_v57  ;;  %v686_v7 = vmul.f32 %v623_v0, %v6320_v63  ;;  %v687_v31 = vmul.f32 %v623_v0, %v6305_v54 }
 0x16e   : > { %v523_v16 = vsel %vm339_vm0, %v481_v14, 0.0  ;;  %v520_v3 = vsel %vm339_vm0, %v480_v22, 0.0 }
 0x16f   : > { %v440_v4 = vrot.slane %v439_v62, 2  ;;  %521 = vadd.xlane.f32.xlu1 %v520_v3  ;;  %v591_v5 = vmul.f32 0.001953125, %v559_v43  ;;  %524 = vadd.xlane.f32.xlu2 %v523_v16  ;;  %v706_v63 = vmul.f32 %v6400_v25, %v686_v7 }
 0x171   : > { %v5606_v1 = vpop.eup %5605  ;;  %v441_v15 = vadd.f32 %v440_v4, %v439_v62  ;;  %v599_v18 = vadd.f32 1e-05, %v591_v5  ;;  %v6460_v32 = vadd.f32 %v6410_v27, %v706_v63 }
 0x172   : > { %v625_v17 = vmul.f32 %v5606_v1, %v598_v51  ;;  %vm631_vm7 = vweird.f32 %v5606_v1 }
 0x173   : > { %v442_v19 = vrot.slane %v441_v15, 1  ;;  %5060 = vmatmul.msk.f32.gmra.mxu0 %vm339_vm0, %v6446_v6  ;;  %5076 = vmatmul.msk.f32.gmra.mxu1 %vm339_vm0, %v6446_v6  ;;  %5607 = vrsqrt.f32 %v599_v18  ;;  %vm632_vm9 = vmor %vm630_vm8, %vm631_vm7  ;;  %vm640_vm11 = vweird.f32 %v599_v18 }
 0x174   : > { %v626_v9 = vmul.f32 %v5606_v1, %v625_v17  ;;  %5092 = vmatmul.msk.f32.gmra.mxu2 %vm339_vm0, %v6446_v6  ;;  %5108 = vmatmul.msk.f32.gmra.mxu3 %vm339_vm0, %v6446_v6 }
 0x175   : > { %v443_v21 = vadd.f32 %v442_v19, %v441_v15 }
 0x176   : > { %v627_v28 = vmul.f32 0.5, %v626_v9 }
 0x177   : > { %v451_v29 = vmul.f32 0.001953125, %v443_v21 }
 0x178   : > { %v628_v30 = vsub.f32 1.5, %v627_v28 }
 0x179   : > { %v6463_v33 = vsub.f32 %v6357_v24, %v451_v29  ;;  %v6466_v10 = vsub.f32 %v6377_v13, %v451_v29  ;;  %v5608_v34 = vpop.eup %5607  ;;  %v707_v13 = vmul.f32 %v6400_v25, %v687_v31 }
 0x17a   : > { %v629_v35 = vmul.f32 %v5606_v1, %v628_v30  ;;  %v635_v36 = vmul.f32 %v5608_v34, %v599_v18  ;;  %vm641_vm10 = vweird.f32 %v5608_v34 }
 0x17b   : > { %5061 = vmatmul.msk.f32.gmra.mxu0 %vm339_vm0, %v6460_v32  ;;  %5077 = vmatmul.msk.f32.gmra.mxu1 %vm339_vm0, %v6460_v32  ;;  %v482_v54 = vmul.f32 %v6463_v33, %v6463_v33  ;;  %v483_v24 = vmul.f32 %v6466_v10, %v6466_v10  ;;  %v6484_v40 = vadd.f32 %v6410_v27, %v707_v13  ;;  %vm642_vm12 = vmor %vm640_vm11, %vm641_vm10  ;;  %vm2736_vm10 = vcmask 130048  }
 0x17c   : > { %5093 = vmatmul.msk.f32.gmra.mxu2 %vm339_vm0, %v6460_v32  ;;  %5109 = vmatmul.msk.f32.gmra.mxu3 %vm339_vm0, %v6460_v32  ;;  %v633_v38 = vsel %vm632_vm9, %v5606_v1, %v629_v35  ;;  %v636_v11 = vmul.f32 %v5608_v34, %v635_v36 }
 0x17d   : > { %v526_v37 = vsel %vm339_vm0, %v482_v54, 0.0  ;;  %v529_v39 = vsel %vm339_vm0, %v483_v24, 0.0  ;;  %v688_v41 = vmul.f32 %v633_v38, %v6314_v59  ;;  %v689_v53 = vmul.f32 %v633_v38, %v6349_v20  ;;  %v759_v38 = vld [vmem:[#allocation7 + $0x98] sm:$0xff] }
 0x17e   : > { %527 = vadd.xlane.f32.xlu0 %v526_v37  ;;  %530 = vadd.xlane.f32.xlu1 %v529_v39  ;;  %v637_v42 = vmul.f32 0.5, %v636_v11  ;;  %v763_v11 = vld [vmem:[#allocation7 + $0xb8] sm:$0xff] }
 0x17f   : > { %v708_v44 = vmul.f32 %v6400_v25, %v688_v41  ;;  %v709_v20 = vmul.f32 %v6400_v25, %v689_v53  ;;  %1108 = vmatpush.msrb.mxu0 %v759_v38  ;;  %1173 = vmatpush.msrb.mxu1 %v763_v11 }
 0x180   : > { %v638_v45 = vsub.f32 1.5, %v637_v42 }
 0x181   : > { %v6498_v59 = vadd.f32 %v6410_v27, %v708_v44  ;;  %v6510_v51 = vadd.f32 %v6410_v27, %v709_v20 }
 0x182   : > { %v639_v47 = vmul.f32 %v5608_v34, %v638_v45 }
 0x183   : > { %5062 = vmatmul.msk.f32.gmra.mxu0 %vm339_vm0, %v6484_v40  ;;  %5078 = vmatmul.msk.f32.gmra.mxu1 %vm339_vm0, %v6484_v40 }
 0x184   : > { %5094 = vmatmul.msk.f32.gmra.mxu2 %vm339_vm0, %v6484_v40  ;;  %5110 = vmatmul.msk.f32.gmra.mxu3 %vm339_vm0, %v6484_v40  ;;  %v643_v48 = vsel %vm642_vm12, %v5608_v34, %v639_v47 }
 0x185   : > { %v690_v55 = vmul.f32 %v643_v48, %v6365_v8  ;;  %v691_v57 = vmul.f32 %v643_v48, %v6362_v26 }
 0x187   : > { %v710_v56 = vmul.f32 %v6400_v25, %v690_v55  ;;  %v711_v8 = vmul.f32 %v6400_v25, %v691_v57 }
 0x189   : > { %v6524_v2 = vadd.f32 %v6410_v27, %v710_v56  ;;  %v6536_v52 = vadd.f32 %v6410_v27, %v711_v8 }
 0x18b   : > { %5063 = vmatmul.msk.f32.gmra.mxu0 %vm339_vm0, %v6498_v59  ;;  %5079 = vmatmul.msk.f32.gmra.mxu1 %vm339_vm0, %v6498_v59 }
 0x18c   : > { %5095 = vmatmul.msk.f32.gmra.mxu2 %vm339_vm0, %v6498_v59  ;;  %5111 = vmatmul.msk.f32.gmra.mxu3 %vm339_vm0, %v6498_v59 }
 0x193   : > { %5064 = vmatmul.msk.f32.gmra.mxu0 %vm339_vm0, %v6510_v51  ;;  %5080 = vmatmul.msk.f32.gmra.mxu1 %vm339_vm0, %v6510_v51 }
 0x194   : > { %5096 = vmatmul.msk.f32.gmra.mxu2 %vm339_vm0, %v6510_v51  ;;  %5112 = vmatmul.msk.f32.gmra.mxu3 %vm339_vm0, %v6510_v51 }
 0x19b   : > { %5065 = vmatmul.msk.f32.gmra.mxu0 %vm339_vm0, %v6524_v2  ;;  %5081 = vmatmul.msk.f32.gmra.mxu1 %vm339_vm0, %v6524_v2 }
 0x19c   : > { %5097 = vmatmul.msk.f32.gmra.mxu2 %vm339_vm0, %v6524_v2  ;;  %5113 = vmatmul.msk.f32.gmra.mxu3 %vm339_vm0, %v6524_v2 }
 0x1a3   : > { %5066 = vmatmul.msk.f32.gmra.mxu0 %vm339_vm0, %v6536_v52  ;;  %5082 = vmatmul.msk.f32.gmra.mxu1 %vm339_vm0, %v6536_v52 }
 0x1a4   : > { %5098 = vmatmul.msk.f32.gmra.mxu2 %vm339_vm0, %v6536_v52  ;;  %5114 = vmatmul.msk.f32.gmra.mxu3 %vm339_vm0, %v6536_v52 }
 0x1d1   : > { %v513_v26 = vpop.xlane.xlu1 %512 }
 0x1d2   : > { %v510_v14 = vpop.xlane.xlu0 %509 }
 0x1d3   : > { %v560_v22 = vadd.f32 %v513_v26, %v510_v14 }
 0x1d5   : > { %v561_v61 = vrot.slane %v560_v22, 4 }
 0x1d7   : > { %v562_v62 = vadd.f32 %v561_v61, %v560_v22 }
 0x1d9   : > { %v563_v0 = vrot.slane %v562_v62, 2 }
 0x1da   : > { %v519_v43 = vpop.xlane.xlu0 %518  ;;  %v516_v3 = vpop.xlane.xlu2 %515 }
 0x1db   : > { %v564_v16 = vadd.f32 %v563_v0, %v562_v62  ;;  %v567_v5 = vadd.f32 %v519_v43, %v516_v3 }
 0x1dd   : > { %v565_v4 = vrot.slane %v564_v16, 1  ;;  %v568_v7 = vrot.slane %v567_v5, 4 }
 0x1df   : > { %v566_v1 = vadd.f32 %v565_v4, %v564_v16  ;;  %v569_v17 = vadd.f32 %v568_v7, %v567_v5  ;;  %v767_v7 = vld [vmem:[#allocation7 + $0xd8] sm:$0xff] }
 0x1e0   : > { %1238 = vmatpush.msrb.mxu2 %v767_v7 }
 0x1e1   : > { %v592_v15 = vmul.f32 0.001953125, %v566_v1  ;;  %v570_v9 = vrot.slane %v569_v17, 2 }
 0x1e2   : > { %v522_v18 = vpop.xlane.xlu1 %521  ;;  %v525_v63 = vpop.xlane.xlu2 %524 }
 0x1e3   : > { %v600_v19 = vadd.f32 1e-05, %v592_v15  ;;  %v571_v21 = vadd.f32 %v570_v9, %v569_v17  ;;  %v574_v28 = vadd.f32 %v525_v63, %v522_v18  ;;  %v771_v15 = vld [vmem:[#allocation7 + $0xf8] sm:$0xff]  ;;  %v762_v18 = vld [vmem:[#allocation7 + $0xb0] sm:$0xff] }
 0x1e4   : > { %1303 = vmatpush.msrb.mxu3 %v771_v15  ;;  %1174 = vmatpush.msrb.mxu1 %v762_v18 }
 0x1e5   : > { %5609 = vrsqrt.f32 %v600_v19  ;;  %v572_v29 = vrot.slane %v571_v21, 1  ;;  %v575_v30 = vrot.slane %v574_v28, 4  ;;  %vm650_vm14 = vweird.f32 %v600_v19 }
 0x1e7   : > { %v573_v31 = vadd.f32 %v572_v29, %v571_v21  ;;  %v576_v34 = vadd.f32 %v575_v30, %v574_v28  ;;  %v770_v21 = vld [vmem:[#allocation7 + $0xf0] sm:$0xff] }
 0x1e8   : > { %1304 = vmatpush.msrb.mxu3 %v770_v21  ;;  %v6638_v15 = vpop.f32.mrf.mxu1  ;;  %v775_v21 = vld [vmem:[#allocation7 + $0x118] sm:$0xff] }
 0x1e9   : > { %v593_v36 = vmul.f32 0.001953125, %v573_v31  ;;  %v577_v54 = vrot.slane %v576_v34, 2 }
 0x1eb   : > { %v5610_v35 = vpop.eup %5609  ;;  %v601_v13 = vadd.f32 1e-05, %v593_v36  ;;  %v578_v37 = vadd.f32 %v577_v54, %v576_v34 }
 0x1ec   : > { %v645_v24 = vmul.f32 %v5610_v35, %v600_v19  ;;  %vm651_vm13 = vweird.f32 %v5610_v35 }
 0x1ed   : > { %5611 = vrsqrt.f32 %v601_v13  ;;  %v579_v41 = vrot.slane %v578_v37, 1  ;;  %vm652_vm15 = vmor %vm650_vm14, %vm651_vm13  ;;  %vm660_vm2 = vweird.f32 %v601_v13 }
 0x1ee   : > { %v646_v39 = vmul.f32 %v5610_v35, %v645_v24 }
 0x1ef   : > { %v580_v44 = vadd.f32 %v579_v41, %v578_v37 }
 0x1f0   : > { %v647_v42 = vmul.f32 0.5, %v646_v39 }
 0x1f1   : > { %v528_v45 = vpop.xlane.xlu0 %527  ;;  %v531_v47 = vpop.xlane.xlu1 %530  ;;  %v594_v20 = vmul.f32 0.001953125, %v580_v44  ;;  %v765_v44 = vld [vmem:[#allocation7 + $0xc8] sm:$0xff] }
 0x1f2   : > { %v648_v53 = vsub.f32 1.5, %v647_v42  ;;  %v581_v48 = vadd.f32 %v531_v47, %v528_v45  ;;  %v769_v45 = vld [vmem:[#allocation7 + $0xe8] sm:$0xff] }
 0x1f3   : > { %v5612_v56 = vpop.eup %5611  ;;  %v6546_v57 = vadd.f32 1e-05, %v594_v20  ;;  %1305 = vmatpush.msrb.mxu3 %v769_v45 }
 0x1f4   : > { %v649_v55 = vmul.f32 %v5610_v35, %v648_v53  ;;  %v582_v8 = vrot.slane %v581_v48, 4  ;;  %v655_v14 = vmul.f32 %v5612_v56, %v601_v13  ;;  %vm661_vm1 = vweird.f32 %v5612_v56  ;;  %v757_v13 = vld [vmem:[#allocation7 + $0x88] sm:$0xff] }
 0x1f5   : > { %5613 = vrsqrt.f32 %v6546_v57  ;;  %vm662_vm3 = vmor %vm660_vm2, %vm661_vm1  ;;  %vm670_vm5 = vweird.f32 %v6546_v57 }
 0x1f6   : > { %v653_v26 = vsel %vm652_vm15, %v5610_v35, %v649_v55  ;;  %v656_v61 = vmul.f32 %v5612_v56, %v655_v14  ;;  %v583_v62 = vadd.f32 %v582_v8, %v581_v48  ;;  %v760_v8 = vld [vmem:[#allocation7 + $0xa0] sm:$0xff] }
 0x1f7   : > { %v692_v22 = vmul.f32 %v653_v26, %v6387_v49  ;;  %v693_v4 = vmul.f32 %v653_v26, %v6384_v46  ;;  %v758_v49 = vld [vmem:[#allocation7 + $0x90] sm:$0xff]  ;;  %v764_v26 = vld [vmem:[#allocation7 + $0xc0] sm:$0xff] }
 0x1f8   : > { %v657_v43 = vmul.f32 0.5, %v656_v61  ;;  %v584_v16 = vrot.slane %v583_v62, 2  ;;  %v766_v46 = vld [vmem:[#allocation7 + $0xd0] sm:$0xff]  ;;  %1109 = vmatpush.msrb.mxu0 %v758_v49  ;;  %v6651_v49 = vpop.f32.mrf.mxu3 }
 0x1f9   : > { %v712_v0 = vmul.f32 %v6400_v25, %v692_v22  ;;  %v713_v28 = vmul.f32 %v6400_v25, %v693_v4  ;;  %1239 = vmatpush.msrb.mxu2 %v766_v46  ;;  %8548 = vst [vmem:[#allocation16_spill] sm:$0xff] %v6651_v49 }
 0x1fa   : > { %v658_v5 = vsub.f32 1.5, %v657_v43  ;;  %v585_v1 = vadd.f32 %v584_v16, %v583_v62  ;;  %1110 = vmatpush.msrb.mxu0 %v757_v13 }
 0x1fb   : > { %v6552_v3 = vadd.f32 %v6410_v27, %v712_v0  ;;  %v5614_v17 = vpop.eup %5613  ;;  %v6567_v35 = vadd.f32 %v6410_v27, %v713_v28  ;;  %1240 = vmatpush.msrb.mxu2 %v765_v44 }
 0x1fc   : > { %v659_v19 = vmul.f32 %v5612_v56, %v658_v5  ;;  %v665_v9 = vmul.f32 %v5614_v17, %v6546_v57  ;;  %v586_v63 = vrot.slane %v585_v1, 1  ;;  %vm671_vm4 = vweird.f32 %v5614_v17  ;;  %v756_v57 = vld [vmem:[#allocation7 + $0x80] sm:$0xff] }
 0x1fd   : > { %5067 = vmatmul.msk.f32.gmra.mxu0 %vm339_vm0, %v6552_v3  ;;  %5083 = vmatmul.msk.f32.gmra.mxu1 %vm339_vm0, %v6552_v3  ;;  %vm672_vm6 = vmor %vm670_vm5, %vm671_vm4 }
 0x1fe   : > { %5099 = vmatmul.msk.f32.gmra.mxu2 %vm339_vm0, %v6552_v3  ;;  %5115 = vmatmul.msk.f32.gmra.mxu3 %vm339_vm0, %v6552_v3  ;;  %v587_v29 = vadd.f32 %v586_v63, %v585_v1  ;;  %v663_v30 = vsel %vm662_vm3, %v5612_v56, %v659_v19  ;;  %v666_v31 = vmul.f32 %v5614_v17, %v665_v9  ;;  %v6662_v9 = vpop.f32.mrf.mxu1 }
 0x1ff   : > { %v694_v36 = vmul.f32 %v663_v30, %v6403_v12  ;;  %v695_v11 = vmul.f32 %v663_v30, %v6398_v23  ;;  %v761_v23 = vld [vmem:[#allocation7 + $0xa8] sm:$0xff]  ;;  %1111 = vmatpush.msrb.mxu0 %v756_v57  ;;  %1241 = vmatpush.msrb.mxu2 %v764_v26  ;;  %v782_v26 = vld [vmem:[#allocation7 + $0x150] sm:$0xff] }
 0x200   : > { %v595_v34 = vmul.f32 0.001953125, %v587_v29  ;;  %v667_v24 = vmul.f32 0.5, %v666_v31  ;;  %1175 = vmatpush.msrb.mxu1 %v761_v23 }
 0x201   : > { %v714_v37 = vmul.f32 %v6400_v25, %v694_v36  ;;  %v715_v53 = vmul.f32 %v6400_v25, %v695_v11  ;;  %1368 = vmatpush.msra.mxu0 %v775_v21  ;;  %v783_v36 = vld [vmem:[#allocation7 + $0x158] sm:$0xff]  ;;  %v773_v21 = vld [vmem:[#allocation7 + $0x108] sm:$0xff] }
 0x202   : > { %v603_v54 = vadd.f32 1e-05, %v595_v34  ;;  %v668_v12 = vsub.f32 1.5, %v667_v24  ;;  %1176 = vmatpush.msrb.mxu1 %v760_v8  ;;  %v779_v34 = vld [vmem:[#allocation7 + $0x138] sm:$0xff]  ;;  %1498 = vmatpush.msra.mxu2 %v783_v36 }
 0x203   : > { %v6581_v39 = vadd.f32 %v6410_v27, %v714_v37  ;;  %v6594_v48 = vadd.f32 %v6410_v27, %v715_v53 }
 0x204   : > { %5615 = vrsqrt.f32 %v603_v54  ;;  %v669_v41 = vmul.f32 %v5614_v17, %v668_v12  ;;  %vm680_vm8 = vweird.f32 %v603_v54  ;;  %1433 = vmatpush.msra.mxu1 %v779_v34  ;;  %1499 = vmatpush.msra.mxu2 %v782_v26 }
 0x205   : > { %5068 = vmatmul.msk.f32.gmra.mxu0 %vm339_vm0, %v6567_v35  ;;  %5084 = vmatmul.msk.f32.gmra.mxu1 %vm339_vm0, %v6567_v35 }
 0x206   : > { %5100 = vmatmul.msk.f32.gmra.mxu2 %vm339_vm0, %v6567_v35  ;;  %5116 = vmatmul.msk.f32.gmra.mxu3 %vm339_vm0, %v6567_v35  ;;  %v673_v47 = vsel %vm672_vm6, %v5614_v17, %v669_v41  ;;  %v6649_v17 = vpop.f32.mrf.mxu2  ;;  %v6682_v46 = vpop.f32.mrf.mxu1 }
 0x207   : > { %v696_v55 = vmul.f32 %v673_v47, %v6426_v60  ;;  %v768_v60 = vld [vmem:[#allocation7 + $0xe0] sm:$0xff]  ;;  %v697_v61 = vmul.f32 %v673_v47, %v6423_v58  ;;  %8547 = vst [vmem:[#allocation15_spill] sm:$0xff] %v6649_v17  ;;  %v774_v47 = vld [vmem:[#allocation7 + $0x110] sm:$0xff] }
 0x208   : > { %1306 = vmatpush.msrb.mxu3 %v768_v60  ;;  %1369 = vmatpush.msra.mxu0 %v774_v47 }
 0x209   : > { %v716_v14 = vmul.f32 %v6400_v25, %v696_v55  ;;  %v717_v58 = vmul.f32 %v6400_v25, %v697_v61 }
 0x20a   : > { %v5616_v38 = vpop.eup %5615  ;;  %1370 = vmatpush.msra.mxu0 %v773_v21  ;;  %v781_v21 = vld [vmem:[#allocation7 + $0x148] sm:$0xff] }
 0x20b   : > { %v675_v42 = vmul.f32 %v5616_v38, %v603_v54  ;;  %v6608_v62 = vadd.f32 %v6410_v27, %v716_v14  ;;  %vm681_vm7 = vweird.f32 %v5616_v38  ;;  %v6620_v16 = vadd.f32 %v6410_v27, %v717_v58  ;;  %v787_v54 = vld [vmem:[#allocation7 + $0x178] sm:$0xff]  ;;  %v786_v14 = vld [vmem:[#allocation7 + $0x170] sm:$0xff]  ;;  %1500 = vmatpush.msra.mxu2 %v781_v21 }
 0x20c   : > { %vm682_vm9 = vmor %vm680_vm8, %vm681_vm7  ;;  %1563 = vmatpush.msra.mxu3 %v787_v54 }
 0x20d   : > { %5069 = vmatmul.msk.f32.gmra.mxu0 %vm339_vm0, %v6581_v39  ;;  %5085 = vmatmul.msk.f32.gmra.mxu1 %vm339_vm0, %v6581_v39  ;;  %v676_v20 = vmul.f32 %v5616_v38, %v675_v42 }
 0x20e   : > { %5101 = vmatmul.msk.f32.gmra.mxu2 %vm339_vm0, %v6581_v39  ;;  %5117 = vmatmul.msk.f32.gmra.mxu3 %vm339_vm0, %v6581_v39  ;;  %v6698_v31 = vpop.f32.mrf.mxu1 }
 0x20f   : > { %v677_v56 = vmul.f32 0.5, %v676_v20  ;;  %1564 = vmatpush.msra.mxu3 %v786_v14 }
 0x211   : > { %v678_v22 = vsub.f32 1.5, %v677_v56  ;;  %v778_v56 = vld [vmem:[#allocation7 + $0x130] sm:$0xff] }
 0x212   : > { %1434 = vmatpush.msra.mxu1 %v778_v56  ;;  %v777_v56 = vld [vmem:[#allocation7 + $0x128] sm:$0xff] }
 0x213   : > { %v679_v0 = vmul.f32 %v5616_v38, %v678_v22 }
 0x214   : > { %1435 = vmatpush.msra.mxu1 %v777_v56 }
 0x215   : > { %5070 = vmatmul.msk.f32.gmra.mxu0 %vm339_vm0, %v6594_v48  ;;  %5086 = vmatmul.msk.f32.gmra.mxu1 %vm339_vm0, %v6594_v48  ;;  %v683_v43 = vsel %vm682_vm9, %v5616_v38, %v679_v0 }
 0x216   : > { %5102 = vmatmul.msk.f32.gmra.mxu2 %vm339_vm0, %v6594_v48  ;;  %5118 = vmatmul.msk.f32.gmra.mxu3 %vm339_vm0, %v6594_v48  ;;  %v698_v4 = vmul.f32 %v683_v43, %v6463_v33  ;;  %v699_v1 = vmul.f32 %v683_v43, %v6466_v10  ;;  %v6636_v33 = vpop.f32.mrf.mxu0  ;;  %v6714_v12 = vpop.f32.mrf.mxu1 }
 0x218   : > { %v718_v5 = vmul.f32 %v6400_v25, %v698_v4  ;;  %v719_v10 = vmul.f32 %v6400_v25, %v699_v1  ;;  %v6668_v25 = vpop.f32.mrf.mxu2 }
 0x219   : > { %8549 = vst [vmem:[#allocation17_spill] sm:$0xff] %v6668_v25 }
 0x21a   : > { %v6634_v7 = vadd.f32 %v6410_v27, %v718_v5  ;;  %v6654_v18 = vadd.f32 %v6410_v27, %v719_v10  ;;  %v6670_v27 = vpop.f32.mrf.mxu3 }
 0x21b   : > { %8550 = vst [vmem:[#allocation18_spill] sm:$0xff] %v6670_v27 }
 0x21d   : > { %5071 = vmatmul.msk.f32.gmra.mxu0 %vm339_vm0, %v6608_v62  ;;  %5087 = vmatmul.msk.f32.gmra.mxu1 %vm339_vm0, %v6608_v62 }
 0x21e   : > { %5103 = vmatmul.msk.f32.gmra.mxu2 %vm339_vm0, %v6608_v62  ;;  %5119 = vmatmul.msk.f32.gmra.mxu3 %vm339_vm0, %v6608_v62  ;;  %v6660_v19 = vpop.f32.mrf.mxu0  ;;  %v6734_v42 = vpop.f32.mrf.mxu1 }
 0x220   : > { %v6692_v28 = vpop.f32.mrf.mxu2 }
 0x221   : > { %8551 = vst [vmem:[#allocation19_spill] sm:$0xff] %v6692_v28 }
 0x222   : > { %v6694_v29 = vpop.f32.mrf.mxu3 }
 0x223   : > { %8552 = vst [vmem:[#allocation20_spill] sm:$0xff] %v6694_v29 }
 0x225   : > { %5072 = vmatmul.msk.f32.gmra.mxu0 %vm339_vm0, %v6620_v16  ;;  %5088 = vmatmul.msk.f32.gmra.mxu1 %vm339_vm0, %v6620_v16 }
 0x226   : > { %5104 = vmatmul.msk.f32.gmra.mxu2 %vm339_vm0, %v6620_v16  ;;  %5120 = vmatmul.msk.f32.gmra.mxu3 %vm339_vm0, %v6620_v16  ;;  %v6680_v63 = vpop.f32.mrf.mxu0  ;;  %v6754_v53 = vpop.f32.mrf.mxu1 }
 0x228   : > { %v6708_v24 = vpop.f32.mrf.mxu2 }
 0x229   : > { %8553 = vst [vmem:[#allocation21_spill] sm:$0xff] %v6708_v24 }
 0x22a   : > { %v6710_v13 = vpop.f32.mrf.mxu3 }
 0x22b   : > { %8554 = vst [vmem:[#allocation22_spill] sm:$0xff] %v6710_v13  ;;  %v784_v13 = vld [vmem:[#allocation7 + $0x160] sm:$0xff] }
 0x22d   : > { %5073 = vmatmul.msk.f32.gmra.mxu0 %vm339_vm0, %v6634_v7  ;;  %5089 = vmatmul.msk.f32.gmra.mxu1 %vm339_vm0, %v6634_v7 }
 0x22e   : > { %5105 = vmatmul.msk.f32.gmra.mxu2 %vm339_vm0, %v6634_v7  ;;  %5121 = vmatmul.msk.f32.gmra.mxu3 %vm339_vm0, %v6634_v7  ;;  %v6696_v30 = vpop.f32.mrf.mxu0  ;;  %v6770_v8 = vpop.f32.mrf.mxu1 }
 0x230   : > { %v6724_v38 = vpop.f32.mrf.mxu2 }
 0x231   : > { %8555 = vst [vmem:[#allocation23_spill] sm:$0xff] %v6724_v38 }
 0x232   : > { %v6726_v11 = vpop.f32.mrf.mxu3 }
 0x233   : > { %8556 = vst [vmem:[#allocation24_spill] sm:$0xff] %v6726_v11 }
 0x235   : > { %5074 = vmatmul.msk.f32.gmra.mxu0 %vm339_vm0, %v6654_v18  ;;  %5090 = vmatmul.msk.f32.gmra.mxu1 %vm339_vm0, %v6654_v18 }
 0x236   : > { %5106 = vmatmul.msk.f32.gmra.mxu2 %vm339_vm0, %v6654_v18  ;;  %5122 = vmatmul.msk.f32.gmra.mxu3 %vm339_vm0, %v6654_v18  ;;  %v6712_v37 = vpop.f32.mrf.mxu0 }
 0x238   : > { %v6740_v23 = vpop.f32.mrf.mxu2 }
 0x239   : > { %8557 = vst [vmem:[#allocation25_spill] sm:$0xff] %v6740_v23 }
 0x23a   : > { %v6742_v44 = vpop.f32.mrf.mxu3 }
 0x23b   : > { %8558 = vst [vmem:[#allocation26_spill] sm:$0xff] %v6742_v44  ;;  %v780_v44 = vld [vmem:[#allocation7 + $0x140] sm:$0xff] }
 0x23c   : > { %1501 = vmatpush.msra.mxu2 %v780_v44 }
 0x23d   : > { %5123 = vmatmul.msk.f32.vlgmr.msrb.gmra.mxu0 %vm339_vm0, %v6420_v50  ;;  %5139 = vmatmul.msk.f32.vlgmr.msrb.gmra.mxu1 %vm339_vm0, %v6420_v50 }
 0x23e   : > { %5155 = vmatmul.msk.f32.vlgmr.msrb.gmra.mxu2 %vm339_vm0, %v6420_v50  ;;  %5171 = vmatmul.msk.f32.vlgmr.msrb.gmra.mxu3 %vm339_vm0, %v6420_v50  ;;  %v6732_v41 = vpop.f32.mrf.mxu0 }
 0x240   : > { %v6764_v20 = vpop.f32.mrf.mxu2 }
 0x241   : > { %8559 = vst [vmem:[#allocation27_spill] sm:$0xff] %v6764_v20 }
 0x242   : > { %v6766_v55 = vpop.f32.mrf.mxu3 }
 0x243   : > { %8560 = vst [vmem:[#allocation28_spill] sm:$0xff] %v6766_v55 }
 0x245   : > { %5124 = vmatmul.msk.f32.gmra.mxu0 %vm339_vm0, %v6446_v6  ;;  %5140 = vmatmul.msk.f32.gmra.mxu1 %vm339_vm0, %v6446_v6 }
 0x246   : > { %5156 = vmatmul.msk.f32.gmra.mxu2 %vm339_vm0, %v6446_v6  ;;  %5172 = vmatmul.msk.f32.gmra.mxu3 %vm339_vm0, %v6446_v6  ;;  %v6752_v45 = vpop.f32.mrf.mxu0 }
 0x248   : > { %v6780_v60 = vpop.f32.mrf.mxu2 }
 0x249   : > { %8561 = vst [vmem:[#allocation29_spill] sm:$0xff] %v6780_v60 }
 0x24a   : > { %v6782_v22 = vpop.f32.mrf.mxu3 }
 0x24b   : > { %8562 = vst [vmem:[#allocation30_spill] sm:$0xff] %v6782_v22  ;;  %v776_v22 = vld [vmem:[#allocation7 + $0x120] sm:$0xff] }
 0x24c   : > { %1436 = vmatpush.msra.mxu1 %v776_v22 }
 0x24d   : > { %5125 = vmatmul.msk.f32.gmra.mxu0 %vm339_vm0, %v6460_v32  ;;  %5141 = vmatmul.msk.f32.gmra.mxu1 %vm339_vm0, %v6460_v32 }
 0x24e   : > { %5157 = vmatmul.msk.f32.gmra.mxu2 %vm339_vm0, %v6460_v32  ;;  %5173 = vmatmul.msk.f32.gmra.mxu3 %vm339_vm0, %v6460_v32  ;;  %v6768_v57 = vpop.f32.mrf.mxu0 }
 0x255   : > { %5126 = vmatmul.msk.f32.gmra.mxu0 %vm339_vm0, %v6484_v40  ;;  %5142 = vmatmul.msk.f32.gmra.mxu1 %vm339_vm0, %v6484_v40 }
 0x256   : > { %5158 = vmatmul.msk.f32.gmra.mxu2 %vm339_vm0, %v6484_v40  ;;  %5174 = vmatmul.msk.f32.gmra.mxu3 %vm339_vm0, %v6484_v40 }
 0x25d   : > { %5127 = vmatmul.msk.f32.gmra.mxu0 %vm339_vm0, %v6498_v59  ;;  %5143 = vmatmul.msk.f32.gmra.mxu1 %vm339_vm0, %v6498_v59 }
 0x25e   : > { %5159 = vmatmul.msk.f32.gmra.mxu2 %vm339_vm0, %v6498_v59  ;;  %5175 = vmatmul.msk.f32.gmra.mxu3 %vm339_vm0, %v6498_v59 }
 0x265   : > { %5128 = vmatmul.msk.f32.gmra.mxu0 %vm339_vm0, %v6510_v51  ;;  %5144 = vmatmul.msk.f32.gmra.mxu1 %vm339_vm0, %v6510_v51 }
 0x266   : > { %5160 = vmatmul.msk.f32.gmra.mxu2 %vm339_vm0, %v6510_v51  ;;  %5176 = vmatmul.msk.f32.gmra.mxu3 %vm339_vm0, %v6510_v51 }
 0x26d   : > { %5129 = vmatmul.msk.f32.gmra.mxu0 %vm339_vm0, %v6524_v2  ;;  %5145 = vmatmul.msk.f32.gmra.mxu1 %vm339_vm0, %v6524_v2 }
 0x26e   : > { %5161 = vmatmul.msk.f32.gmra.mxu2 %vm339_vm0, %v6524_v2  ;;  %5177 = vmatmul.msk.f32.gmra.mxu3 %vm339_vm0, %v6524_v2 }
 0x275   : > { %5130 = vmatmul.msk.f32.gmra.mxu0 %vm339_vm0, %v6536_v52  ;;  %5146 = vmatmul.msk.f32.gmra.mxu1 %vm339_vm0, %v6536_v52 }
 0x276   : > { %5162 = vmatmul.msk.f32.gmra.mxu2 %vm339_vm0, %v6536_v52  ;;  %5178 = vmatmul.msk.f32.gmra.mxu3 %vm339_vm0, %v6536_v52 }
 0x27a   : > { %v6784_v61 = vpop.f32.mrf.mxu0  ;;  %v6786_v0 = vpop.f32.mrf.mxu1 }
 0x27d   : > { %5131 = vmatmul.msk.f32.gmra.mxu0 %vm339_vm0, %v6552_v3  ;;  %5147 = vmatmul.msk.f32.gmra.mxu1 %vm339_vm0, %v6552_v3 }
 0x27e   : > { %5163 = vmatmul.msk.f32.gmra.mxu2 %vm339_vm0, %v6552_v3  ;;  %5179 = vmatmul.msk.f32.gmra.mxu3 %vm339_vm0, %v6552_v3 }
 0x281   : > { %v6796_v58 = vpop.f32.mrf.mxu2  ;;  %v6798_v43 = vpop.f32.mrf.mxu3 }
 0x282   : > { %8563 = vst [vmem:[#allocation31_spill] sm:$0xff] %v6796_v58  ;;  %v6800_v4 = vpop.f32.mrf.mxu0  ;;  %v6802_v5 = vpop.f32.mrf.mxu1 }
 0x283   : > { %8564 = vst [vmem:[#allocation32_spill] sm:$0xff] %v6798_v43 }
 0x284   : > { %8565 = vst [vmem:[#allocation33_spill] sm:$0xff] %v6802_v5 }
 0x285   : > { %5132 = vmatmul.msk.f32.gmra.mxu0 %vm339_vm0, %v6567_v35  ;;  %5148 = vmatmul.msk.f32.gmra.mxu1 %vm339_vm0, %v6567_v35 }
 0x286   : > { %5164 = vmatmul.msk.f32.gmra.mxu2 %vm339_vm0, %v6567_v35  ;;  %5180 = vmatmul.msk.f32.gmra.mxu3 %vm339_vm0, %v6567_v35 }
 0x289   : > { %v6812_v1 = vpop.f32.mrf.mxu2  ;;  %v6814_v10 = vpop.f32.mrf.mxu3 }
 0x28a   : > { %8566 = vst [vmem:[#allocation34_spill] sm:$0xff] %v6812_v1  ;;  %v6816_v34 = vpop.f32.mrf.mxu0  ;;  %v6818_v36 = vpop.f32.mrf.mxu1 }
 0x28b   : > { %8567 = vst [vmem:[#allocation35_spill] sm:$0xff] %v6814_v10  ;;  %v785_v10 = vld [vmem:[#allocation7 + $0x168] sm:$0xff] }
 0x28c   : > { %1565 = vmatpush.msra.mxu3 %v785_v10  ;;  %v772_v10 = vld [vmem:[#allocation7 + $0x100] sm:$0xff] }
 0x28d   : > { %5133 = vmatmul.msk.f32.gmra.mxu0 %vm339_vm0, %v6581_v39  ;;  %5149 = vmatmul.msk.f32.gmra.mxu1 %vm339_vm0, %v6581_v39 }
 0x28e   : > { %5165 = vmatmul.msk.f32.gmra.mxu2 %vm339_vm0, %v6581_v39  ;;  %5181 = vmatmul.msk.f32.gmra.mxu3 %vm339_vm0, %v6581_v39 }
 0x28f   : > { %1371 = vmatpush.msra.mxu0 %v772_v10  ;;  %1566 = vmatpush.msra.mxu3 %v784_v13 }
 0x291   : > { %v6828_v54 = vpop.f32.mrf.mxu2  ;;  %v6830_v47 = vpop.f32.mrf.mxu3 }
 0x292   : > { %8568 = vst [vmem:[#allocation36_spill] sm:$0xff] %v6828_v54  ;;  %v6832_v26 = vpop.f32.mrf.mxu0  ;;  %v6834_v14 = vpop.f32.mrf.mxu1 }
 0x293   : > { %8569 = vst [vmem:[#allocation37_spill] sm:$0xff] %v6830_v47 }
 0x294   : > { %8570 = vst [vmem:[#allocation38_spill] sm:$0xff] %v6834_v14 }
 0x295   : > { %5134 = vmatmul.msk.f32.gmra.mxu0 %vm339_vm0, %v6594_v48  ;;  %5150 = vmatmul.msk.f32.gmra.mxu1 %vm339_vm0, %v6594_v48 }
 0x296   : > { %5166 = vmatmul.msk.f32.gmra.mxu2 %vm339_vm0, %v6594_v48  ;;  %5182 = vmatmul.msk.f32.gmra.mxu3 %vm339_vm0, %v6594_v48 }
 0x299   : > { %v6844_v47 = vpop.f32.mrf.mxu2  ;;  %v6846_v43 = vpop.f32.mrf.mxu3 }
 0x29a   : > { %8571 = vst [vmem:[#allocation39_spill] sm:$0xff] %v6844_v47  ;;  %v6848_v56 = vpop.f32.mrf.mxu0  ;;  %v6850_v21 = vpop.f32.mrf.mxu1 }
 0x29b   : > { %8572 = vst [vmem:[#allocation40_spill] sm:$0xff] %v6846_v43 }
 0x29d   : > { %5135 = vmatmul.msk.f32.gmra.mxu0 %vm339_vm0, %v6608_v62  ;;  %5151 = vmatmul.msk.f32.gmra.mxu1 %vm339_vm0, %v6608_v62 }
 0x29e   : > { %5167 = vmatmul.msk.f32.gmra.mxu2 %vm339_vm0, %v6608_v62  ;;  %5183 = vmatmul.msk.f32.gmra.mxu3 %vm339_vm0, %v6608_v62 }
 0x2a1   : > { %v6860_v43 = vpop.f32.mrf.mxu2  ;;  %v6862_v27 = vpop.f32.mrf.mxu3 }
 0x2a2   : > { %8573 = vst [vmem:[#allocation41_spill] sm:$0xff] %v6860_v43  ;;  %v6864_v22 = vpop.f32.mrf.mxu0  ;;  %v6866_v44 = vpop.f32.mrf.mxu1 }
 0x2a3   : > { %8574 = vst [vmem:[#allocation42_spill] sm:$0xff] %v6862_v27 }
 0x2a4   : > { %8575 = vst [vmem:[#allocation43_spill] sm:$0xff] %v6866_v44 }
 0x2a5   : > { %5136 = vmatmul.msk.f32.gmra.mxu0 %vm339_vm0, %v6620_v16  ;;  %5152 = vmatmul.msk.f32.gmra.mxu1 %vm339_vm0, %v6620_v16 }
 0x2a6   : > { %5168 = vmatmul.msk.f32.gmra.mxu2 %vm339_vm0, %v6620_v16  ;;  %5184 = vmatmul.msk.f32.gmra.mxu3 %vm339_vm0, %v6620_v16 }
 0x2a9   : > { %v6876_v13 = vpop.f32.mrf.mxu2  ;;  %v6878_v10 = vpop.f32.mrf.mxu3 }
 0x2aa   : > { %8576 = vst [vmem:[#allocation44_spill] sm:$0xff] %v6876_v13  ;;  %v6880_v27 = vpop.f32.mrf.mxu0  ;;  %v6882_v55 = vpop.f32.mrf.mxu1 }
 0x2ab   : > { %8577 = vst [vmem:[#allocation45_spill] sm:$0xff] %v6878_v10 }
 0x2ad   : > { %5137 = vmatmul.msk.f32.gmra.mxu0 %vm339_vm0, %v6634_v7  ;;  %5153 = vmatmul.msk.f32.gmra.mxu1 %vm339_vm0, %v6634_v7 }
 0x2ae   : > { %5169 = vmatmul.msk.f32.gmra.mxu2 %vm339_vm0, %v6634_v7  ;;  %5185 = vmatmul.msk.f32.gmra.mxu3 %vm339_vm0, %v6634_v7 }
 0x2b1   : > { %v6892_v11 = vpop.f32.mrf.mxu2  ;;  %v6894_v29 = vpop.f32.mrf.mxu3 }
 0x2b2   : > { %8578 = vst [vmem:[#allocation46_spill] sm:$0xff] %v6892_v11  ;;  %v6896_v10 = vpop.f32.mrf.mxu0  ;;  %v6898_v49 = vpop.f32.mrf.mxu1 }
 0x2b3   : > { %8579 = vst [vmem:[#allocation47_spill] sm:$0xff] %v6894_v29 }
 0x2b4   : > { %8580 = vst [vmem:[#allocation48_spill] sm:$0xff] %v6898_v49 }
 0x2b5   : > { %5138 = vmatmul.msk.f32.gmra.mxu0 %vm339_vm0, %v6654_v18  ;;  %5154 = vmatmul.msk.f32.gmra.mxu1 %vm339_vm0, %v6654_v18 }
 0x2b6   : > { %5170 = vmatmul.msk.f32.gmra.mxu2 %vm339_vm0, %v6654_v18  ;;  %5186 = vmatmul.msk.f32.gmra.mxu3 %vm339_vm0, %v6654_v18 }
 0x2b9   : > { %v6908_v13 = vpop.f32.mrf.mxu2  ;;  %v6910_v47 = vpop.f32.mrf.mxu3 }
 0x2ba   : > { %8581 = vst [vmem:[#allocation49_spill] sm:$0xff] %v6908_v13  ;;  %v1113_v29 = vpop.f32.mrf.mxu0  ;;  %v6912_v1 = vpop.f32.mrf.mxu1 }
 0x2bb   : > { %8582 = vst [vmem:[#allocation50_spill] sm:$0xff] %v6910_v47 }
 0x2bd   : > { %5187 = vmatmul.msk.f32.vlgmr.msra.gmra.mxu0 %vm339_vm0, %v6420_v50  ;;  %5203 = vmatmul.msk.f32.vlgmr.msra.gmra.mxu1 %vm339_vm0, %v6420_v50 }
 0x2be   : > { %5219 = vmatmul.msk.f32.vlgmr.msra.gmra.mxu2 %vm339_vm0, %v6420_v50  ;;  %5235 = vmatmul.msk.f32.vlgmr.msra.gmra.mxu3 %vm339_vm0, %v6420_v50 }
 0x2c1   : > { %v6922_v11 = vpop.f32.mrf.mxu2  ;;  %v6924_v13 = vpop.f32.mrf.mxu3 }
 0x2c2   : > { %8583 = vst [vmem:[#allocation51_spill] sm:$0xff] %v6924_v13  ;;  %v1116_v47 = vpop.f32.mrf.mxu0  ;;  %v6926_v43 = vpop.f32.mrf.mxu1 }
 0x2c3   : > { %5251 = vmatpush.xpose.msk.msrb.mxu0 %vm339_vm0, %v1116_v47 }
 0x2c5   : > { %5188 = vmatmul.msk.f32.gmra.mxu0 %vm339_vm0, %v6446_v6  ;;  %5204 = vmatmul.msk.f32.gmra.mxu1 %vm339_vm0, %v6446_v6 }
 0x2c6   : > { %5220 = vmatmul.msk.f32.gmra.mxu2 %vm339_vm0, %v6446_v6  ;;  %5236 = vmatmul.msk.f32.gmra.mxu3 %vm339_vm0, %v6446_v6 }
 0x2c7   : > { %5252 = vmatpush.xpose.msk.msrb.mxu0 %vm339_vm0, %v1113_v29 }
 0x2c9   : > { %v6938_v50 = vpop.f32.mrf.mxu2  ;;  %v6940_v54 = vpop.f32.mrf.mxu3 }
 0x2ca   : > { %8584 = vst [vmem:[#allocation52_spill] sm:$0xff] %v6940_v54  ;;  %v1119_v58 = vpop.f32.mrf.mxu0  ;;  %v6942_v47 = vpop.f32.mrf.mxu1 }
 0x2cd   : > { %5189 = vmatmul.msk.f32.gmra.mxu0 %vm339_vm0, %v6460_v32  ;;  %5205 = vmatmul.msk.f32.gmra.mxu1 %vm339_vm0, %v6460_v32 }
 0x2ce   : > { %5221 = vmatmul.msk.f32.gmra.mxu2 %vm339_vm0, %v6460_v32  ;;  %5237 = vmatmul.msk.f32.gmra.mxu3 %vm339_vm0, %v6460_v32 }
 0x2d1   : > { %v6952_v6 = vpop.f32.mrf.mxu2  ;;  %v6954_v29 = vpop.f32.mrf.mxu3 }
 0x2d2   : > { %8585 = vst [vmem:[#allocation53_spill] sm:$0xff] %v6954_v29  ;;  %v1122_v60 = vpop.f32.mrf.mxu0  ;;  %v6956_v23 = vpop.f32.mrf.mxu1 }
 0x2d3   : > { %5255 = vmatpush.xpose.msk.msrb.mxu1 %vm339_vm0, %v1122_v60 }
 0x2d5   : > { %5190 = vmatmul.msk.f32.gmra.mxu0 %vm339_vm0, %v6484_v40  ;;  %5206 = vmatmul.msk.f32.gmra.mxu1 %vm339_vm0, %v6484_v40 }
 0x2d6   : > { %5222 = vmatmul.msk.f32.gmra.mxu2 %vm339_vm0, %v6484_v40  ;;  %5238 = vmatmul.msk.f32.gmra.mxu3 %vm339_vm0, %v6484_v40 }
 0x2d7   : > { %5256 = vmatpush.xpose.msk.msrb.mxu1 %vm339_vm0, %v1119_v58 }
 0x2d9   : > { %v6968_v32 = vpop.f32.mrf.mxu2  ;;  %v6970_v24 = vpop.f32.mrf.mxu3 }
 0x2da   : > { %8586 = vst [vmem:[#allocation54_spill] sm:$0xff] %v6970_v24  ;;  %v1125_v25 = vpop.f32.mrf.mxu0  ;;  %v6972_v60 = vpop.f32.mrf.mxu1 }
 0x2dd   : > { %5191 = vmatmul.msk.f32.gmra.mxu0 %vm339_vm0, %v6498_v59  ;;  %5207 = vmatmul.msk.f32.gmra.mxu1 %vm339_vm0, %v6498_v59 }
 0x2de   : > { %5223 = vmatmul.msk.f32.gmra.mxu2 %vm339_vm0, %v6498_v59  ;;  %5239 = vmatmul.msk.f32.gmra.mxu3 %vm339_vm0, %v6498_v59 }
 0x2e1   : > { %v6982_v40 = vpop.f32.mrf.mxu2  ;;  %v6984_v58 = vpop.f32.mrf.mxu3 }
 0x2e2   : > { %8587 = vst [vmem:[#allocation55_spill] sm:$0xff] %v6984_v58  ;;  %v1128_v29 = vpop.f32.mrf.mxu0  ;;  %v6986_v13 = vpop.f32.mrf.mxu1 }
 0x2e3   : > { %5259 = vmatpush.xpose.msk.msrb.mxu2 %vm339_vm0, %v1128_v29 }
 0x2e5   : > { %5192 = vmatmul.msk.f32.gmra.mxu0 %vm339_vm0, %v6510_v51  ;;  %5208 = vmatmul.msk.f32.gmra.mxu1 %vm339_vm0, %v6510_v51 }
 0x2e6   : > { %5224 = vmatmul.msk.f32.gmra.mxu2 %vm339_vm0, %v6510_v51  ;;  %5240 = vmatmul.msk.f32.gmra.mxu3 %vm339_vm0, %v6510_v51 }
 0x2e7   : > { %5260 = vmatpush.xpose.msk.msrb.mxu2 %vm339_vm0, %v1125_v25 }
 0x2e9   : > { %v6998_v59 = vpop.f32.mrf.mxu2  ;;  %v7000_v58 = vpop.f32.mrf.mxu3 }
 0x2ea   : > { %8588 = vst [vmem:[#allocation56_spill] sm:$0xff] %v7000_v58  ;;  %v1131_v24 = vpop.f32.mrf.mxu0  ;;  %v7002_v29 = vpop.f32.mrf.mxu1 }
 0x2ed   : > { %5193 = vmatmul.msk.f32.gmra.mxu0 %vm339_vm0, %v6524_v2  ;;  %5209 = vmatmul.msk.f32.gmra.mxu1 %vm339_vm0, %v6524_v2 }
 0x2ee   : > { %5225 = vmatmul.msk.f32.gmra.mxu2 %vm339_vm0, %v6524_v2  ;;  %5241 = vmatmul.msk.f32.gmra.mxu3 %vm339_vm0, %v6524_v2 }
 0x2f1   : > { %v7012_v51 = vpop.f32.mrf.mxu2  ;;  %v7014_v25 = vpop.f32.mrf.mxu3 }
 0x2f2   : > { %8589 = vst [vmem:[#allocation57_spill] sm:$0xff] %v7014_v25  ;;  %v1134_v58 = vpop.f32.mrf.mxu0  ;;  %v7016_v54 = vpop.f32.mrf.mxu1 }
 0x2f3   : > { %5263 = vmatpush.xpose.msk.msrb.mxu3 %vm339_vm0, %v1134_v58 }
 0x2f5   : > { %5194 = vmatmul.msk.f32.gmra.mxu0 %vm339_vm0, %v6536_v52  ;;  %5210 = vmatmul.msk.f32.gmra.mxu1 %vm339_vm0, %v6536_v52 }
 0x2f6   : > { %5226 = vmatmul.msk.f32.gmra.mxu2 %vm339_vm0, %v6536_v52  ;;  %5242 = vmatmul.msk.f32.gmra.mxu3 %vm339_vm0, %v6536_v52 }
 0x2f7   : > { %5264 = vmatpush.xpose.msk.msrb.mxu3 %vm339_vm0, %v1131_v24 }
 0x2f9   : > { %v7028_v2 = vpop.f32.mrf.mxu2  ;;  %v7030_v25 = vpop.f32.mrf.mxu3 }
 0x2fa   : > { %8590 = vst [vmem:[#allocation58_spill] sm:$0xff] %v7030_v25  ;;  %v1137_v20 = vpop.f32.mrf.mxu0  ;;  %v7032_v58 = vpop.f32.mrf.mxu1 }
 0x2fd   : > { %5195 = vmatmul.msk.f32.gmra.mxu0 %vm339_vm0, %v6552_v3  ;;  %5211 = vmatmul.msk.f32.gmra.mxu1 %vm339_vm0, %v6552_v3 }
 0x2fe   : > { %5227 = vmatmul.msk.f32.gmra.mxu2 %vm339_vm0, %v6552_v3  ;;  %5243 = vmatmul.msk.f32.gmra.mxu3 %vm339_vm0, %v6552_v3 }
 0x301   : > { %v7042_v52 = vpop.f32.mrf.mxu2  ;;  %v7044_v24 = vpop.f32.mrf.mxu3 }
 0x302   : > { %8591 = vst [vmem:[#allocation59_spill] sm:$0xff] %v7044_v24  ;;  %v1140_v25 = vpop.f32.mrf.mxu0  ;;  %v7046_v38 = vpop.f32.mrf.mxu1 }
 0x303   : > { %5267 = vmatpush.xpose.msk.msra.mxu0 %vm339_vm0, %v1140_v25 }
 0x305   : > { %5196 = vmatmul.msk.f32.gmra.mxu0 %vm339_vm0, %v6567_v35  ;;  %5212 = vmatmul.msk.f32.gmra.mxu1 %vm339_vm0, %v6567_v35 }
 0x306   : > { %5228 = vmatmul.msk.f32.gmra.mxu2 %vm339_vm0, %v6567_v35  ;;  %5244 = vmatmul.msk.f32.gmra.mxu3 %vm339_vm0, %v6567_v35 }
 0x307   : > { %5268 = vmatpush.xpose.msk.msra.mxu0 %vm339_vm0, %v1137_v20 }
 0x309   : > { %v7058_v3 = vpop.f32.mrf.mxu2  ;;  %v7060_v24 = vpop.f32.mrf.mxu3 }
 0x30a   : > { %8592 = vst [vmem:[#allocation60_spill] sm:$0xff] %v7060_v24  ;;  %v1143_v28 = vpop.f32.mrf.mxu0  ;;  %v7062_v25 = vpop.f32.mrf.mxu1 }
 0x30d   : > { %5197 = vmatmul.msk.f32.gmra.mxu0 %vm339_vm0, %v6581_v39  ;;  %5213 = vmatmul.msk.f32.gmra.mxu1 %vm339_vm0, %v6581_v39 }
 0x30e   : > { %5229 = vmatmul.msk.f32.gmra.mxu2 %vm339_vm0, %v6581_v39  ;;  %5245 = vmatmul.msk.f32.gmra.mxu3 %vm339_vm0, %v6581_v39 }
 0x311   : > { %v7072_v35 = vpop.f32.mrf.mxu2  ;;  %v7074_v20 = vpop.f32.mrf.mxu3 }
 0x312   : > { %8593 = vst [vmem:[#allocation61_spill] sm:$0xff] %v7074_v20  ;;  %v1146_v24 = vpop.f32.mrf.mxu0  ;;  %v7076_v17 = vpop.f32.mrf.mxu1 }
 0x313   : > { %5271 = vmatpush.xpose.msk.msra.mxu1 %vm339_vm0, %v1146_v24 }
 0x315   : > { %5198 = vmatmul.msk.f32.gmra.mxu0 %vm339_vm0, %v6594_v48  ;;  %5214 = vmatmul.msk.f32.gmra.mxu1 %vm339_vm0, %v6594_v48 }
 0x316   : > { %5230 = vmatmul.msk.f32.gmra.mxu2 %vm339_vm0, %v6594_v48  ;;  %5246 = vmatmul.msk.f32.gmra.mxu3 %vm339_vm0, %v6594_v48 }
 0x317   : > { %5272 = vmatpush.xpose.msk.msra.mxu1 %vm339_vm0, %v1143_v28 }
 0x319   : > { %v7088_v39 = vpop.f32.mrf.mxu2  ;;  %v7090_v20 = vpop.f32.mrf.mxu3 }
 0x31a   : > { %8594 = vst [vmem:[#allocation62_spill] sm:$0xff] %v7090_v20  ;;  %v1149_v49 = vpop.f32.mrf.mxu0  ;;  %v7092_v24 = vpop.f32.mrf.mxu1 }
 0x31d   : > { %5199 = vmatmul.msk.f32.gmra.mxu0 %vm339_vm0, %v6608_v62  ;;  %5215 = vmatmul.msk.f32.gmra.mxu1 %vm339_vm0, %v6608_v62 }
 0x31e   : > { %5231 = vmatmul.msk.f32.gmra.mxu2 %vm339_vm0, %v6608_v62  ;;  %5247 = vmatmul.msk.f32.gmra.mxu3 %vm339_vm0, %v6608_v62 }
 0x321   : > { %v7102_v48 = vpop.f32.mrf.mxu2  ;;  %v7104_v28 = vpop.f32.mrf.mxu3 }
 0x322   : > { %8595 = vst [vmem:[#allocation63_spill] sm:$0xff] %v7104_v28  ;;  %v1152_v20 = vpop.f32.mrf.mxu0  ;;  %v1217_v44 = vpop.f32.mrf.mxu1 }
 0x323   : > { %5275 = vmatpush.xpose.msk.msra.mxu2 %vm339_vm0, %v1152_v20 }
 0x325   : > { %5200 = vmatmul.msk.f32.gmra.mxu0 %vm339_vm0, %v6620_v16  ;;  %5216 = vmatmul.msk.f32.gmra.mxu1 %vm339_vm0, %v6620_v16 }
 0x326   : > { %5232 = vmatmul.msk.f32.gmra.mxu2 %vm339_vm0, %v6620_v16  ;;  %5248 = vmatmul.msk.f32.gmra.mxu3 %vm339_vm0, %v6620_v16 }
 0x327   : > { %5276 = vmatpush.xpose.msk.msra.mxu2 %vm339_vm0, %v1149_v49 }
 0x329   : > { %v7116_v62 = vpop.f32.mrf.mxu2  ;;  %v7118_v28 = vpop.f32.mrf.mxu3 }
 0x32a   : > { %8596 = vst [vmem:[#allocation64_spill] sm:$0xff] %v7118_v28  ;;  %v1155_v14 = vpop.f32.mrf.mxu0  ;;  %v1220_v20 = vpop.f32.mrf.mxu1 }
 0x32d   : > { %5201 = vmatmul.msk.f32.gmra.mxu0 %vm339_vm0, %v6634_v7  ;;  %5217 = vmatmul.msk.f32.gmra.mxu1 %vm339_vm0, %v6634_v7 }
 0x32e   : > { %5233 = vmatmul.msk.f32.gmra.mxu2 %vm339_vm0, %v6634_v7  ;;  %5249 = vmatmul.msk.f32.gmra.mxu3 %vm339_vm0, %v6634_v7 }
 0x331   : > { %v7128_v16 = vpop.f32.mrf.mxu2  ;;  %v7130_v49 = vpop.f32.mrf.mxu3 }
 0x332   : > { %8597 = vst [vmem:[#allocation65_spill] sm:$0xff] %v7128_v16  ;;  %v1158_v5 = vpop.f32.mrf.mxu0  ;;  %v1223_v28 = vpop.f32.mrf.mxu1 }
 0x333   : > { %8598 = vst [vmem:[#allocation66_spill] sm:$0xff] %v7130_v49  ;;  %5279 = vmatpush.xpose.msk.msra.mxu3 %vm339_vm0, %v1158_v5 }
 0x335   : > { %5202 = vmatmul.msk.f32.gmra.mxu0 %vm339_vm0, %v6654_v18  ;;  %5218 = vmatmul.msk.f32.gmra.mxu1 %vm339_vm0, %v6654_v18 }
 0x336   : > { %5234 = vmatmul.msk.f32.gmra.mxu2 %vm339_vm0, %v6654_v18  ;;  %5250 = vmatmul.msk.f32.gmra.mxu3 %vm339_vm0, %v6654_v18 }
 0x337   : > { %5280 = vmatpush.xpose.msk.msra.mxu3 %vm339_vm0, %v1155_v14  ;;  %v8624_v14 = vld [vmem:[#allocation48_spill] sm:$0xff] }
 0x339   : > { %v7142_v7 = vpop.f32.mrf.mxu2  ;;  %v7144_v49 = vpop.f32.mrf.mxu3 }
 0x33a   : > { %v7146_v16 = vpop.f32.mrf.mxu0  ;;  %v7148_v5 = vpop.f32.mrf.mxu1 }
 0x33b   : > { %8599 = vst [vmem:[#allocation67_spill] sm:$0xff] %v7148_v5 }
 0x33d   : > { %5253 = vmatmul.msk.f32.vlgmr.msrb.gmra.mxu0 %vm339_vm0, %v6636_v33  ;;  %5257 = vmatmul.msk.f32.vlgmr.msrb.gmra.mxu1 %vm339_vm0, %v6680_v63 }
 0x33e   : > { %5261 = vmatmul.msk.f32.vlgmr.msrb.gmra.mxu2 %vm339_vm0, %v6712_v37  ;;  %5265 = vmatmul.msk.f32.vlgmr.msrb.gmra.mxu3 %vm339_vm0, %v6752_v45 }
 0x33f   : > { %5283 = vmatpush.xpose.msk.msrb.mxu0 %vm339_vm0, %v6926_v43  ;;  %5287 = vmatpush.xpose.msk.msrb.mxu1 %vm339_vm0, %v6956_v23 }
 0x340   : > { %5291 = vmatpush.xpose.msk.msrb.mxu2 %vm339_vm0, %v6986_v13  ;;  %5295 = vmatpush.xpose.msk.msrb.mxu3 %vm339_vm0, %v7016_v54  ;;  %v8628_v13 = vld [vmem:[#allocation15_spill] sm:$0xff] }
 0x341   : > { %v7166_v33 = vpop.f32.mrf.mxu2  ;;  %v7168_v18 = vpop.f32.mrf.mxu3 }
 0x342   : > { %8600 = vst [vmem:[#allocation68_spill] sm:$0xff] %v7166_v33  ;;  %v7170_v63 = vpop.f32.mrf.mxu0  ;;  %v7172_v37 = vpop.f32.mrf.mxu1 }
 0x343   : > { %8601 = vst [vmem:[#allocation69_spill] sm:$0xff] %v7168_v18  ;;  %5284 = vmatpush.xpose.msk.msrb.mxu0 %vm339_vm0, %v6912_v1  ;;  %5288 = vmatpush.xpose.msk.msrb.mxu1 %vm339_vm0, %v6942_v47  ;;  %v8631_v47 = vld [vmem:[#allocation27_spill] sm:$0xff] }
 0x344   : > { %5292 = vmatpush.xpose.msk.msrb.mxu2 %vm339_vm0, %v6972_v60  ;;  %5296 = vmatpush.xpose.msk.msrb.mxu3 %vm339_vm0, %v7002_v29  ;;  %v8634_v60 = vld [vmem:[#allocation56_spill] sm:$0xff] }
 0x345   : > { %5254 = vmatmul.msk.f32.gmra.mxu0 %vm339_vm0, %v6660_v19  ;;  %5258 = vmatmul.msk.f32.gmra.mxu1 %vm339_vm0, %v6696_v30 }
 0x346   : > { %5262 = vmatmul.msk.f32.gmra.mxu2 %vm339_vm0, %v6732_v41  ;;  %5266 = vmatmul.msk.f32.gmra.mxu3 %vm339_vm0, %v6768_v57 }
 0x349   : > { %v7190_v23 = vpop.f32.mrf.mxu2  ;;  %v7192_v45 = vpop.f32.mrf.mxu3 }
 0x34a   : > { %8602 = vst [vmem:[#allocation70_spill] sm:$0xff] %v7190_v23  ;;  %v7194_v43 = vpop.f32.mrf.mxu0  ;;  %v7196_v1 = vpop.f32.mrf.mxu1 }
 0x34b   : > { %8603 = vst [vmem:[#allocation71_spill] sm:$0xff] %v7192_v45 }
 0x34c   : > { %8604 = vst [vmem:[#allocation72_spill] sm:$0xff] %v7196_v1 }
 0x34d   : > { %5269 = vmatmul.msk.f32.vlgmr.msra.gmra.mxu0 %vm339_vm0, %v6784_v61  ;;  %5273 = vmatmul.msk.f32.vlgmr.msra.gmra.mxu1 %vm339_vm0, %v6816_v34 }
 0x34e   : > { %5277 = vmatmul.msk.f32.vlgmr.msra.gmra.mxu2 %vm339_vm0, %v6848_v56  ;;  %5281 = vmatmul.msk.f32.vlgmr.msra.gmra.mxu3 %vm339_vm0, %v6880_v27 }
 0x34f   : > { %5299 = vmatpush.xpose.msk.msra.mxu0 %vm339_vm0, %v7046_v38  ;;  %5303 = vmatpush.xpose.msk.msra.mxu1 %vm339_vm0, %v7076_v17 }
 0x350   : > { %5307 = vmatpush.xpose.msk.msra.mxu2 %vm339_vm0, %v1217_v44  ;;  %5311 = vmatpush.xpose.msk.msra.mxu3 %vm339_vm0, %v1223_v28 }
 0x351   : > { %v7212_v19 = vpop.f32.mrf.mxu2  ;;  %v7214_v30 = vpop.f32.mrf.mxu3 }
 0x352   : > { %8605 = vst [vmem:[#allocation73_spill] sm:$0xff] %v7212_v19  ;;  %v7216_v41 = vpop.f32.mrf.mxu0  ;;  %v7218_v57 = vpop.f32.mrf.mxu1 }
 0x353   : > { %8606 = vst [vmem:[#allocation74_spill] sm:$0xff] %v7214_v30  ;;  %5300 = vmatpush.xpose.msk.msra.mxu0 %vm339_vm0, %v7032_v58  ;;  %5304 = vmatpush.xpose.msk.msra.mxu1 %vm339_vm0, %v7062_v25  ;;  %v8639_v58 = vld [vmem:[#allocation51_spill] sm:$0xff]  ;;  %v8642_v25 = vld [vmem:[#allocation57_spill] sm:$0xff] }
 0x354   : > { %8607 = vst [vmem:[#allocation75_spill] sm:$0xff] %v7218_v57  ;;  %5308 = vmatpush.xpose.msk.msra.mxu2 %vm339_vm0, %v7092_v24  ;;  %5312 = vmatpush.xpose.msk.msra.mxu3 %vm339_vm0, %v1220_v20  ;;  %v8645_v24 = vld [vmem:[#allocation25_spill] sm:$0xff] }
 0x355   : > { %5270 = vmatmul.msk.f32.gmra.mxu0 %vm339_vm0, %v6800_v4  ;;  %5274 = vmatmul.msk.f32.gmra.mxu1 %vm339_vm0, %v6832_v26  ;;  %v8623_v26 = vld [vmem:[#allocation43_spill] sm:$0xff] }
 0x356   : > { %5278 = vmatmul.msk.f32.gmra.mxu2 %vm339_vm0, %v6864_v22  ;;  %5282 = vmatmul.msk.f32.gmra.mxu3 %vm339_vm0, %v6896_v10  ;;  %v8629_v10 = vld [vmem:[#allocation19_spill] sm:$0xff] }
 0x359   : > { %v7235_v17 = vpop.f32.mrf.mxu2  ;;  %v7237_v27 = vpop.f32.mrf.mxu3 }
 0x35a   : > { %8608 = vst [vmem:[#allocation76_spill] sm:$0xff] %v7235_v17  ;;  %v7239_v38 = vpop.f32.mrf.mxu0  ;;  %v7241_v61 = vpop.f32.mrf.mxu1 }
 0x35b   : > { %8609 = vst [vmem:[#allocation77_spill] sm:$0xff] %v7237_v27 }
 0x35c   : > { %8610 = vst [vmem:[#allocation78_spill] sm:$0xff] %v7241_v61 }
 0x35d   : > { %5285 = vmatmul.msk.f32.vlgmr.msrb.gmra.mxu0 %vm339_vm0, %v6638_v15  ;;  %5289 = vmatmul.msk.f32.vlgmr.msrb.gmra.mxu1 %vm339_vm0, %v6682_v46 }
 0x35e   : > { %5293 = vmatmul.msk.f32.vlgmr.msrb.gmra.mxu2 %vm339_vm0, %v6714_v12  ;;  %5297 = vmatmul.msk.f32.vlgmr.msrb.gmra.mxu3 %vm339_vm0, %v6754_v53 }
 0x35f   : > { %5315 = vmatpush.xpose.msk.msrb.mxu0 %vm339_vm0, %v6938_v50  ;;  %5319 = vmatpush.xpose.msk.msrb.mxu1 %vm339_vm0, %v6968_v32  ;;  %v8630_v50 = vld [vmem:[#allocation23_spill] sm:$0xff]  ;;  %v8633_v32 = vld [vmem:[#allocation54_spill] sm:$0xff] }
 0x360   : > { %5323 = vmatpush.xpose.msk.msrb.mxu2 %vm339_vm0, %v6998_v59  ;;  %5327 = vmatpush.xpose.msk.msrb.mxu3 %vm339_vm0, %v7028_v2 }
 0x361   : > { %v7259_v15 = vpop.f32.mrf.mxu2  ;;  %v7261_v46 = vpop.f32.mrf.mxu3 }
 0x362   : > { %8611 = vst [vmem:[#allocation79_spill] sm:$0xff] %v7259_v15  ;;  %v7263_v12 = vpop.f32.mrf.mxu0  ;;  %v7265_v4 = vpop.f32.mrf.mxu1 }
 0x363   : > { %8612 = vst [vmem:[#allocation80_spill] sm:$0xff] %v7261_v46  ;;  %5316 = vmatpush.xpose.msk.msrb.mxu0 %vm339_vm0, %v6922_v11  ;;  %5320 = vmatpush.xpose.msk.msrb.mxu1 %vm339_vm0, %v6952_v6  ;;  %v8632_v6 = vld [vmem:[#allocation52_spill] sm:$0xff] }
 0x364   : > { %8613 = vst [vmem:[#allocation81_spill] sm:$0xff] %v7265_v4  ;;  %5324 = vmatpush.xpose.msk.msrb.mxu2 %vm339_vm0, %v6982_v40  ;;  %5328 = vmatpush.xpose.msk.msrb.mxu3 %vm339_vm0, %v7012_v51  ;;  %v8635_v40 = vld [vmem:[#allocation58_spill] sm:$0xff] }
 0x365   : > { %5286 = vmatmul.msk.f32.gmra.mxu0 %vm339_vm0, %v6662_v9  ;;  %5290 = vmatmul.msk.f32.gmra.mxu1 %vm339_vm0, %v6698_v31 }
 0x366   : > { %5294 = vmatmul.msk.f32.gmra.mxu2 %vm339_vm0, %v6734_v42  ;;  %5298 = vmatmul.msk.f32.gmra.mxu3 %vm339_vm0, %v6770_v8 }
 0x369   : > { %v7283_v11 = vpop.f32.mrf.mxu2  ;;  %v7285_v53 = vpop.f32.mrf.mxu3 }
 0x36a   : > { %8614 = vst [vmem:[#allocation82_spill] sm:$0xff] %v7283_v11  ;;  %v7287_v34 = vpop.f32.mrf.mxu0  ;;  %v7289_v54 = vpop.f32.mrf.mxu1 }
 0x36b   : > { %8615 = vst [vmem:[#allocation83_spill] sm:$0xff] %v7285_v53 }
 0x36c   : > { %8616 = vst [vmem:[#allocation84_spill] sm:$0xff] %v7289_v54 }
 0x36d   : > { %5301 = vmatmul.msk.f32.vlgmr.msra.gmra.mxu0 %vm339_vm0, %v6786_v0  ;;  %5305 = vmatmul.msk.f32.vlgmr.msra.gmra.mxu1 %vm339_vm0, %v6818_v36  ;;  %v8621_v0 = vld [vmem:[#allocation33_spill] sm:$0xff]  ;;  %v8622_v36 = vld [vmem:[#allocation38_spill] sm:$0xff] }
 0x36e   : > { %5309 = vmatmul.msk.f32.vlgmr.msra.gmra.mxu2 %vm339_vm0, %v6850_v21  ;;  %5313 = vmatmul.msk.f32.vlgmr.msra.gmra.mxu3 %vm339_vm0, %v6882_v55  ;;  %v8620_v55 = vld [vmem:[#allocation65_spill] sm:$0xff] }
 0x36f   : > { %5331 = vmatpush.xpose.msk.msra.mxu0 %vm339_vm0, %v7058_v3  ;;  %5335 = vmatpush.xpose.msk.msra.mxu1 %vm339_vm0, %v7088_v39  ;;  %v8641_v3 = vld [vmem:[#allocation55_spill] sm:$0xff]  ;;  %v8644_v39 = vld [vmem:[#allocation21_spill] sm:$0xff] }
 0x370   : > { %5339 = vmatpush.xpose.msk.msra.mxu2 %vm339_vm0, %v7116_v62  ;;  %5343 = vmatpush.xpose.msk.msra.mxu3 %vm339_vm0, %v7142_v7 }
 0x371   : > { %v7307_v9 = vpop.f32.mrf.mxu2  ;;  %v7309_v31 = vpop.f32.mrf.mxu3 }
 0x372   : > { %8617 = vst [vmem:[#allocation85_spill] sm:$0xff] %v7307_v9  ;;  %v7311_v42 = vpop.f32.mrf.mxu0  ;;  %v7313_v8 = vpop.f32.mrf.mxu1 }
 0x373   : > { %8618 = vst [vmem:[#allocation86_spill] sm:$0xff] %v7309_v31  ;;  %5332 = vmatpush.xpose.msk.msra.mxu0 %vm339_vm0, %v7042_v52  ;;  %5336 = vmatpush.xpose.msk.msra.mxu1 %vm339_vm0, %v7072_v35  ;;  %v8640_v52 = vld [vmem:[#allocation53_spill] sm:$0xff] }
 0x374   : > { %8619 = vst [vmem:[#allocation87_spill] sm:$0xff] %v7313_v8  ;;  %5340 = vmatpush.xpose.msk.msra.mxu2 %vm339_vm0, %v7102_v48  ;;  %5344 = vmatpush.xpose.msk.msra.mxu3 %vm339_vm0, %v8620_v55  ;;  %v8643_v35 = vld [vmem:[#allocation17_spill] sm:$0xff]  ;;  %v8650_v55 = vld [vmem:[#allocation31_spill] sm:$0xff] }
 0x375   : > { %5302 = vmatmul.msk.f32.gmra.mxu0 %vm339_vm0, %v8621_v0  ;;  %5306 = vmatmul.msk.f32.gmra.mxu1 %vm339_vm0, %v8622_v36  ;;  %v8646_v48 = vld [vmem:[#allocation29_spill] sm:$0xff]  ;;  %v8651_v0 = vld [vmem:[#allocation36_spill] sm:$0xff] }
 0x376   : > { %5310 = vmatmul.msk.f32.gmra.mxu2 %vm339_vm0, %v8623_v26  ;;  %5314 = vmatmul.msk.f32.gmra.mxu3 %vm339_vm0, %v8624_v14  ;;  %v8652_v36 = vld [vmem:[#allocation41_spill] sm:$0xff]  ;;  %v8653_v26 = vld [vmem:[#allocation46_spill] sm:$0xff]  ;;  %v8654_v14 = vld [vmem:[#allocation60_spill] sm:$0xff] }
 0x379   : > { %v7331_v56 = vpop.f32.mrf.mxu2  ;;  %v7333_v21 = vpop.f32.mrf.mxu3 }
 0x37a   : > { %8625 = vst [vmem:[#allocation65_spill] sm:$0xff] %v7331_v56  ;;  %v7335_v22 = vpop.f32.mrf.mxu0  ;;  %v7337_v44 = vpop.f32.mrf.mxu1 }
 0x37b   : > { %8626 = vst [vmem:[#allocation33_spill] sm:$0xff] %v7333_v21 }
 0x37c   : > { %8627 = vst [vmem:[#allocation38_spill] sm:$0xff] %v7337_v44 }
 0x37d   : > { %5317 = vmatmul.msk.f32.vlgmr.msrb.gmra.mxu0 %vm339_vm0, %v8628_v13  ;;  %5321 = vmatmul.msk.f32.vlgmr.msrb.gmra.mxu1 %vm339_vm0, %v8629_v10  ;;  %v8655_v13 = vld [vmem:[#allocation62_spill] sm:$0xff]  ;;  %v8656_v10 = vld [vmem:[#allocation64_spill] sm:$0xff] }
 0x37e   : > { %5325 = vmatmul.msk.f32.vlgmr.msrb.gmra.mxu2 %vm339_vm0, %v8630_v50  ;;  %5329 = vmatmul.msk.f32.vlgmr.msrb.gmra.mxu3 %vm339_vm0, %v8631_v47 }
 0x37f   : > { %5347 = vmatpush.xpose.msk.msrb.mxu0 %vm339_vm0, %v8632_v6  ;;  %5351 = vmatpush.xpose.msk.msrb.mxu1 %vm339_vm0, %v8633_v32 }
 0x380   : > { %5355 = vmatpush.xpose.msk.msrb.mxu2 %vm339_vm0, %v8634_v60  ;;  %5359 = vmatpush.xpose.msk.msrb.mxu3 %vm339_vm0, %v8635_v40  ;;  %v8660_v60 = vld [vmem:[#allocation59_spill] sm:$0xff]  ;;  %v8661_v40 = vld [vmem:[#allocation61_spill] sm:$0xff] }
 0x381   : > { %v7355_v59 = vpop.f32.mrf.mxu2  ;;  %v7357_v29 = vpop.f32.mrf.mxu3 }
 0x382   : > { %8636 = vst [vmem:[#allocation43_spill] sm:$0xff] %v7355_v59  ;;  %v7359_v51 = vpop.f32.mrf.mxu0  ;;  %v7361_v2 = vpop.f32.mrf.mxu1 }
 0x383   : > { %8637 = vst [vmem:[#allocation48_spill] sm:$0xff] %v7357_v29  ;;  %5348 = vmatpush.xpose.msk.msrb.mxu0 %vm339_vm0, %v8639_v58  ;;  %5352 = vmatpush.xpose.msk.msrb.mxu1 %vm339_vm0, %v8640_v52  ;;  %v8662_v58 = vld [vmem:[#allocation63_spill] sm:$0xff]  ;;  %v8663_v52 = vld [vmem:[#allocation66_spill] sm:$0xff] }
 0x384   : > { %8638 = vst [vmem:[#allocation15_spill] sm:$0xff] %v7361_v2  ;;  %5356 = vmatpush.xpose.msk.msrb.mxu2 %vm339_vm0, %v8641_v3  ;;  %5360 = vmatpush.xpose.msk.msrb.mxu3 %vm339_vm0, %v8642_v25  ;;  %v8665_v3 = vld [vmem:[#allocation39_spill] sm:$0xff]  ;;  %v8666_v25 = vld [vmem:[#allocation44_spill] sm:$0xff] }
 0x385   : > { %5318 = vmatmul.msk.f32.gmra.mxu0 %vm339_vm0, %v8643_v35  ;;  %5322 = vmatmul.msk.f32.gmra.mxu1 %vm339_vm0, %v8644_v39  ;;  %v8667_v35 = vld [vmem:[#allocation49_spill] sm:$0xff] }
 0x386   : > { %5326 = vmatmul.msk.f32.gmra.mxu2 %vm339_vm0, %v8645_v24  ;;  %5330 = vmatmul.msk.f32.gmra.mxu3 %vm339_vm0, %v8646_v48 }
 0x389   : > { %v7379_v28 = vpop.f32.mrf.mxu2  ;;  %v7381_v62 = vpop.f32.mrf.mxu3 }
 0x38a   : > { %8647 = vst [vmem:[#allocation19_spill] sm:$0xff] %v7379_v28  ;;  %v1403_v20 = vpop.f32.mrf.mxu0  ;;  %v7383_v7 = vpop.f32.mrf.mxu1 }
 0x38b   : > { %8648 = vst [vmem:[#allocation23_spill] sm:$0xff] %v7381_v62 }
 0x38c   : > { %8649 = vst [vmem:[#allocation27_spill] sm:$0xff] %v7383_v7 }
 0x38d   : > { %5333 = vmatmul.msk.f32.vlgmr.msra.gmra.mxu0 %vm339_vm0, %v8650_v55  ;;  %5337 = vmatmul.msk.f32.vlgmr.msra.gmra.mxu1 %vm339_vm0, %v8651_v0  ;;  %v8671_v0 = vld [vmem:[#allocation16_spill] sm:$0xff] }
 0x38e   : > { %5341 = vmatmul.msk.f32.vlgmr.msra.gmra.mxu2 %vm339_vm0, %v8652_v36  ;;  %5345 = vmatmul.msk.f32.vlgmr.msra.gmra.mxu3 %vm339_vm0, %v8653_v26  ;;  %v8672_v36 = vld [vmem:[#allocation20_spill] sm:$0xff] }
 0x38f   : > { %5363 = vmatpush.xpose.msk.msra.mxu0 %vm339_vm0, %v8654_v14  ;;  %5367 = vmatpush.xpose.msk.msra.mxu1 %vm339_vm0, %v8655_v13  ;;  %v8673_v26 = vld [vmem:[#allocation24_spill] sm:$0xff] }
 0x390   : > { %5371 = vmatpush.xpose.msk.msra.mxu2 %vm339_vm0, %v8656_v10  ;;  %5375 = vmatpush.xpose.msk.msra.mxu3 %vm339_vm0, %v7144_v49  ;;  %v8664_v49 = vld [vmem:[#allocation34_spill] sm:$0xff]  ;;  %v8674_v14 = vld [vmem:[#allocation28_spill] sm:$0xff] }
 0x391   : > { %v7401_v50 = vpop.f32.mrf.mxu2  ;;  %v7403_v47 = vpop.f32.mrf.mxu3 }
 0x392   : > { %8657 = vst [vmem:[#allocation52_spill] sm:$0xff] %v7401_v50  ;;  %v1406_v6 = vpop.f32.mrf.mxu0  ;;  %v7405_v32 = vpop.f32.mrf.mxu1 }
 0x393   : > { %8658 = vst [vmem:[#allocation54_spill] sm:$0xff] %v7403_v47  ;;  %5364 = vmatpush.xpose.msk.msra.mxu0 %vm339_vm0, %v8660_v60  ;;  %5368 = vmatpush.xpose.msk.msra.mxu1 %vm339_vm0, %v8661_v40 }
 0x394   : > { %8659 = vst [vmem:[#allocation56_spill] sm:$0xff] %v7405_v32  ;;  %5372 = vmatpush.xpose.msk.msra.mxu2 %vm339_vm0, %v8662_v58  ;;  %5376 = vmatpush.xpose.msk.msra.mxu3 %vm339_vm0, %v8663_v52  ;;  %v8685_v58 = vld [vmem:[#allocation32_spill] sm:$0xff]  ;;  %v8686_v52 = vld [vmem:[#allocation37_spill] sm:$0xff] }
 0x395   : > { %5334 = vmatmul.msk.f32.gmra.mxu0 %vm339_vm0, %v8664_v49  ;;  %5338 = vmatmul.msk.f32.gmra.mxu1 %vm339_vm0, %v8665_v3  ;;  %v8687_v49 = vld [vmem:[#allocation42_spill] sm:$0xff]  ;;  %v8688_v3 = vld [vmem:[#allocation47_spill] sm:$0xff] }
 0x396   : > { %5342 = vmatmul.msk.f32.gmra.mxu2 %vm339_vm0, %v8666_v25  ;;  %5346 = vmatmul.msk.f32.gmra.mxu3 %vm339_vm0, %v8667_v35 }
 0x399   : > { %v7423_v39 = vpop.f32.mrf.mxu2  ;;  %v7425_v24 = vpop.f32.mrf.mxu3 }
 0x39a   : > { %8668 = vst [vmem:[#allocation58_spill] sm:$0xff] %v7423_v39  ;;  %v1409_v48 = vpop.f32.mrf.mxu0  ;;  %v7427_v55 = vpop.f32.mrf.mxu1 }
 0x39b   : > { %8669 = vst [vmem:[#allocation51_spill] sm:$0xff] %v7425_v24 }
 0x39c   : > { %8670 = vst [vmem:[#allocation53_spill] sm:$0xff] %v7427_v55 }
 0x39d   : > { %5349 = vmatmul.msk.f32.vlgmr.msrb.gmra.mxu0 %vm339_vm0, %v8671_v0  ;;  %5353 = vmatmul.msk.f32.vlgmr.msrb.gmra.mxu1 %vm339_vm0, %v8672_v36 }
 0x39e   : > { %5357 = vmatmul.msk.f32.vlgmr.msrb.gmra.mxu2 %vm339_vm0, %v8673_v26  ;;  %5361 = vmatmul.msk.f32.vlgmr.msrb.gmra.mxu3 %vm339_vm0, %v8674_v14  ;;  %v8692_v26 = vld [vmem:[#allocation35_spill] sm:$0xff]  ;;  %v8693_v14 = vld [vmem:[#allocation40_spill] sm:$0xff] }
 0x39f   : > { %3461 = vmatpush.msrb.mxu0 %v7170_v63  ;;  %3490 = vmatpush.msrb.mxu1 %v7216_v41  ;;  %v8678_v41 = vld [vmem:[#allocation18_spill] sm:$0xff] }
 0x3a0   : > { %3519 = vmatpush.msrb.mxu2 %v7263_v12  ;;  %3548 = vmatpush.msrb.mxu3 %v7311_v42  ;;  %v8679_v12 = vld [vmem:[#allocation22_spill] sm:$0xff] }
 0x3a1   : > { %3462 = vmatpush.msrb.mxu0 %v7146_v16  ;;  %3491 = vmatpush.msrb.mxu1 %v7194_v43  ;;  %v7443_v13 = vpop.f32.mrf.mxu2  ;;  %v7445_v10 = vpop.f32.mrf.mxu3  ;;  %v8680_v16 = vld [vmem:[#allocation26_spill] sm:$0xff] }
 0x3a2   : > { %8675 = vst [vmem:[#allocation55_spill] sm:$0xff] %v7443_v13  ;;  %3520 = vmatpush.msrb.mxu2 %v7239_v38  ;;  %3549 = vmatpush.msrb.mxu3 %v7287_v34  ;;  %v1412_v60 = vpop.f32.mrf.mxu0  ;;  %v7449_v63 = vpop.f32.mrf.mxu1  ;;  %v8681_v43 = vld [vmem:[#allocation30_spill] sm:$0xff] }
 0x3a3   : > { %8676 = vst [vmem:[#allocation57_spill] sm:$0xff] %v7445_v10 }
 0x3a4   : > { %8677 = vst [vmem:[#allocation17_spill] sm:$0xff] %v7449_v63 }
 0x3a5   : > { %5350 = vmatmul.msk.f32.gmra.mxu0 %vm339_vm0, %v8678_v41  ;;  %5354 = vmatmul.msk.f32.gmra.mxu1 %vm339_vm0, %v8679_v12 }
 0x3a6   : > { %5358 = vmatmul.msk.f32.gmra.mxu2 %vm339_vm0, %v8680_v16  ;;  %5362 = vmatmul.msk.f32.gmra.mxu3 %vm339_vm0, %v8681_v43 }
 0x3a9   : > { %v7459_v42 = vpop.f32.mrf.mxu2  ;;  %v7461_v38 = vpop.f32.mrf.mxu3 }
 0x3aa   : > { %8682 = vst [vmem:[#allocation21_spill] sm:$0xff] %v7459_v42  ;;  %v1415_v34 = vpop.f32.mrf.mxu0  ;;  %v7463_v40 = vpop.f32.mrf.mxu1 }
 0x3ab   : > { %8683 = vst [vmem:[#allocation25_spill] sm:$0xff] %v7461_v38 }
 0x3ac   : > { %8684 = vst [vmem:[#allocation29_spill] sm:$0xff] %v7463_v40 }
 0x3ad   : > { %5365 = vmatmul.msk.f32.vlgmr.msra.gmra.mxu0 %vm339_vm0, %v8685_v58  ;;  %5369 = vmatmul.msk.f32.vlgmr.msra.gmra.mxu1 %vm339_vm0, %v8686_v52 }
 0x3ae   : > { %5373 = vmatmul.msk.f32.vlgmr.msra.gmra.mxu2 %vm339_vm0, %v8687_v49  ;;  %5377 = vmatmul.msk.f32.vlgmr.msra.gmra.mxu3 %vm339_vm0, %v8688_v3 }
 0x3af   : > { %3577 = vmatpush.msra.mxu0 %v7359_v51  ;;  %3606 = vmatpush.msra.mxu1 %v1406_v6  ;;  %v8694_v51 = vld [vmem:[#allocation45_spill] sm:$0xff] }
 0x3b0   : > { %3635 = vmatpush.msra.mxu2 %v1412_v60 }
 0x3b1   : > { %3578 = vmatpush.msra.mxu0 %v7335_v22  ;;  %3607 = vmatpush.msra.mxu1 %v1403_v20  ;;  %v7475_v25 = vpop.f32.mrf.mxu2  ;;  %v7477_v35 = vpop.f32.mrf.mxu3  ;;  %v8695_v22 = vld [vmem:[#allocation50_spill] sm:$0xff] }
 0x3b2   : > { %8689 = vst [vmem:[#allocation31_spill] sm:$0xff] %v7475_v25  ;;  %3636 = vmatpush.msra.mxu2 %v1409_v48  ;;  %v1418_v0 = vpop.f32.mrf.mxu0  ;;  %v7479_v36 = vpop.f32.mrf.mxu1 }
 0x3b3   : > { %8690 = vst [vmem:[#allocation36_spill] sm:$0xff] %v7477_v35  ;;  %3664 = vmatpush.msra.mxu3 %v1418_v0 }
 0x3b4   : > { %8691 = vst [vmem:[#allocation41_spill] sm:$0xff] %v7479_v36 }
 0x3b5   : > { %5366 = vmatmul.msk.f32.gmra.mxu0 %vm339_vm0, %v8692_v26  ;;  %5370 = vmatmul.msk.f32.gmra.mxu1 %vm339_vm0, %v8693_v14 }
 0x3b6   : > { %5374 = vmatmul.msk.f32.gmra.mxu2 %vm339_vm0, %v8694_v51  ;;  %5378 = vmatmul.msk.f32.gmra.mxu3 %vm339_vm0, %v8695_v22 }
 0x3b7   : > { %3665 = vmatpush.msra.mxu3 %v1415_v34 }
 0x3b9   : > { %v7489_v20 = vpop.f32.mrf.mxu2  ;;  %v7491_v6 = vpop.f32.mrf.mxu3 }
 0x3ba   : > { %8696 = vst [vmem:[#allocation46_spill] sm:$0xff] %v7489_v20  ;;  %v7493_v48 = vpop.f32.mrf.mxu0  ;;  %v7495_v60 = vpop.f32.mrf.mxu1 }
 0x3bb   : > { %8697 = vst [vmem:[#allocation60_spill] sm:$0xff] %v7491_v6  ;;  %v2743_v41 = vsel %vm2736_vm10, %v7495_v60, -inf  ;;  %v2737_v12 = vsel %vm2736_vm10, %v7493_v48, -inf }
 0x3bc   : > { %2744 = vmax.xlane.f32.xlu1 %v2743_v41  ;;  %2738 = vmax.xlane.f32.xlu2 %v2737_v12 }
 0x3c1   : > { %v7501_v16 = vpop.f32.mrf.mxu2  ;;  %v7503_v43 = vpop.f32.mrf.mxu3 }
 0x3c2   : > { %v7505_v34 = vpop.f32.mrf.mxu0  ;;  %v2749_v58 = vsel %vm2736_vm10, %v7501_v16, -inf  ;;  %v7511_v49 = vpop.f32.mrf.mxu1  ;;  %v2755_v14 = vsel %vm2736_vm10, %v7503_v43, -inf }
 0x3c3   : > { %v2740_v52 = vsel %vm2736_vm10, %v7505_v34, -inf  ;;  %v2746_v51 = vsel %vm2736_vm10, %v7511_v49, -inf }
 0x3c4   : > { %2750 = vmax.xlane.f32.xlu2 %v2749_v58  ;;  %2741 = vmax.xlane.f32.xlu0 %v2740_v52 }
 0x3c9   : > { %v7513_v3 = vpop.f32.mrf.mxu2  ;;  %v7515_v0 = vpop.f32.mrf.mxu3 }
 0x3ca   : > { %v7517_v26 = vpop.f32.mrf.mxu0  ;;  %v7523_v22 = vpop.f32.mrf.mxu1  ;;  %v2752_v52 = vsel %vm2736_vm10, %v7513_v3, -inf  ;;  %v2758_v35 = vsel %vm2736_vm10, %v7515_v0, -inf }
 0x3cb   : > { %v2761_v10 = vsel %vm2736_vm10, %v7517_v26, -inf }
 0x3cc   : > { %2756 = vmax.xlane.f32.xlu2 %v2755_v14  ;;  %2747 = vmax.xlane.f32.xlu0 %v2746_v51  ;;  %v2767_v51 = vsel %vm2736_vm10, %v7523_v22, -inf }
 0x3d1   : > { %v7525_v41 = vpop.f32.mrf.mxu2  ;;  %v7527_v12 = vpop.f32.mrf.mxu3 }
 0x3d2   : > { %v7529_v58 = vpop.f32.mrf.mxu0  ;;  %v7543_v38 = vpop.f32.mrf.mxu1  ;;  %v2779_v24 = vsel %vm2736_vm10, %v7527_v12, -inf }
 0x3d3   : > { %v2764_v6 = vsel %vm2736_vm10, %v7529_v58, -inf  ;;  %v2770_v30 = vsel %vm2736_vm10, %v7543_v38, -inf }
 0x3d4   : > { %2753 = vmax.xlane.f32.xlu2 %v2752_v52  ;;  %2759 = vmax.xlane.f32.xlu0 %v2758_v35  ;;  %v2773_v52 = vsel %vm2736_vm10, %v7525_v41, -inf }
 0x3d5   : > { %2765 = vmax.xlane.f32.xlu1 %v2764_v6 }
 0x3d9   : > { %v7537_v14 = vpop.f32.mrf.mxu2  ;;  %v7545_v47 = vpop.f32.mrf.mxu3 }
 0x3da   : > { %v2776_v31 = vsel %vm2736_vm10, %v7537_v14, -inf  ;;  %v7549_v35 = vpop.f32.mrf.mxu0 }
 0x3dc   : > { %2768 = vmax.xlane.f32.xlu0 %v2767_v51  ;;  %2762 = vmax.xlane.f32.xlu2 %v2761_v10  ;;  %v2782_v51 = vsel %vm2736_vm10, %v7545_v47, -inf  ;;  %v7559_v10 = vpop.f32.mrf.mxu1 }
 0x3dd   : > { %2777 = vmax.xlane.f32.xlu1 %v2776_v31 }
 0x3e1   : > { %v7551_v6 = vpop.f32.mrf.mxu2  ;;  %v7561_v21 = vpop.f32.mrf.mxu3 }
 0x3e2   : > { %v7565_v29 = vpop.f32.mrf.mxu0  ;;  %v2797_v27 = vsel %vm2736_vm10, %v7551_v6, -inf  ;;  %v2803_v20 = vsel %vm2736_vm10, %v7561_v21, -inf }
 0x3e4   : > { %2774 = vmax.xlane.f32.xlu0 %v2773_v52  ;;  %2780 = vmax.xlane.f32.xlu2 %v2779_v24  ;;  %v2785_v24 = vsel %vm2736_vm10, %v7549_v35, -inf  ;;  %v7573_v52 = vpop.f32.mrf.mxu1 }
 0x3e5   : > { %2783 = vmax.xlane.f32.xlu1 %v2782_v51 }
 0x3e9   : > { %v7563_v31 = vpop.f32.mrf.mxu2  ;;  %v7575_v51 = vpop.f32.mrf.mxu3 }
 0x3ea   : > { %v2800_v62 = vsel %vm2736_vm10, %v7563_v31, -inf  ;;  %v2806_v46 = vsel %vm2736_vm10, %v7575_v51, -inf }
 0x3ec   : > { %2771 = vmax.xlane.f32.xlu0 %v2770_v30  ;;  %2801 = vmax.xlane.f32.xlu2 %v2800_v62  ;;  %v2791_v30 = vsel %vm2736_vm10, %v7559_v10, -inf  ;;  %v7583_v62 = vpop.f32.mrf.mxu0  ;;  %v7585_v25 = vpop.f32.mrf.mxu1 }
 0x3ed   : > { %2786 = vmax.xlane.f32.xlu1 %v2785_v24  ;;  %v2794_v24 = vsel %vm2736_vm10, %v7573_v52, -inf  ;;  %v2809_v53 = vsel %vm2736_vm10, %v7583_v62, -inf  ;;  %v2815_v45 = vsel %vm2736_vm10, %v7585_v25, -inf }
 0x3f1   : > { %v7597_v18 = vpop.f32.mrf.mxu3 }
 0x3f4   : > { %2798 = vmax.xlane.f32.xlu0 %v2797_v27  ;;  %2807 = vmax.xlane.f32.xlu2 %v2806_v46  ;;  %v7593_v27 = vpop.f32.mrf.mxu2  ;;  %v7595_v46 = vpop.f32.mrf.mxu0 }
 0x3f5   : > { %2792 = vmax.xlane.f32.xlu1 %v2791_v30  ;;  %v2827_v30 = vsel %vm2736_vm10, %v7597_v18, -inf  ;;  %v7603_v50 = vpop.f32.mrf.mxu1  ;;  %v2821_v39 = vsel %vm2736_vm10, %v7593_v27, -inf }
 0x3f6   : > { %v2818_v28 = vsel %vm2736_vm10, %v7603_v50, -inf }
 0x3f9   : > { %v7615_v42 = vpop.f32.mrf.mxu3 }
 0x3fa   : > { %v2830_v56 = vsel %vm2736_vm10, %v7615_v42, -inf }
 0x3fc   : > { %2795 = vmax.xlane.f32.xlu0 %v2794_v24  ;;  %2810 = vmax.xlane.f32.xlu2 %v2809_v53  ;;  %v2788_v24 = vsel %vm2736_vm10, %v7565_v29, -inf  ;;  %v7607_v53 = vpop.f32.mrf.mxu2 }
 0x3fd   : > { %2804 = vmax.xlane.f32.xlu1 %v2803_v20  ;;  %v7609_v20 = vpop.f32.mrf.mxu0  ;;  %v2824_v13 = vsel %vm2736_vm10, %v7607_v53, -inf }
 0x3fe   : > { %v2833_v9 = vsel %vm2736_vm10, %v7609_v20, -inf }
 0x404   : > { %2828 = vmax.xlane.f32.xlu0 %v2827_v30  ;;  %2816 = vmax.xlane.f32.xlu2 %v2815_v45  ;;  %v2812_v30 = vsel %vm2736_vm10, %v7595_v46, -inf  ;;  %v7619_v45 = vpop.f32.mrf.mxu1 }
 0x405   : > { %2789 = vmax.xlane.f32.xlu1 %v2788_v24  ;;  %v7621_v24 = vpop.f32.mrf.mxu2  ;;  %v7623_v59 = vpop.f32.mrf.mxu0  ;;  %v2839_v15 = vsel %vm2736_vm10, %v7619_v45, -inf }
 0x406   : > { %v2836_v40 = vsel %vm2736_vm10, %v7623_v59, -inf }
 0x40c   : > { %2825 = vmax.xlane.f32.xlu0 %v2824_v13  ;;  %2822 = vmax.xlane.f32.xlu2 %v2821_v39  ;;  %v2845_v39 = vsel %vm2736_vm10, %v7621_v24, -inf  ;;  %v7631_v13 = vpop.f32.mrf.mxu3 }
 0x40d   : > { %2813 = vmax.xlane.f32.xlu1 %v2812_v30  ;;  %v7633_v30 = vpop.f32.mrf.mxu1  ;;  %v2851_v19 = vsel %vm2736_vm10, %v7631_v13, -inf }
 0x414   : > { %2819 = vmax.xlane.f32.xlu2 %v2818_v28  ;;  %2834 = vmax.xlane.f32.xlu0 %v2833_v9  ;;  %v7641_v28 = vpop.f32.mrf.mxu0  ;;  %v7643_v9 = vpop.f32.mrf.mxu2 }
 0x415   : > { %2846 = vmax.xlane.f32.xlu1 %v2845_v39  ;;  %v7645_v39 = vpop.f32.mrf.mxu3  ;;  %v7647_v11 = vpop.f32.mrf.mxu1  ;;  %v2848_v36 = vsel %vm2736_vm10, %v7643_v9, -inf }
 0x416   : > { %v2854_v17 = vsel %vm2736_vm10, %v7645_v39, -inf  ;;  %v2863_v55 = vsel %vm2736_vm10, %v7647_v11, -inf }
 0x41c   : > { %2831 = vmax.xlane.f32.xlu2 %v2830_v56  ;;  %2840 = vmax.xlane.f32.xlu0 %v2839_v15  ;;  %v2842_v56 = vsel %vm2736_vm10, %v7633_v30, -inf  ;;  %v7655_v15 = vpop.f32.mrf.mxu0 }
 0x41d   : > { %2852 = vmax.xlane.f32.xlu1 %v2851_v19  ;;  %v7657_v19 = vpop.f32.mrf.mxu2  ;;  %v7663_v23 = vpop.f32.mrf.mxu1  ;;  %v2860_v63 = vsel %vm2736_vm10, %v7655_v15, -inf }
 0x41e   : > { %v2869_v33 = vsel %vm2736_vm10, %v7657_v19, -inf  ;;  %v7679_v44 = vpop.f32.mrf.mxu3  ;;  %v2866_v57 = vsel %vm2736_vm10, %v7663_v23, -inf }
 0x41f   : > { %8699 = vst [vmem:[#allocation64_spill] sm:$0xff] %v7679_v44  ;;  %v2875_v1 = vsel %vm2736_vm10, %v7679_v44, -inf }
 0x424   : > { %2855 = vmax.xlane.f32.xlu2 %v2854_v17  ;;  %2837 = vmax.xlane.f32.xlu0 %v2836_v40  ;;  %v2857_v17 = vsel %vm2736_vm10, %v7641_v28, -inf }
 0x425   : > { %2843 = vmax.xlane.f32.xlu1 %v2842_v56  ;;  %v7667_v56 = vpop.f32.mrf.mxu0  ;;  %v7673_v7 = vpop.f32.mrf.mxu2 }
 0x426   : > { %8698 = vst [vmem:[#allocation62_spill] sm:$0xff] %v7673_v7 }
 0x42c   : > { %2870 = vmax.xlane.f32.xlu2 %v2869_v33  ;;  %2849 = vmax.xlane.f32.xlu0 %v2848_v36  ;;  %v2881_v33 = vsel %vm2736_vm10, %v7667_v56, -inf  ;;  %v7677_v36 = vpop.f32.mrf.mxu1 }
 0x42d   : > { %2858 = vmax.xlane.f32.xlu1 %v2857_v17 }
 0x42f   : > { %v2739_v40 = vpop.xlane.xlu2 %2738 }
 0x430   : > { %v2929_v2 = vsub.f32 %v7493_v48, %v2739_v40  ;;  %v2745_v48 = vpop.xlane.xlu1 %2744 }
 0x434   : > { %2864 = vmax.xlane.f32.xlu0 %v2863_v55  ;;  %2861 = vmax.xlane.f32.xlu2 %v2860_v63  ;;  %v2887_v55 = vsel %vm2736_vm10, %v7677_v36, -inf  ;;  %v7688_v63 = vpop.f32.mrf.mxu2  ;;  %v7690_v8 = vpop.f32.mrf.mxu1 }
 0x435   : > { %2882 = vmax.xlane.f32.xlu1 %v2881_v33  ;;  %8700 = vst [vmem:[#allocation59_spill] sm:$0xff] %v7688_v63  ;;  %v2993_v33 = vmul.f32 1.442695, %v2929_v2  ;;  %v2893_v2 = vsel %vm2736_vm10, %v7688_v63, -inf }
 0x436   : > { %8701 = vst [vmem:[#allocation61_spill] sm:$0xff] %v7690_v8 }
 0x437   : > { %v2751_v17 = vpop.xlane.xlu2 %2750  ;;  %v2742_v32 = vpop.xlane.xlu0 %2741  ;;  %5617 = vpow2.f32 %v2993_v33 }
 0x438   : > { %v2933_v40 = vsub.f32 %v7501_v16, %v2751_v17 }
 0x43c   : > { %2876 = vmax.xlane.f32.xlu0 %v2875_v1  ;;  %2867 = vmax.xlane.f32.xlu2 %v2866_v57  ;;  %v2872_v1 = vsel %vm2736_vm10, %v7673_v7, -inf  ;;  %v2890_v57 = vsel %vm2736_vm10, %v7690_v8, -inf  ;;  %v7708_v17 = vpop.f32.mrf.mxu2 }
 0x43d   : > { %2888 = vmax.xlane.f32.xlu1 %v2887_v55  ;;  %v3001_v55 = vmul.f32 1.442695, %v2933_v40  ;;  %v7702_v16 = vpop.eup %5617  ;;  %8703 = vst [vmem:[#allocation66_spill] sm:$0xff] %v7708_v17 }
 0x43e   : > { %v3121_v40 = vsel %vm2736_vm10, %v7702_v16, 0.0 }
 0x43f   : > { %v2757_v54 = vpop.xlane.xlu2 %2756  ;;  %v2748_v61 = vpop.xlane.xlu0 %2747  ;;  %5619 = vpow2.f32 %v3001_v55 }
 0x440   : > { %v2935_v44 = vsub.f32 %v7503_v43, %v2757_v54  ;;  %v7704_v54 = vpop.f32.mrf.mxu3  ;;  %v2932_v55 = vsub.f32 %v7511_v49, %v2748_v61 }
 0x441   : > { %8702 = vst [vmem:[#allocation63_spill] sm:$0xff] %v7704_v54 }
 0x442   : > { %v3005_v4 = vmul.f32 1.442695, %v2935_v44  ;;  %v2878_v44 = vsel %vm2736_vm10, %v7704_v54, -inf }
 0x444   : > { %2873 = vmax.xlane.f32.xlu0 %v2872_v1  ;;  %2891 = vmax.xlane.f32.xlu2 %v2890_v57  ;;  %v2931_v1 = vsub.f32 %v7495_v60, %v2745_v48  ;;  %v2930_v57 = vsub.f32 %v7505_v34, %v2742_v32  ;;  %5621 = vpow2.f32 %v3005_v4  ;;  %v7720_v32 = vpop.f32.mrf.mxu0 }
 0x445   : > { %2894 = vmax.xlane.f32.xlu1 %v2893_v2  ;;  %v2896_v2 = vsel %vm2736_vm10, %v7708_v17, -inf  ;;  %v7718_v48 = vpop.eup %5619 }
 0x446   : > { %v2997_v8 = vmul.f32 1.442695, %v2931_v1  ;;  %v2995_v63 = vmul.f32 1.442695, %v2930_v57  ;;  %8704 = vst [vmem:[#allocation34_spill] sm:$0xff] %v7718_v48  ;;  %v3133_v1 = vsel %vm2736_vm10, %v7718_v48, 0.0 }
 0x447   : > { %v2754_v5 = vpop.xlane.xlu2 %2753  ;;  %v7700_v33 = vpop.xlane.xlu0 %2759  ;;  %v2884_v57 = vsel %vm2736_vm10, %v7720_v32, -inf }
 0x448   : > { %v7706_v43 = vpop.xlane.xlu1 %2765  ;;  %5623 = vpow2.f32 %v2997_v8 }
 0x449   : > { %5625 = vpow2.f32 %v2995_v63 }
 0x44a   : > { %v7724_v34 = vpop.eup %5621 }
 0x44c   : > { %2879 = vmax.xlane.f32.xlu0 %v2878_v44  ;;  %3122 = vadd.xlane.f32.xlu2 %v3121_v40  ;;  %v3139_v40 = vsel %vm2736_vm10, %v7724_v34, 0.0 }
 0x44d   : > { %2897 = vmax.xlane.f32.xlu1 %v2896_v2  ;;  %v2999_v2 = vmul.f32 1.442695, %v2932_v55 }
 0x44e   : > { %v7734_v61 = vpop.eup %5623 }
 0x44f   : > { %v2769_v7 = vpop.xlane.xlu0 %2768  ;;  %v2763_v60 = vpop.xlane.xlu2 %2762  ;;  %5627 = vpow2.f32 %v2999_v2  ;;  %v3127_v55 = vsel %vm2736_vm10, %v7734_v61, 0.0 }
 0x450   : > { %v7722_v4 = vpop.xlane.xlu1 %2777  ;;  %v2937_v44 = vsub.f32 %v7517_v26, %v2763_v60  ;;  %v7737_v63 = vpop.eup %5625  ;;  %v2934_v60 = vsub.f32 %v7513_v3, %v2754_v5 }
 0x452   : > { %v3009_v54 = vmul.f32 1.442695, %v2937_v44  ;;  %v3124_v44 = vsel %vm2736_vm10, %v7737_v63, 0.0 }
 0x454   : > { %3134 = vadd.xlane.f32.xlu2 %v3133_v1  ;;  %2885 = vmax.xlane.f32.xlu0 %v2884_v57  ;;  %v2939_v57 = vsub.f32 %v7523_v22, %v2769_v7  ;;  %5629 = vpow2.f32 %v3009_v54  ;;  %v2936_v22 = vsub.f32 %v7515_v0, %v7700_v33 }
 0x455   : > { %3140 = vadd.xlane.f32.xlu1 %v3139_v40  ;;  %v7748_v2 = vpop.eup %5627 }
 0x456   : > { %v3007_v0 = vmul.f32 1.442695, %v2936_v22 }
 0x457   : > { %v2775_v8 = vpop.xlane.xlu0 %2774  ;;  %v2781_v17 = vpop.xlane.xlu2 %2780 }
 0x458   : > { %v2941_v49 = vsub.f32 %v7525_v41, %v2775_v8  ;;  %v2784_v26 = vpop.xlane.xlu1 %2783  ;;  %v2943_v48 = vsub.f32 %v7527_v12, %v2781_v17  ;;  %v3003_v41 = vmul.f32 1.442695, %v2934_v60  ;;  %v3013_v8 = vmul.f32 1.442695, %v2939_v57 }
 0x459   : > { %v3130_v60 = vsel %vm2736_vm10, %v7748_v2, 0.0 }
 0x45a   : > { %v3017_v1 = vmul.f32 1.442695, %v2941_v49  ;;  %v3021_v40 = vmul.f32 1.442695, %v2943_v48  ;;  %v7750_v7 = vpop.eup %5629  ;;  %v2938_v48 = vsub.f32 %v7529_v58, %v7706_v43 }
 0x45c   : > { %5631 = vpow2.f32 %v3017_v1  ;;  %3128 = vadd.xlane.f32.xlu0 %v3127_v55  ;;  %v3145_v1 = vsel %vm2736_vm10, %v7750_v7, 0.0 }
 0x45d   : > { %3125 = vadd.xlane.f32.xlu1 %v3124_v44  ;;  %5633 = vpow2.f32 %v3003_v41 }
 0x45e   : > { %5635 = vpow2.f32 %v3021_v40  ;;  %v2944_v40 = vsub.f32 %v7545_v47, %v2784_v26 }
 0x45f   : > { %v2772_v5 = vpop.xlane.xlu0 %2771  ;;  %v7746_v3 = vpop.xlane.xlu2 %2801  ;;  %5637 = vpow2.f32 %v3013_v8 }
 0x460   : > { %v2787_v12 = vpop.xlane.xlu1 %2786  ;;  %v2940_v17 = vsub.f32 %v7543_v38, %v2772_v5  ;;  %v3011_v38 = vmul.f32 1.442695, %v2938_v48  ;;  %5639 = vpow2.f32 %v3007_v0  ;;  %v2942_v5 = vsub.f32 %v7537_v14, %v7722_v4 }
 0x461   : > { %v2945_v8 = vsub.f32 %v7549_v35, %v2787_v12 }
 0x462   : > { %v7754_v54 = vpop.eup %5631  ;;  %v3015_v33 = vmul.f32 1.442695, %v2940_v17  ;;  %v3019_v35 = vmul.f32 1.442695, %v2942_v5 }
 0x463   : > { %v3157_v49 = vsel %vm2736_vm10, %v7754_v54, 0.0  ;;  %v7765_v57 = vpop.eup %5633  ;;  %v3025_v47 = vmul.f32 1.442695, %v2945_v8 }
 0x464   : > { %3158 = vadd.xlane.f32.xlu2 %v3157_v49  ;;  %3131 = vadd.xlane.f32.xlu0 %v3130_v60  ;;  %v7769_v43 = vpop.eup %5635  ;;  %5641 = vpow2.f32 %v3015_v33  ;;  %v3136_v17 = vsel %vm2736_vm10, %v7765_v57, 0.0  ;;  %v3023_v49 = vmul.f32 1.442695, %v2944_v40 }
 0x465   : > { %3146 = vadd.xlane.f32.xlu1 %v3145_v1  ;;  %v7771_v41 = vpop.eup %5637  ;;  %5643 = vpow2.f32 %v3011_v38  ;;  %v3163_v22 = vsel %vm2736_vm10, %v7769_v43, 0.0 }
 0x466   : > { %v3151_v48 = vsel %vm2736_vm10, %v7771_v41, 0.0  ;;  %v7783_v26 = vpop.eup %5639  ;;  %5645 = vpow2.f32 %v3023_v49 }
 0x467   : > { %v2799_v55 = vpop.xlane.xlu0 %2798  ;;  %v7767_v58 = vpop.xlane.xlu2 %2807  ;;  %5647 = vpow2.f32 %v3025_v47  ;;  %v3142_v8 = vsel %vm2736_vm10, %v7783_v26, 0.0 }
 0x468   : > { %v2793_v44 = vpop.xlane.xlu1 %2792  ;;  %v2949_v0 = vsub.f32 %v7551_v6, %v2799_v55  ;;  %5649 = vpow2.f32 %v3019_v35 }
 0x469   : > { %v2947_v38 = vsub.f32 %v7559_v10, %v2793_v44 }
 0x46a   : > { %v7785_v14 = vpop.eup %5641 }
 0x46b   : > { %v7787_v1 = vpop.eup %5643  ;;  %v3154_v40 = vsel %vm2736_vm10, %v7785_v14, 0.0 }
 0x46c   : > { %3164 = vadd.xlane.f32.xlu2 %v3163_v22  ;;  %3137 = vadd.xlane.f32.xlu0 %v3136_v17  ;;  %v3148_v5 = vsel %vm2736_vm10, %v7787_v1, 0.0  ;;  %v3033_v22 = vmul.f32 1.442695, %v2949_v0  ;;  %v7798_v55 = vpop.eup %5645 }
 0x46d   : > { %3152 = vadd.xlane.f32.xlu1 %v3151_v48  ;;  %v7802_v44 = vpop.eup %5647  ;;  %v3166_v0 = vsel %vm2736_vm10, %v7798_v55, 0.0 }
 0x46e   : > { %v7804_v49 = vpop.eup %5649  ;;  %5651 = vpow2.f32 %v3033_v22 }
 0x46f   : > { %v2796_v12 = vpop.xlane.xlu0 %2795  ;;  %v2811_v60 = vpop.xlane.xlu2 %2810 }
 0x470   : > { %v2805_v4 = vpop.xlane.xlu1 %2804  ;;  %v2953_v33 = vsub.f32 %v7583_v62, %v2811_v60  ;;  %v3029_v62 = vmul.f32 1.442695, %v2947_v38  ;;  %v3169_v60 = vsel %vm2736_vm10, %v7802_v44, 0.0 }
 0x471   : > { %v2951_v35 = vsub.f32 %v7561_v21, %v2805_v4 }
 0x472   : > { %v3041_v6 = vmul.f32 1.442695, %v2953_v33  ;;  %v3160_v33 = vsel %vm2736_vm10, %v7804_v49, 0.0 }
 0x474   : > { %3155 = vadd.xlane.f32.xlu2 %v3154_v40  ;;  %3143 = vadd.xlane.f32.xlu0 %v3142_v8  ;;  %5653 = vpow2.f32 %v3041_v6  ;;  %v7814_v40 = vpop.eup %5651  ;;  %v3037_v8 = vmul.f32 1.442695, %v2951_v35 }
 0x475   : > { %3149 = vadd.xlane.f32.xlu1 %v3148_v5  ;;  %5655 = vpow2.f32 %v3029_v62  ;;  %v2948_v62 = vsub.f32 %v7573_v52, %v2796_v12  ;;  %v3181_v35 = vsel %vm2736_vm10, %v7814_v40, 0.0  ;;  %v7830_v52 = vpop.f32.mrf.mxu3 }
 0x477   : > { %v7800_v17 = vpop.xlane.xlu0 %2828  ;;  %v2817_v10 = vpop.xlane.xlu2 %2816  ;;  %v3031_v12 = vmul.f32 1.442695, %v2948_v62 }
 0x478   : > { %v2790_v48 = vpop.xlane.xlu1 %2789 }
 0x479   : > { %v2946_v47 = vsub.f32 %v7565_v29, %v2790_v48 }
 0x47a   : > { %v7816_v22 = vpop.eup %5653 }
 0x47b   : > { %v3027_v38 = vmul.f32 1.442695, %v2946_v47  ;;  %8705 = vst [vmem:[#allocation39_spill] sm:$0xff] %v7816_v22  ;;  %v7819_v6 = vpop.eup %5655  ;;  %v3193_v47 = vsel %vm2736_vm10, %v7816_v22, 0.0 }
 0x47c   : > { %3170 = vadd.xlane.f32.xlu2 %v3169_v60  ;;  %3167 = vadd.xlane.f32.xlu0 %v3166_v0  ;;  %v2950_v60 = vsub.f32 %v7563_v31, %v7746_v3 }
 0x47d   : > { %3161 = vadd.xlane.f32.xlu1 %v3160_v33  ;;  %5657 = vpow2.f32 %v3027_v38 }
 0x47e   : > { %5659 = vpow2.f32 %v3037_v8  ;;  %v3035_v0 = vmul.f32 1.442695, %v2950_v60 }
 0x47f   : > { %v2826_v29 = vpop.xlane.xlu0 %2825  ;;  %v2823_v5 = vpop.xlane.xlu2 %2822 }
 0x480   : > { %v2957_v21 = vsub.f32 %v7593_v27, %v2823_v5  ;;  %v2814_v4 = vpop.xlane.xlu1 %2813  ;;  %v3175_v27 = vsel %vm2736_vm10, %v7819_v6, 0.0  ;;  %v2955_v5 = vsub.f32 %v7585_v25, %v2817_v10 }
 0x482   : > { %v3049_v48 = vmul.f32 1.442695, %v2957_v21 }
 0x483   : > { %v7832_v3 = vpop.eup %5657 }
 0x484   : > { %3194 = vadd.xlane.f32.xlu2 %v3193_v47  ;;  %3182 = vadd.xlane.f32.xlu0 %v3181_v35  ;;  %5661 = vpow2.f32 %v3049_v48  ;;  %v7836_v8 = vpop.eup %5659  ;;  %v3172_v62 = vsel %vm2736_vm10, %v7832_v3, 0.0  ;;  %v3045_v35 = vmul.f32 1.442695, %v2955_v5  ;;  %v2954_v5 = vsub.f32 %v7595_v46, %v2814_v4 }
 0x485   : > { %3176 = vadd.xlane.f32.xlu1 %v3175_v27  ;;  %5663 = vpow2.f32 %v3031_v12  ;;  %v3187_v47 = vsel %vm2736_vm10, %v7836_v8, 0.0 }
 0x486   : > { %5665 = vpow2.f32 %v3035_v0 }
 0x487   : > { %v2820_v33 = vpop.xlane.xlu2 %2819  ;;  %v2835_v31 = vpop.xlane.xlu0 %2834  ;;  %5667 = vpow2.f32 %v3045_v35 }
 0x488   : > { %v7834_v38 = vpop.xlane.xlu1 %2846  ;;  %v2956_v48 = vsub.f32 %v7603_v50, %v2820_v33  ;;  %v7856_v33 = vpop.f32.mrf.mxu3 }
 0x48a   : > { %v7839_v21 = vpop.eup %5661  ;;  %v3047_v27 = vmul.f32 1.442695, %v2956_v48 }
 0x48b   : > { %8706 = vst [vmem:[#allocation44_spill] sm:$0xff] %v7839_v21  ;;  %v3205_v60 = vsel %vm2736_vm10, %v7839_v21, 0.0  ;;  %v7850_v12 = vpop.eup %5663  ;;  %v2959_v21 = vsub.f32 %v7597_v18, %v7800_v17  ;;  %v3043_v17 = vmul.f32 1.442695, %v2954_v5 }
 0x48c   : > { %3173 = vadd.xlane.f32.xlu0 %v3172_v62  ;;  %3206 = vadd.xlane.f32.xlu2 %v3205_v60  ;;  %v7854_v0 = vpop.eup %5665  ;;  %v2958_v62 = vsub.f32 %v7607_v53, %v2826_v29  ;;  %5669 = vpow2.f32 %v3047_v27  ;;  %v3178_v48 = vsel %vm2736_vm10, %v7850_v12, 0.0  ;;  %v2902_v60 = vsel %vm2736_vm10, %v7856_v33, -inf }
 0x48d   : > { %3188 = vadd.xlane.f32.xlu1 %v3187_v47  ;;  %v3184_v47 = vsel %vm2736_vm10, %v7854_v0, 0.0  ;;  %v3053_v22 = vmul.f32 1.442695, %v2959_v21  ;;  %v7870_v46 = vpop.eup %5667  ;;  %v2952_v27 = vsub.f32 %v7575_v51, %v7767_v58  ;;  %v2961_v21 = vsub.f32 %v7609_v20, %v2835_v31 }
 0x48e   : > { %v3051_v18 = vmul.f32 1.442695, %v2958_v62  ;;  %v2899_v62 = vsel %vm2736_vm10, %v7830_v52, -inf }
 0x48f   : > { %v2832_v25 = vpop.xlane.xlu2 %2831  ;;  %v7848_v10 = vpop.xlane.xlu0 %2840  ;;  %5671 = vpow2.f32 %v3053_v22 }
 0x490   : > { %v7852_v50 = vpop.xlane.xlu1 %2852  ;;  %5673 = vpow2.f32 %v3051_v18 }
 0x491   : > { %5675 = vpow2.f32 %v3043_v17 }
 0x492   : > { %v7872_v4 = vpop.eup %5669 }
 0x493   : > { %v3202_v5 = vsel %vm2736_vm10, %v7872_v4, 0.0 }
 0x494   : > { %3179 = vadd.xlane.f32.xlu0 %v3178_v48  ;;  %2903 = vmax.xlane.f32.xlu2 %v2902_v60  ;;  %v3199_v60 = vsel %vm2736_vm10, %v7870_v46, 0.0 }
 0x495   : > { %3185 = vadd.xlane.f32.xlu1 %v3184_v47  ;;  %v3039_v47 = vmul.f32 1.442695, %v2952_v27  ;;  %v7884_v58 = vpop.eup %5671 }
 0x496   : > { %v7888_v31 = vpop.eup %5673 }
 0x497   : > { %v7868_v35 = vpop.xlane.xlu2 %2855  ;;  %v2838_v53 = vpop.xlane.xlu0 %2837  ;;  %5677 = vpow2.f32 %v3039_v47 }
 0x498   : > { %v2844_v29 = vpop.xlane.xlu1 %2843  ;;  %v2962_v48 = vsub.f32 %v7623_v59, %v2838_v53  ;;  %v3057_v59 = vmul.f32 1.442695, %v2961_v21  ;;  %v7890_v17 = vpop.eup %5675  ;;  %v2965_v53 = vsub.f32 %v7621_v24, %v7834_v38  ;;  %v3211_v21 = vsel %vm2736_vm10, %v7884_v58, 0.0 }
 0x49a   : > { %v3059_v51 = vmul.f32 1.442695, %v2962_v48  ;;  %v2960_v48 = vsub.f32 %v7615_v42, %v2832_v25 }
 0x49c   : > { %2900 = vmax.xlane.f32.xlu0 %v2899_v62  ;;  %3203 = vadd.xlane.f32.xlu2 %v3202_v5  ;;  %5679 = vpow2.f32 %v3059_v51  ;;  %v3208_v62 = vsel %vm2736_vm10, %v7888_v31, 0.0  ;;  %v3196_v5 = vsel %vm2736_vm10, %v7890_v17, 0.0 }
 0x49d   : > { %3200 = vadd.xlane.f32.xlu1 %v3199_v60  ;;  %5681 = vpow2.f32 %v3057_v59  ;;  %v3065_v60 = vmul.f32 1.442695, %v2965_v53  ;;  %v7902_v38 = vpop.eup %5677  ;;  %v2964_v53 = vsub.f32 %v7633_v30, %v2844_v29 }
 0x49f   : > { %v7886_v22 = vpop.xlane.xlu2 %2870  ;;  %v2850_v20 = vpop.xlane.xlu0 %2849  ;;  %5683 = vpow2.f32 %v3065_v60 }
 0x4a0   : > { %v2859_v18 = vpop.xlane.xlu1 %2858 }
 0x4a1   : > { %v2969_v27 = vsub.f32 %v7641_v28, %v2859_v18  ;;  %v3055_v28 = vmul.f32 1.442695, %v2960_v48  ;;  %v2963_v18 = vsub.f32 %v7619_v45, %v7848_v10 }
 0x4a2   : > { %v7904_v42 = vpop.eup %5679 }
 0x4a3   : > { %v3073_v24 = vmul.f32 1.442695, %v2969_v27  ;;  %v7906_v59 = vpop.eup %5681  ;;  %v3220_v27 = vsel %vm2736_vm10, %v7904_v42, 0.0 }
 0x4a4   : > { %3212 = vadd.xlane.f32.xlu0 %v3211_v21  ;;  %3209 = vadd.xlane.f32.xlu2 %v3208_v62  ;;  %v2966_v21 = vsub.f32 %v7643_v9, %v2850_v20  ;;  %v3217_v48 = vsel %vm2736_vm10, %v7906_v59, 0.0  ;;  %v3190_v62 = vsel %vm2736_vm10, %v7902_v38, 0.0  ;;  %v3063_v9 = vmul.f32 1.442695, %v2964_v53 }
 0x4a5   : > { %3197 = vadd.xlane.f32.xlu1 %v3196_v5  ;;  %5685 = vpow2.f32 %v3073_v24  ;;  %v3061_v5 = vmul.f32 1.442695, %v2963_v18  ;;  %v7918_v10 = vpop.eup %5683 }
 0x4a6   : > { %5687 = vpow2.f32 %v3055_v28  ;;  %v3067_v45 = vmul.f32 1.442695, %v2966_v21 }
 0x4a7   : > { %v2865_v47 = vpop.xlane.xlu0 %2864  ;;  %v2862_v51 = vpop.xlane.xlu2 %2861  ;;  %5689 = vpow2.f32 %v3061_v5 }
 0x4a8   : > { %v2883_v25 = vpop.xlane.xlu1 %2882  ;;  %v2971_v28 = vsub.f32 %v7647_v11, %v2865_v47  ;;  %5691 = vpow2.f32 %v3067_v45  ;;  %v2970_v18 = vsub.f32 %v7655_v15, %v2862_v51 }
 0x4a9   : > { %5693 = vpow2.f32 %v3063_v9 }
 0x4aa   : > { %v3075_v11 = vmul.f32 1.442695, %v2970_v18 }
 0x4ab   : > { %v7922_v29 = vpop.eup %5685 }
 0x4ac   : > { %3221 = vadd.xlane.f32.xlu0 %v3220_v27  ;;  %3218 = vadd.xlane.f32.xlu2 %v3217_v48  ;;  %v7924_v24 = vpop.eup %5687  ;;  %v3241_v53 = vsel %vm2736_vm10, %v7922_v29, 0.0  ;;  %v3229_v48 = vsel %vm2736_vm10, %v7918_v10, 0.0 }
 0x4ad   : > { %3191 = vadd.xlane.f32.xlu1 %v3190_v62  ;;  %v3214_v27 = vsel %vm2736_vm10, %v7924_v24, 0.0  ;;  %v3077_v62 = vmul.f32 1.442695, %v2971_v28  ;;  %v7935_v47 = vpop.eup %5689  ;;  %v2977_v28 = vsub.f32 %v7667_v56, %v2883_v25 }
 0x4ae   : > { %v7941_v5 = vpop.eup %5691 }
 0x4af   : > { %v7920_v20 = vpop.xlane.xlu0 %2876  ;;  %v2868_v30 = vpop.xlane.xlu2 %2867  ;;  %5695 = vpow2.f32 %v3077_v62  ;;  %v3232_v18 = vsel %vm2736_vm10, %v7941_v5, 0.0 }
 0x4b0   : > { %v2889_v60 = vpop.xlane.xlu1 %2888  ;;  %v2972_v21 = vsub.f32 %v7663_v23, %v2868_v30  ;;  %v7945_v9 = vpop.eup %5693  ;;  %v2967_v30 = vsub.f32 %v7631_v13, %v7852_v50  ;;  %5697 = vpow2.f32 %v3075_v11  ;;  %v3089_v13 = vmul.f32 1.442695, %v2977_v28 }
 0x4b1   : > { %8707 = vst [vmem:[#allocation49_spill] sm:$0xff] %v7945_v9 }
 0x4b2   : > { %v3079_v15 = vmul.f32 1.442695, %v2972_v21  ;;  %v3223_v21 = vsel %vm2736_vm10, %v7935_v47, 0.0 }
 0x4b4   : > { %3242 = vadd.xlane.f32.xlu0 %v3241_v53  ;;  %3215 = vadd.xlane.f32.xlu2 %v3214_v27  ;;  %5699 = vpow2.f32 %v3079_v15  ;;  %v3226_v53 = vsel %vm2736_vm10, %v7945_v9, 0.0  ;;  %v3069_v27 = vmul.f32 1.442695, %v2967_v30  ;;  %v2979_v15 = vsub.f32 %v7677_v36, %v2889_v60  ;;  %v7981_v9 = vpop.f32.mrf.mxu0 }
 0x4b5   : > { %3230 = vadd.xlane.f32.xlu1 %v3229_v48  ;;  %v7956_v48 = vpop.eup %5695 }
 0x4b6   : > { %8708 = vst [vmem:[#allocation16_spill] sm:$0xff] %v7956_v48  ;;  %v7960_v25 = vpop.eup %5697  ;;  %v3247_v30 = vsel %vm2736_vm10, %v7956_v48, 0.0 }
 0x4b7   : > { %v7937_v51 = vpop.xlane.xlu0 %2873  ;;  %v7939_v23 = vpop.xlane.xlu2 %2891  ;;  %8709 = vst [vmem:[#allocation20_spill] sm:$0xff] %v7960_v25  ;;  %v3244_v28 = vsel %vm2736_vm10, %v7960_v25, 0.0 }
 0x4b8   : > { %v7943_v45 = vpop.xlane.xlu1 %2894 }
 0x4ba   : > { %v7964_v11 = vpop.eup %5699 }
 0x4bc   : > { %3233 = vadd.xlane.f32.xlu0 %v3232_v18  ;;  %3224 = vadd.xlane.f32.xlu2 %v3223_v21  ;;  %v2973_v18 = vsub.f32 %v7657_v19, %v7886_v22  ;;  %v3250_v21 = vsel %vm2736_vm10, %v7964_v11, 0.0 }
 0x4bd   : > { %3227 = vadd.xlane.f32.xlu1 %v3226_v53 }
 0x4bf   : > { %v7958_v50 = vpop.xlane.xlu0 %2879  ;;  %v3123_v56 = vpop.xlane.xlu2 %3122 }
 0x4c0   : > { %5701 = vrcp.f32 %v3123_v56  ;;  %v7962_v62 = vpop.xlane.xlu1 %2897  ;;  %v3081_v56 = vmul.f32 1.442695, %v2973_v18 }
 0x4c1   : > { %5703 = vpow2.f32 %v3069_v27  ;;  %v3093_v27 = vmul.f32 1.442695, %v2979_v15 }
 0x4c2   : > { %5705 = vpow2.f32 %v3089_v13 }
 0x4c4   : > { %3248 = vadd.xlane.f32.xlu0 %v3247_v30  ;;  %3245 = vadd.xlane.f32.xlu2 %v3244_v28  ;;  %v8711_v28 = vld [vmem:[#allocation67_spill] sm:$0xff] }
 0x4c5   : > { %3251 = vadd.xlane.f32.xlu1 %v3250_v21 }
 0x4c6   : > { %v5702_v53 = vpop.eup %5701 }
 0x4c7   : > { %v3377_v36 = vmul.f32 %v5702_v53, %v7702_v16  ;;  %v3135_v60 = vpop.xlane.xlu2 %3134  ;;  %v2886_v19 = vpop.xlane.xlu0 %2885  ;;  %v2968_v16 = vsub.f32 %v7645_v39, %v7868_v35  ;;  %v8712_v53 = vld [vmem:[#allocation34_spill] sm:$0xff] }
 0x4c8   : > { %v7976_v22 = vpop.eup %5703  ;;  %5707 = vrcp.f32 %v3135_v60  ;;  %v3141_v13 = vpop.xlane.xlu1 %3140  ;;  %v2978_v48 = vsub.f32 %v7720_v32, %v2886_v19  ;;  %v8710_v32 = vld [vmem:[#allocation62_spill] sm:$0xff]  ;;  %v8713_v60 = vld [vmem:[#allocation59_spill] sm:$0xff] }
 0x4c9   : > { %v7979_v25 = vpop.eup %5705  ;;  %5709 = vrcp.f32 %v3141_v13  ;;  %5379 = vmatmul.msk.f32.vlgmr.msrb.gmra.mxu0 %vm2736_vm10, %v3377_v36  ;;  %v3235_v18 = vsel %vm2736_vm10, %v7976_v22, 0.0  ;;  %v2974_v30 = vsub.f32 %v8710_v32, %v7937_v51  ;;  %v2981_v19 = vsub.f32 %v8713_v60, %v7943_v45  ;;  %v8716_v45 = vld [vmem:[#allocation87_spill] sm:$0xff] }
 0x4ca   : > { %5711 = vpow2.f32 %v3093_v27  ;;  %v3091_v15 = vmul.f32 1.442695, %v2978_v48  ;;  %3693 = vmatpush.msrb.mxu0 %v7172_v37  ;;  %v3265_v21 = vsel %vm2736_vm10, %v7979_v25, 0.0  ;;  %v2905_v37 = vsel %vm2736_vm10, %v7981_v9, -inf }
 0x4cb   : > { %5713 = vpow2.f32 %v3081_v56  ;;  %v3071_v48 = vmul.f32 1.442695, %v2968_v16  ;;  %v3083_v51 = vmul.f32 1.442695, %v2974_v30  ;;  %v8714_v16 = vld [vmem:[#allocation81_spill] sm:$0xff] }
 0x4cc   : > { %5715 = vpow2.f32 %v3091_v15  ;;  %3694 = vmatpush.msrb.mxu0 %v8711_v28  ;;  %3236 = vadd.xlane.f32.xlu0 %v3235_v18  ;;  %v8715_v30 = vld [vmem:[#allocation61_spill] sm:$0xff] }
 0x4cd   : > { %3266 = vadd.xlane.f32.xlu1 %v3265_v21  ;;  %2906 = vmax.xlane.f32.xlu2 %v2905_v37  ;;  %v2980_v28 = vsub.f32 %v8715_v30, %v7939_v23  ;;  %v8717_v37 = vld [vmem:[#allocation64_spill] sm:$0xff] }
 0x4ce   : > { %v5708_v39 = vpop.eup %5707  ;;  %v8719_v23 = vld [vmem:[#allocation84_spill] sm:$0xff] }
 0x4cf   : > { %v5710_v35 = vpop.eup %5709  ;;  %v3381_v27 = vmul.f32 %v5708_v39, %v8712_v53  ;;  %v3129_v56 = vpop.xlane.xlu0 %3128  ;;  %v2975_v39 = vsub.f32 %v8717_v37, %v7920_v20  ;;  %v8718_v53 = vld [vmem:[#allocation78_spill] sm:$0xff]  ;;  %v3095_v60 = vmul.f32 1.442695, %v2980_v28 }
 0x4d0   : > { %v7997_v36 = vpop.eup %5711  ;;  %v3383_v13 = vmul.f32 %v5710_v35, %v7724_v34  ;;  %v3126_v15 = vpop.xlane.xlu1 %3125  ;;  %5717 = vrcp.f32 %v3129_v56  ;;  %v3097_v35 = vmul.f32 1.442695, %v2981_v19  ;;  %v8720_v19 = vld [vmem:[#allocation66_spill] sm:$0xff] }
 0x4d1   : > { %v8002_v18 = vpop.eup %5713  ;;  %5719 = vrcp.f32 %v3126_v15  ;;  %5383 = vmatmul.msk.f32.vlgmr.msrb.gmra.mxu2 %vm2736_vm10, %v3381_v27  ;;  %v3271_v34 = vsel %vm2736_vm10, %v7997_v36, 0.0  ;;  %v8023_v20 = vpop.f32.mrf.mxu0  ;;  %v2982_v30 = vsub.f32 %v8720_v19, %v7962_v62  ;;  %v8722_v62 = vld [vmem:[#allocation63_spill] sm:$0xff] }
 0x4d2   : > { %v8005_v32 = vpop.eup %5715  ;;  %5385 = vmatmul.msk.f32.vlgmr.msrb.gmra.mxu3 %vm2736_vm10, %v3383_v13  ;;  %3751 = vmatpush.msrb.mxu2 %v8714_v16  ;;  %5721 = vpow2.f32 %v3071_v48  ;;  %v3253_v48 = vsel %vm2736_vm10, %v8002_v18, 0.0 }
 0x4d3   : > { %3780 = vmatpush.msrb.mxu3 %v8716_v45  ;;  %v3268_v21 = vsel %vm2736_vm10, %v8005_v32, 0.0  ;;  %5723 = vpow2.f32 %v3083_v51  ;;  %v3085_v51 = vmul.f32 1.442695, %v2975_v39  ;;  %v3099_v39 = vmul.f32 1.442695, %v2982_v30 }
 0x4d4   : > { %3752 = vmatpush.msrb.mxu2 %v8718_v53  ;;  %3272 = vadd.xlane.f32.xlu0 %v3271_v34  ;;  %5725 = vpow2.f32 %v3097_v35  ;;  %v8723_v35 = vld [vmem:[#allocation72_spill] sm:$0xff] }
 0x4d5   : > { %3781 = vmatpush.msrb.mxu3 %v8719_v23  ;;  %3254 = vadd.xlane.f32.xlu1 %v3253_v48 }
 0x4d6   : > { %v5718_v27 = vpop.eup %5717  ;;  %3269 = vadd.xlane.f32.xlu2 %v3268_v21  ;;  %v2908_v21 = vsel %vm2736_vm10, %v8023_v20, -inf }
 0x4d7   : > { %v5720_v56 = vpop.eup %5719  ;;  %v3379_v13 = vmul.f32 %v5718_v27, %v7734_v61  ;;  %v3159_v15 = vpop.xlane.xlu2 %3158  ;;  %v8721_v61 = vld [vmem:[#allocation75_spill] sm:$0xff] }
 0x4d8   : > { %v3132_v16 = vpop.xlane.xlu0 %3131  ;;  %v3147_v45 = vpop.xlane.xlu1 %3146  ;;  %v3378_v34 = vmul.f32 %v5720_v56, %v7737_v63  ;;  %v2976_v63 = vsub.f32 %v8722_v62, %v7958_v50 }
 0x4d9   : > { %v8028_v37 = vpop.eup %5721  ;;  %5727 = vrcp.f32 %v3147_v45  ;;  %5381 = vmatmul.msk.f32.vlgmr.msrb.gmra.mxu1 %vm2736_vm10, %v3379_v13 }
 0x4da   : > { %v8031_v28 = vpop.eup %5723  ;;  %5729 = vrcp.f32 %v3132_v16  ;;  %5380 = vmatmul.msk.f32.gmra.mxu0 %vm2736_vm10, %v3378_v34  ;;  %3722 = vmatpush.msrb.mxu1 %v8721_v61  ;;  %v3238_v53 = vsel %vm2736_vm10, %v8028_v37, 0.0  ;;  %v3087_v16 = vmul.f32 1.442695, %v2976_v63  ;;  %v8724_v34 = vld [vmem:[#allocation15_spill] sm:$0xff]  ;;  %v8064_v63 = vpop.f32.mrf.mxu1 }
 0x4db   : > { %5731 = vpow2.f32 %v3095_v60  ;;  %v3256_v48 = vsel %vm2736_vm10, %v8031_v28, 0.0  ;;  %v8044_v23 = vpop.eup %5725 }
 0x4dc   : > { %5733 = vpow2.f32 %v3085_v51  ;;  %3723 = vmatpush.msrb.mxu1 %v8723_v35  ;;  %2909 = vmax.xlane.f32.xlu0 %v2908_v21  ;;  %v3277_v61 = vsel %vm2736_vm10, %v8044_v23, 0.0  ;;  %v8725_v21 = vld [vmem:[#allocation38_spill] sm:$0xff] }
 0x4dd   : > { %3239 = vadd.xlane.f32.xlu1 %v3238_v53  ;;  %5735 = vpow2.f32 %v3099_v39 }
 0x4de   : > { %3257 = vadd.xlane.f32.xlu2 %v3256_v48 }
 0x4df   : > { %v5728_v27 = vpop.eup %5727  ;;  %v3165_v56 = vpop.xlane.xlu2 %3164 }
 0x4e0   : > { %v3138_v60 = vpop.xlane.xlu0 %3137  ;;  %v5730_v13 = vpop.eup %5729  ;;  %v3385_v50 = vmul.f32 %v5728_v27, %v7750_v7 }
 0x4e1   : > { %v3153_v51 = vpop.xlane.xlu1 %3152  ;;  %v8047_v19 = vpop.eup %5731  ;;  %v3380_v30 = vmul.f32 %v5730_v13, %v7748_v2 }
 0x4e2   : > { %5737 = vrcp.f32 %v3153_v51  ;;  %v8050_v45 = vpop.eup %5733  ;;  %5387 = vmatmul.msk.f32.vlgmr.msra.gmra.mxu0 %vm2736_vm10, %v3385_v50  ;;  %v3274_v7 = vsel %vm2736_vm10, %v8047_v19, 0.0  ;;  %v8726_v50 = vld [vmem:[#allocation56_spill] sm:$0xff] }
 0x4e3   : > { %5739 = vrcp.f32 %v3138_v60  ;;  %5382 = vmatmul.msk.f32.gmra.mxu1 %vm2736_vm10, %v3380_v30  ;;  %3809 = vmatpush.msra.mxu0 %v8724_v34  ;;  %v3259_v2 = vsel %vm2736_vm10, %v8050_v45, 0.0  ;;  %v8062_v62 = vpop.eup %5735  ;;  %v8079_v34 = vpop.f32.mrf.mxu2 }
 0x4e4   : > { %5741 = vpow2.f32 %v3087_v16  ;;  %3278 = vadd.xlane.f32.xlu0 %v3277_v61  ;;  %v8727_v61 = vld [vmem:[#allocation27_spill] sm:$0xff] }
 0x4e5   : > { %3810 = vmatpush.msra.mxu0 %v8725_v21  ;;  %3275 = vadd.xlane.f32.xlu1 %v3274_v7  ;;  %5743 = vrcp.f32 %v3159_v15  ;;  %v3280_v15 = vsel %vm2736_vm10, %v8062_v62, 0.0 }
 0x4e6   : > { %3260 = vadd.xlane.f32.xlu2 %v3259_v2 }
 0x4e7   : > { %v3156_v35 = vpop.xlane.xlu2 %3155 }
 0x4e8   : > { %v5738_v39 = vpop.eup %5737  ;;  %v3144_v53 = vpop.xlane.xlu0 %3143  ;;  %5745 = vrcp.f32 %v3156_v35 }
 0x4e9   : > { %v5740_v48 = vpop.eup %5739  ;;  %v3387_v27 = vmul.f32 %v5738_v39, %v7771_v41  ;;  %v3150_v60 = vpop.xlane.xlu1 %3149  ;;  %v2911_v41 = vsel %vm2736_vm10, %v8064_v63, -inf }
 0x4ea   : > { %5747 = vrcp.f32 %v3150_v60  ;;  %v3382_v13 = vmul.f32 %v5740_v48, %v7765_v57  ;;  %v8068_v16 = vpop.eup %5741 }
 0x4eb   : > { %5749 = vrcp.f32 %v3144_v53  ;;  %5389 = vmatmul.msk.f32.vlgmr.msra.gmra.mxu1 %vm2736_vm10, %v3387_v27  ;;  %v5744_v51 = vpop.eup %5743  ;;  %v3262_v57 = vsel %vm2736_vm10, %v8068_v16, 0.0  ;;  %v8084_v27 = vpop.f32.mrf.mxu1 }
 0x4ec   : > { %5384 = vmatmul.msk.f32.gmra.mxu2 %vm2736_vm10, %v3382_v13  ;;  %3838 = vmatpush.msra.mxu1 %v8726_v50  ;;  %5751 = vrcp.f32 %v3165_v56  ;;  %v3389_v13 = vmul.f32 %v5744_v51, %v7754_v54 }
 0x4ed   : > { %3281 = vadd.xlane.f32.xlu0 %v3280_v15  ;;  %2912 = vmax.xlane.f32.xlu1 %v2911_v41  ;;  %v8729_v41 = vld [vmem:[#allocation53_spill] sm:$0xff] }
 0x4ee   : > { %v5746_v30 = vpop.eup %5745  ;;  %3839 = vmatpush.msra.mxu1 %v8727_v61  ;;  %3263 = vadd.xlane.f32.xlu2 %v3262_v57 }
 0x4ef   : > { %v3171_v21 = vpop.xlane.xlu2 %3170  ;;  %v3388_v39 = vmul.f32 %v5746_v30, %v7785_v14  ;;  %v2914_v14 = vsel %vm2736_vm10, %v8084_v27, -inf  ;;  %v8099_v30 = vpop.f32.mrf.mxu3 }
 0x4f0   : > { %v5748_v7 = vpop.eup %5747  ;;  %v3168_v2 = vpop.xlane.xlu0 %3167  ;;  %5753 = vrcp.f32 %v3171_v21 }
 0x4f1   : > { %v5750_v35 = vpop.eup %5749  ;;  %v3162_v53 = vpop.xlane.xlu1 %3161  ;;  %v3386_v48 = vmul.f32 %v5748_v7, %v7787_v1  ;;  %v8728_v1 = vld [vmem:[#allocation17_spill] sm:$0xff] }
 0x4f2   : > { %5755 = vrcp.f32 %v3162_v53  ;;  %v3384_v60 = vmul.f32 %v5750_v35, %v7783_v26  ;;  %v5752_v56 = vpop.eup %5751  ;;  %v2917_v26 = vsel %vm2736_vm10, %v8079_v34, -inf  ;;  %v8102_v21 = vpop.f32.mrf.mxu2  ;;  %v8731_v35 = vld [vmem:[#allocation41_spill] sm:$0xff] }
 0x4f3   : > { %5388 = vmatmul.msk.f32.gmra.mxu0 %vm2736_vm10, %v3386_v48  ;;  %5390 = vmatmul.msk.f32.gmra.mxu1 %vm2736_vm10, %v3388_v39  ;;  %5757 = vrcp.f32 %v3168_v2  ;;  %v3391_v39 = vmul.f32 %v5752_v56, %v7769_v43  ;;  %v2920_v2 = vsel %vm2736_vm10, %v8102_v21, -inf  ;;  %v8733_v43 = vld [vmem:[#allocation29_spill] sm:$0xff] }
 0x4f4   : > { %5386 = vmatmul.msk.f32.gmra.mxu3 %vm2736_vm10, %v3384_v60  ;;  %5391 = vmatmul.msk.f32.vlgmr.msra.gmra.mxu2 %vm2736_vm10, %v3389_v13 }
 0x4f5   : > { %3867 = vmatpush.msra.mxu2 %v8728_v1  ;;  %2915 = vmax.xlane.f32.xlu1 %v2914_v14 }
 0x4f6   : > { %v5754_v15 = vpop.eup %5753  ;;  %2918 = vmax.xlane.f32.xlu2 %v2917_v26 }
 0x4f7   : > { %v3393_v50 = vmul.f32 %v5754_v15, %v7802_v44  ;;  %3868 = vmatpush.msra.mxu2 %v8729_v41  ;;  %v3195_v51 = vpop.xlane.xlu2 %3194  ;;  %v8730_v44 = vld [vmem:[#allocation70_spill] sm:$0xff] }
 0x4f8   : > { %v5756_v54 = vpop.eup %5755  ;;  %v3183_v57 = vpop.xlane.xlu0 %3182  ;;  %v8735_v41 = vld [vmem:[#allocation82_spill] sm:$0xff] }
 0x4f9   : > { %v3177_v61 = vpop.xlane.xlu1 %3176  ;;  %v3390_v7 = vmul.f32 %v5756_v54, %v7804_v49  ;;  %v8732_v49 = vld [vmem:[#allocation68_spill] sm:$0xff]  ;;  %v5758_v53 = vpop.eup %5757 }
 0x4fa   : > { %5759 = vrcp.f32 %v3177_v61  ;;  %v3392_v15 = vmul.f32 %v5758_v53, %v7798_v55  ;;  %v8117_v54 = vpop.f32.mrf.mxu3  ;;  %v8737_v55 = vld [vmem:[#allocation79_spill] sm:$0xff] }
 0x4fb   : > { %5761 = vrcp.f32 %v3183_v57  ;;  %5395 = vmatmul.msk.f32.vlgmr.msrb.gmra.mxu0 %vm2736_vm10, %v3393_v50  ;;  %v8734_v50 = vld [vmem:[#allocation76_spill] sm:$0xff] }
 0x4fc   : > { %5393 = vmatmul.msk.f32.vlgmr.msra.gmra.mxu3 %vm2736_vm10, %v3391_v39  ;;  %3925 = vmatpush.msrb.mxu0 %v8730_v44 }
 0x4fd   : > { %5392 = vmatmul.msk.f32.gmra.mxu2 %vm2736_vm10, %v3390_v7  ;;  %3896 = vmatpush.msra.mxu3 %v8731_v35 }
 0x4fe   : > { %3926 = vmatpush.msrb.mxu0 %v8732_v49  ;;  %2921 = vmax.xlane.f32.xlu1 %v2920_v2 }
 0x4ff   : > { %3897 = vmatpush.msra.mxu3 %v8733_v43  ;;  %v3207_v56 = vpop.xlane.xlu2 %3206  ;;  %v8738_v43 = vld [vmem:[#allocation65_spill] sm:$0xff] }
 0x500   : > { %v5760_v48 = vpop.eup %5759  ;;  %v3174_v60 = vpop.xlane.xlu0 %3173 }
 0x501   : > { %v5762_v13 = vpop.eup %5761  ;;  %v3395_v14 = vmul.f32 %v5760_v48, %v7819_v6  ;;  %v3189_v1 = vpop.xlane.xlu1 %3188  ;;  %5763 = vrcp.f32 %v3174_v60  ;;  %v8736_v6 = vld [vmem:[#allocation73_spill] sm:$0xff] }
 0x502   : > { %v3397_v26 = vmul.f32 %v5762_v13, %v7814_v40  ;;  %5765 = vrcp.f32 %v3189_v1  ;;  %v2926_v40 = vsel %vm2736_vm10, %v8117_v54, -inf  ;;  %v8740_v13 = vld [vmem:[#allocation39_spill] sm:$0xff] }
 0x503   : > { %5397 = vmatmul.msk.f32.vlgmr.msrb.gmra.mxu1 %vm2736_vm10, %v3395_v14  ;;  %5767 = vrcp.f32 %v3195_v51 }
 0x504   : > { %5394 = vmatmul.msk.f32.gmra.mxu3 %vm2736_vm10, %v3392_v15  ;;  %3954 = vmatpush.msrb.mxu1 %v8734_v50 }
 0x505   : > { %5399 = vmatmul.msk.f32.vlgmr.msrb.gmra.mxu2 %vm2736_vm10, %v3397_v26 }
 0x506   : > { %3983 = vmatpush.msrb.mxu2 %v8735_v41  ;;  %3955 = vmatpush.msrb.mxu1 %v8736_v6  ;;  %v8741_v6 = vld [vmem:[#allocation19_spill] sm:$0xff] }
 0x507   : > { %v5764_v57 = vpop.eup %5763  ;;  %2927 = vmax.xlane.f32.xlu1 %v2926_v40  ;;  %v2904_v44 = vpop.xlane.xlu2 %2903 }
 0x508   : > { %3984 = vmatpush.msrb.mxu2 %v8737_v55  ;;  %v3180_v61 = vpop.xlane.xlu0 %3179  ;;  %v3394_v7 = vmul.f32 %v5764_v57, %v7832_v3  ;;  %v5766_v39 = vpop.eup %5765  ;;  %v2984_v49 = vsub.f32 %v7856_v33, %v2904_v44  ;;  %v8739_v3 = vld [vmem:[#allocation85_spill] sm:$0xff]  ;;  %v8743_v55 = vld [vmem:[#allocation44_spill] sm:$0xff] }
 0x509   : > { %v3186_v35 = vpop.xlane.xlu1 %3185  ;;  %5769 = vrcp.f32 %v3180_v61  ;;  %v3399_v2 = vmul.f32 %v5766_v39, %v7836_v8  ;;  %v5768_v51 = vpop.eup %5767 }
 0x50a   : > { %5771 = vrcp.f32 %v3186_v35  ;;  %5396 = vmatmul.msk.f32.gmra.mxu0 %vm2736_vm10, %v3394_v7  ;;  %v3103_v53 = vmul.f32 1.442695, %v2984_v49  ;;  %v3401_v14 = vmul.f32 %v5768_v51, %v8740_v13  ;;  %v8746_v51 = vld [vmem:[#allocation55_spill] sm:$0xff] }
 0x50c   : > { %5401 = vmatmul.msk.f32.vlgmr.msrb.gmra.mxu3 %vm2736_vm10, %v3399_v2  ;;  %5773 = vpow2.f32 %v3103_v53  ;;  %v8744_v2 = vld [vmem:[#allocation21_spill] sm:$0xff]  ;;  %v8745_v53 = vld [vmem:[#allocation58_spill] sm:$0xff] }
 0x50d   : > { %4012 = vmatpush.msrb.mxu3 %v8738_v43  ;;  %5775 = vrcp.f32 %v3207_v56 }
 0x50f   : > { %v5770_v48 = vpop.eup %5769  ;;  %4013 = vmatpush.msrb.mxu3 %v8739_v3  ;;  %v3204_v1 = vpop.xlane.xlu2 %3203 }
 0x510   : > { %v5772_v60 = vpop.eup %5771  ;;  %v2901_v8 = vpop.xlane.xlu0 %2900  ;;  %v3396_v33 = vmul.f32 %v5770_v48, %v7850_v12  ;;  %v8742_v12 = vld [vmem:[#allocation43_spill] sm:$0xff] }
 0x511   : > { %v3201_v26 = vpop.xlane.xlu1 %3200  ;;  %v2983_v15 = vsub.f32 %v7830_v52, %v2901_v8  ;;  %v3398_v50 = vmul.f32 %v5772_v60, %v7854_v0 }
 0x512   : > { %5398 = vmatmul.msk.f32.gmra.mxu1 %vm2736_vm10, %v3396_v33  ;;  %5403 = vmatmul.msk.f32.vlgmr.msra.gmra.mxu0 %vm2736_vm10, %v3401_v14  ;;  %5777 = vrcp.f32 %v3201_v26  ;;  %v8143_v56 = vpop.eup %5773  ;;  %v2923_v26 = vsel %vm2736_vm10, %v8099_v30, -inf }
 0x513   : > { %v3101_v41 = vmul.f32 1.442695, %v2983_v15  ;;  %5400 = vmatmul.msk.f32.gmra.mxu2 %vm2736_vm10, %v3398_v50  ;;  %4041 = vmatpush.msra.mxu0 %v8741_v6  ;;  %v3286_v52 = vsel %vm2736_vm10, %v8143_v56, 0.0  ;;  %v5776_v40 = vpop.eup %5775 }
 0x514   : > { %3287 = vadd.xlane.f32.xlu2 %v3286_v52  ;;  %v3405_v61 = vmul.f32 %v5776_v40, %v8743_v55 }
 0x515   : > { %5779 = vpow2.f32 %v3101_v41  ;;  %4042 = vmatpush.msra.mxu0 %v8742_v12  ;;  %v8748_v12 = vld [vmem:[#allocation71_spill] sm:$0xff] }
 0x516   : > { %5781 = vrcp.f32 %v3204_v1 }
 0x517   : > { %v3210_v7 = vpop.xlane.xlu2 %3209 }
 0x518   : > { %v3213_v0 = vpop.xlane.xlu0 %3212  ;;  %v5778_v57 = vpop.eup %5777  ;;  %5783 = vrcp.f32 %v3210_v7 }
 0x519   : > { %v3198_v39 = vpop.xlane.xlu1 %3197  ;;  %v3403_v44 = vmul.f32 %v5778_v57, %v7870_v46  ;;  %v8747_v46 = vld [vmem:[#allocation52_spill] sm:$0xff] }
 0x51a   : > { %5785 = vrcp.f32 %v3198_v39 }
 0x51b   : > { %v8150_v35 = vpop.eup %5779  ;;  %5407 = vmatmul.msk.f32.vlgmr.msra.gmra.mxu2 %vm2736_vm10, %v3405_v61  ;;  %5405 = vmatmul.msk.f32.vlgmr.msra.gmra.mxu1 %vm2736_vm10, %v3403_v44 }
 0x51c   : > { %4099 = vmatpush.msra.mxu2 %v8744_v2  ;;  %v3283_v49 = vsel %vm2736_vm10, %v8150_v35, 0.0  ;;  %4070 = vmatpush.msra.mxu1 %v8745_v53  ;;  %v5782_v43 = vpop.eup %5781  ;;  %v8750_v2 = vld [vmem:[#allocation46_spill] sm:$0xff]  ;;  %v8751_v53 = vld [vmem:[#allocation83_spill] sm:$0xff] }
 0x51d   : > { %3284 = vadd.xlane.f32.xlu0 %v3283_v49  ;;  %v3404_v1 = vmul.f32 %v5782_v43, %v7872_v4  ;;  %v8752_v43 = vld [vmem:[#allocation31_spill] sm:$0xff] }
 0x51e   : > { %4100 = vmatpush.msra.mxu2 %v8746_v51  ;;  %4071 = vmatpush.msra.mxu1 %v8747_v46  ;;  %v5784_v48 = vpop.eup %5783 }
 0x51f   : > { %v3219_v13 = vpop.xlane.xlu2 %3218  ;;  %v3406_v8 = vmul.f32 %v5784_v48, %v7888_v31 }
 0x520   : > { %v3222_v3 = vpop.xlane.xlu0 %3221  ;;  %v5786_v60 = vpop.eup %5785  ;;  %5787 = vrcp.f32 %v3219_v13 }
 0x521   : > { %v3192_v14 = vpop.xlane.xlu1 %3191  ;;  %v3402_v33 = vmul.f32 %v5786_v60, %v7890_v17 }
 0x522   : > { %5789 = vrcp.f32 %v3192_v14 }
 0x523   : > { %5408 = vmatmul.msk.f32.gmra.mxu2 %vm2736_vm10, %v3406_v8  ;;  %5404 = vmatmul.msk.f32.gmra.mxu0 %vm2736_vm10, %v3402_v33  ;;  %5791 = vrcp.f32 %v3213_v0  ;;  %v8749_v0 = vld [vmem:[#allocation69_spill] sm:$0xff]  ;;  %v8755_v33 = vld [vmem:[#allocation23_spill] sm:$0xff] }
 0x524   : > { %5406 = vmatmul.msk.f32.gmra.mxu1 %vm2736_vm10, %v3404_v1  ;;  %5793 = vrcp.f32 %v3222_v3  ;;  %v8754_v8 = vld [vmem:[#allocation77_spill] sm:$0xff]  ;;  %v8756_v1 = vld [vmem:[#allocation74_spill] sm:$0xff] }
 0x525   : > { %2924 = vmax.xlane.f32.xlu0 %v2923_v26 }
 0x526   : > { %v5788_v15 = vpop.eup %5787 }
 0x527   : > { %v3409_v41 = vmul.f32 %v5788_v15, %v7906_v59  ;;  %v3216_v17 = vpop.xlane.xlu2 %3215 }
 0x528   : > { %v3243_v50 = vpop.xlane.xlu0 %3242  ;;  %v5790_v31 = vpop.eup %5789 }
 0x529   : > { %v3231_v4 = vpop.xlane.xlu1 %3230  ;;  %v3400_v6 = vmul.f32 %v5790_v31, %v7902_v38  ;;  %v5792_v52 = vpop.eup %5791 }
 0x52a   : > { %5795 = vrcp.f32 %v3231_v4  ;;  %v5794_v40 = vpop.eup %5793  ;;  %v3407_v38 = vmul.f32 %v5792_v52, %v7884_v58 }
 0x52b   : > { %5402 = vmatmul.msk.f32.gmra.mxu3 %vm2736_vm10, %v3400_v6  ;;  %5411 = vmatmul.msk.f32.vlgmr.msrb.gmra.mxu0 %vm2736_vm10, %v3409_v41  ;;  %5797 = vrcp.f32 %v3243_v50  ;;  %v3410_v39 = vmul.f32 %v5794_v40, %v7904_v42  ;;  %v8758_v50 = vld [vmem:[#allocation49_spill] sm:$0xff]  ;;  %v8759_v41 = vld [vmem:[#allocation20_spill] sm:$0xff] }
 0x52c   : > { %4157 = vmatpush.msrb.mxu0 %v8748_v12  ;;  %5799 = vrcp.f32 %v3216_v17 }
 0x52e   : > { %4158 = vmatpush.msrb.mxu0 %v8749_v0 }
 0x52f   : > { %v3225_v55 = vpop.xlane.xlu2 %3224 }
 0x530   : > { %v3234_v57 = vpop.xlane.xlu0 %3233  ;;  %v5796_v59 = vpop.eup %5795 }
 0x531   : > { %v3228_v61 = vpop.xlane.xlu1 %3227  ;;  %5801 = vrcp.f32 %v3234_v57  ;;  %v3413_v7 = vmul.f32 %v5796_v59, %v7918_v10  ;;  %v5798_v44 = vpop.eup %5797  ;;  %v8753_v10 = vld [vmem:[#allocation80_spill] sm:$0xff] }
 0x532   : > { %5803 = vrcp.f32 %v3225_v55  ;;  %v5800_v49 = vpop.eup %5799  ;;  %v3417_v13 = vmul.f32 %v5798_v44, %v7922_v29  ;;  %v8757_v29 = vld [vmem:[#allocation48_spill] sm:$0xff]  ;;  %v8763_v44 = vld [vmem:[#allocation86_spill] sm:$0xff] }
 0x533   : > { %5409 = vmatmul.msk.f32.vlgmr.msra.gmra.mxu3 %vm2736_vm10, %v3407_v38  ;;  %5412 = vmatmul.msk.f32.gmra.mxu0 %vm2736_vm10, %v3410_v39  ;;  %5805 = vrcp.f32 %v3228_v61  ;;  %v3408_v14 = vmul.f32 %v5800_v49, %v7924_v24  ;;  %v8760_v59 = vld [vmem:[#allocation16_spill] sm:$0xff]  ;;  %v8764_v49 = vld [vmem:[#allocation54_spill] sm:$0xff] }
 0x534   : > { %5415 = vmatmul.msk.f32.vlgmr.msrb.gmra.mxu2 %vm2736_vm10, %v3413_v7  ;;  %4128 = vmatpush.msra.mxu3 %v8750_v2  ;;  %v8761_v7 = vld [vmem:[#allocation33_spill] sm:$0xff] }
 0x535   : > { %4215 = vmatpush.msrb.mxu2 %v8751_v53 }
 0x536   : > { %4129 = vmatpush.msra.mxu3 %v8752_v43 }
 0x537   : > { %v5802_v51 = vpop.eup %5801  ;;  %4216 = vmatpush.msrb.mxu2 %v8753_v10  ;;  %v3246_v48 = vpop.xlane.xlu2 %3245 }
 0x538   : > { %v5804_v58 = vpop.eup %5803  ;;  %v3249_v42 = vpop.xlane.xlu0 %3248  ;;  %v3414_v60 = vmul.f32 %v5802_v51, %v7941_v5  ;;  %5807 = vrcp.f32 %v3246_v48 }
 0x539   : > { %v3411_v46 = vmul.f32 %v5804_v58, %v7935_v47  ;;  %v3252_v3 = vpop.xlane.xlu1 %3251  ;;  %v5806_v47 = vpop.eup %5805  ;;  %5809 = vrcp.f32 %v3249_v42 }
 0x53a   : > { %v3412_v31 = vmul.f32 %v5806_v47, %v8758_v50 }
 0x53b   : > { %5413 = vmatmul.msk.f32.vlgmr.msrb.gmra.mxu1 %vm2736_vm10, %v3411_v46  ;;  %5410 = vmatmul.msk.f32.gmra.mxu3 %vm2736_vm10, %v3408_v14  ;;  %v8766_v14 = vld [vmem:[#allocation57_spill] sm:$0xff] }
 0x53c   : > { %5419 = vmatmul.msk.f32.vlgmr.msra.gmra.mxu0 %vm2736_vm10, %v3417_v13  ;;  %5416 = vmatmul.msk.f32.gmra.mxu2 %vm2736_vm10, %v3414_v60  ;;  %v8765_v13 = vld [vmem:[#allocation25_spill] sm:$0xff] }
 0x53d   : > { %4186 = vmatpush.msrb.mxu1 %v8754_v8  ;;  %4273 = vmatpush.msra.mxu0 %v8755_v33 }
 0x53e   : > { %v5808_v5 = vpop.eup %5807 }
 0x53f   : > { %4187 = vmatpush.msrb.mxu1 %v8756_v1  ;;  %4274 = vmatpush.msra.mxu0 %v8757_v29  ;;  %v3418_v17 = vmul.f32 %v5808_v5, %v8759_v41  ;;  %v5810_v12 = vpop.eup %5809 }
 0x540   : > { %v3237_v24 = vpop.xlane.xlu0 %3236  ;;  %v2907_v15 = vpop.xlane.xlu2 %2906  ;;  %v3419_v55 = vmul.f32 %v5810_v12, %v8760_v59 }
 0x541   : > { %v3267_v26 = vpop.xlane.xlu1 %3266  ;;  %5811 = vrcp.f32 %v3237_v24  ;;  %v2985_v4 = vsub.f32 %v7981_v9, %v2907_v15 }
 0x542   : > { %5813 = vrcp.f32 %v3267_v26 }
 0x543   : > { %5414 = vmatmul.msk.f32.gmra.mxu1 %vm2736_vm10, %v3412_v31  ;;  %v3105_v6 = vmul.f32 1.442695, %v2985_v4 }
 0x544   : > { %5420 = vmatmul.msk.f32.gmra.mxu0 %vm2736_vm10, %v3418_v17 }
 0x545   : > { %5815 = vpow2.f32 %v3105_v6 }
 0x546   : > { %5817 = vrcp.f32 %v3252_v3 }
 0x547   : > { %v5812_v52 = vpop.eup %5811 }
 0x548   : > { %v5814_v40 = vpop.eup %5813  ;;  %v3415_v0 = vmul.f32 %v5812_v52, %v7976_v22  ;;  %v3273_v57 = vpop.xlane.xlu0 %3272  ;;  %v8762_v22 = vld [vmem:[#allocation51_spill] sm:$0xff]  ;;  %v8768_v52 = vld [vmem:[#allocation36_spill] sm:$0xff] }
 0x549   : > { %v3425_v61 = vmul.f32 %v5814_v40, %v7979_v25  ;;  %v3255_v38 = vpop.xlane.xlu1 %3254  ;;  %v3270_v9 = vpop.xlane.xlu2 %3269 }
 0x54a   : > { %5819 = vrcp.f32 %v3255_v38  ;;  %5417 = vmatmul.msk.f32.vlgmr.msrb.gmra.mxu3 %vm2736_vm10, %v3415_v0 }
 0x54b   : > { %5821 = vrcp.f32 %v3270_v9  ;;  %5421 = vmatmul.msk.f32.vlgmr.msra.gmra.mxu1 %vm2736_vm10, %v3419_v55  ;;  %4244 = vmatpush.msrb.mxu3 %v8761_v7  ;;  %v8207_v39 = vpop.eup %5815 }
 0x54c   : > { %5427 = vmatmul.msk.f32.vlgmr.msrb.gmra.mxu0 %vm2736_vm10, %v3425_v61  ;;  %4302 = vmatpush.msra.mxu1 %v8762_v22  ;;  %v3289_v25 = vsel %vm2736_vm10, %v8207_v39, 0.0  ;;  %v5818_v2 = vpop.eup %5817  ;;  %5823 = vrcp.f32 %v3273_v57 }
 0x54d   : > { %4245 = vmatpush.msrb.mxu3 %v8763_v44  ;;  %3290 = vadd.xlane.f32.xlu2 %v3289_v25  ;;  %v3420_v46 = vmul.f32 %v5818_v2, %v7964_v11 }
 0x54e   : > { %4303 = vmatpush.msra.mxu1 %v8764_v49 }
 0x550   : > { %v5820_v53 = vpop.eup %5819  ;;  %v2910_v51 = vpop.xlane.xlu0 %2909 }
 0x551   : > { %v5822_v43 = vpop.eup %5821  ;;  %v3421_v58 = vmul.f32 %v5820_v53, %v8002_v18  ;;  %v3240_v10 = vpop.xlane.xlu1 %3239  ;;  %v2986_v42 = vsub.f32 %v8023_v20, %v2910_v51 }
 0x552   : > { %5825 = vrcp.f32 %v3240_v10  ;;  %v3258_v48 = vpop.xlane.xlu2 %3257  ;;  %v3426_v3 = vmul.f32 %v5822_v43, %v8005_v32  ;;  %v5824_v18 = vpop.eup %5823 }
 0x553   : > { %5827 = vrcp.f32 %v3258_v48  ;;  %v3107_v60 = vmul.f32 1.442695, %v2986_v42  ;;  %5422 = vmatmul.msk.f32.gmra.mxu1 %vm2736_vm10, %v3420_v46  ;;  %5423 = vmatmul.msk.f32.vlgmr.msra.gmra.mxu2 %vm2736_vm10, %v3421_v58  ;;  %v3427_v47 = vmul.f32 %v5824_v18, %v7997_v36 }
 0x554   : > { %5428 = vmatmul.msk.f32.gmra.mxu0 %vm2736_vm10, %v3426_v3  ;;  %4331 = vmatpush.msra.mxu2 %v8765_v13 }
 0x555   : > { %5829 = vpow2.f32 %v3107_v60 }
 0x556   : > { %4332 = vmatpush.msra.mxu2 %v8766_v14 }
 0x558   : > { %v5826_v20 = vpop.eup %5825  ;;  %v3279_v11 = vpop.xlane.xlu0 %3278 }
 0x559   : > { %v5828_v8 = vpop.eup %5827  ;;  %v3276_v32 = vpop.xlane.xlu1 %3275  ;;  %5831 = vrcp.f32 %v3279_v11  ;;  %v3416_v33 = vmul.f32 %v5826_v20, %v8028_v37  ;;  %v4375_v11 = vld [vmem:[#allocation8 + $0x28] sm:$0xff] }
 0x55a   : > { %5833 = vrcp.f32 %v3276_v32  ;;  %v3261_v1 = vpop.xlane.xlu2 %3260  ;;  %v3422_v5 = vmul.f32 %v5828_v8, %v8031_v28  ;;  %v8280_v20 = vpop.f32.mrf.mxu0 }
 0x55b   : > { %v8227_v29 = vpop.eup %5829  ;;  %5835 = vrcp.f32 %v3261_v1  ;;  %5418 = vmatmul.msk.f32.gmra.mxu3 %vm2736_vm10, %v3416_v33  ;;  %5429 = vmatmul.msk.f32.vlgmr.msrb.gmra.mxu1 %vm2736_vm10, %v3427_v47  ;;  %v8284_v32 = vpop.f32.mrf.mxu1 }
 0x55c   : > { %5424 = vmatmul.msk.f32.gmra.mxu2 %vm2736_vm10, %v3422_v5  ;;  %v3292_v36 = vsel %vm2736_vm10, %v8227_v29, 0.0 }
 0x55d   : > { %3293 = vadd.xlane.f32.xlu0 %v3292_v36 }
 0x55f   : > { %v5832_v24 = vpop.eup %5831 }
 0x560   : > { %v5834_v26 = vpop.eup %5833  ;;  %v3429_v37 = vmul.f32 %v5832_v24, %v8044_v23  ;;  %v3282_v15 = vpop.xlane.xlu0 %3281  ;;  %v8767_v23 = vld [vmem:[#allocation60_spill] sm:$0xff] }
 0x561   : > { %v5836_v50 = vpop.eup %5835  ;;  %v2913_v28 = vpop.xlane.xlu1 %2912  ;;  %5837 = vrcp.f32 %v3282_v15  ;;  %v3428_v31 = vmul.f32 %v5834_v26, %v8047_v19 }
 0x562   : > { %v3423_v41 = vmul.f32 %v5836_v50, %v8050_v45  ;;  %v2987_v17 = vsub.f32 %v8064_v63, %v2913_v28  ;;  %v3264_v4 = vpop.xlane.xlu2 %3263  ;;  %v8282_v8 = vpop.f32.mrf.mxu0 }
 0x563   : > { %5839 = vrcp.f32 %v3264_v4  ;;  %5430 = vmatmul.msk.f32.gmra.mxu1 %vm2736_vm10, %v3428_v31  ;;  %v8290_v24 = vpop.f32.mrf.mxu1  ;;  %v8294_v50 = vpop.f32.mrf.mxu2  ;;  %v4371_v31 = vld [vmem:[#allocation8 + $0x10] sm:$0xff] }
 0x564   : > { %v3109_v6 = vmul.f32 1.442695, %v2987_v17  ;;  %5425 = vmatmul.msk.f32.vlgmr.msra.gmra.mxu3 %vm2736_vm10, %v3423_v41  ;;  %5431 = vmatmul.msk.f32.vlgmr.msrb.gmra.mxu2 %vm2736_vm10, %v3429_v37  ;;  %v4372_v37 = vld [vmem:[#allocation8 + $0x18] sm:$0xff]  ;;  %v4369_v17 = vld [vmem:[#allocation8] sm:$0xff] }
 0x565   : > { %4360 = vmatpush.msra.mxu3 %v8767_v23  ;;  %4551 = vmatpush.msrb.mxu1 %v4372_v37 }
 0x566   : > { %5841 = vpow2.f32 %v3109_v6  ;;  %v4608_v6 = vld [vmem:[#allocation8 + $0x58] sm:$0xff] }
 0x567   : > { %v5838_v12 = vpop.eup %5837  ;;  %4361 = vmatpush.msra.mxu3 %v8768_v52  ;;  %4552 = vmatpush.msrb.mxu1 %v4371_v31 }
 0x568   : > { %v3430_v19 = vmul.f32 %v5838_v12, %v8062_v62  ;;  %4669 = vmatpush.msrb.mxu2 %v4608_v6  ;;  %v4607_v12 = vld [vmem:[#allocation8 + $0x50] sm:$0xff] }
 0x569   : > { %v5840_v45 = vpop.eup %5839  ;;  %v2916_v40 = vpop.xlane.xlu1 %2915 }
 0x56a   : > { %v2988_v63 = vsub.f32 %v8084_v27, %v2916_v40  ;;  %v2919_v0 = vpop.xlane.xlu2 %2918  ;;  %v3424_v57 = vmul.f32 %v5840_v45, %v8068_v16  ;;  %v8287_v5 = vpop.f32.mrf.mxu0  ;;  %4670 = vmatpush.msrb.mxu2 %v4607_v12 }
 0x56b   : > { %v2989_v59 = vsub.f32 %v8079_v34, %v2919_v0  ;;  %v8298_v41 = vpop.f32.mrf.mxu1  ;;  %v8305_v0 = vpop.f32.mrf.mxu3 }
 0x56c   : > { %v8247_v55 = vpop.eup %5841  ;;  %v3111_v61 = vmul.f32 1.442695, %v2988_v63  ;;  %5426 = vmatmul.msk.f32.gmra.mxu3 %vm2736_vm10, %v3424_v57  ;;  %5432 = vmatmul.msk.f32.gmra.mxu2 %vm2736_vm10, %v3430_v19  ;;  %v4605_v19 = vld [vmem:[#allocation8 + $0x40] sm:$0xff] }
 0x56d   : > { %v3113_v38 = vmul.f32 1.442695, %v2989_v59  ;;  %v3295_v62 = vsel %vm2736_vm10, %v8247_v55, 0.0 }
 0x56e   : > { %5843 = vpow2.f32 %v3111_v61  ;;  %3296 = vadd.xlane.f32.xlu1 %v3295_v62 }
 0x56f   : > { %5845 = vpow2.f32 %v3113_v38  ;;  %v8300_v23 = vpop.f32.mrf.mxu2 }
 0x571   : > { %v2922_v27 = vpop.xlane.xlu1 %2921 }
 0x572   : > { %v2990_v9 = vsub.f32 %v8102_v21, %v2922_v27  ;;  %v8292_v26 = vpop.f32.mrf.mxu0 }
 0x573   : > { %v8303_v45 = vpop.f32.mrf.mxu1 }
 0x574   : > { %v8254_v16 = vpop.eup %5843  ;;  %v3115_v34 = vmul.f32 1.442695, %v2990_v9 }
 0x575   : > { %v8256_v7 = vpop.eup %5845  ;;  %v3298_v22 = vsel %vm2736_vm10, %v8254_v16, 0.0 }
 0x576   : > { %5847 = vpow2.f32 %v3115_v34  ;;  %3299 = vadd.xlane.f32.xlu2 %v3298_v22  ;;  %v3301_v44 = vsel %vm2736_vm10, %v8256_v7, 0.0 }
 0x577   : > { %3302 = vadd.xlane.f32.xlu0 %v3301_v44  ;;  %v8307_v57 = vpop.f32.mrf.mxu2  ;;  %v8314_v34 = vpop.f32.mrf.mxu3 }
 0x57a   : > { %v2928_v25 = vpop.xlane.xlu1 %2927  ;;  %v3696_v4 = vpop.f32.mrf.mxu0 }
 0x57b   : > { %v2992_v2 = vsub.f32 %v8117_v54, %v2928_v25 }
 0x57c   : > { %v8263_v49 = vpop.eup %5847 }
 0x57d   : > { %v3119_v21 = vmul.f32 1.442695, %v2992_v2  ;;  %v3304_v53 = vsel %vm2736_vm10, %v8263_v49, 0.0 }
 0x57e   : > { %3305 = vadd.xlane.f32.xlu1 %v3304_v53 }
 0x57f   : > { %5849 = vpow2.f32 %v3119_v21 }
 0x580   : > { %v3725_v62 = vpop.f32.mrf.mxu1  ;;  %v8319_v2 = vpop.f32.mrf.mxu2 }
 0x585   : > { %v8267_v51 = vpop.eup %5849 }
 0x586   : > { %v3310_v43 = vsel %vm2736_vm10, %v8267_v51, 0.0 }
 0x587   : > { %3311 = vadd.xlane.f32.xlu0 %v3310_v43  ;;  %v3288_v10 = vpop.xlane.xlu2 %3287  ;;  %v3699_v40 = vpop.f32.mrf.mxu0 }
 0x58f   : > { %v8312_v27 = vpop.f32.mrf.mxu0  ;;  %v3728_v21 = vpop.f32.mrf.mxu1 }
 0x590   : > { %v3285_v58 = vpop.xlane.xlu0 %3284 }
 0x591   : > { %5851 = vrcp.f32 %v3285_v58 }
 0x592   : > { %5853 = vrcp.f32 %v3288_v10  ;;  %v8324_v10 = vpop.f32.mrf.mxu3 }
 0x597   : > { %v5852_v42 = vpop.eup %5851 }
 0x598   : > { %v3431_v54 = vmul.f32 %v5852_v42, %v8150_v35  ;;  %v2925_v46 = vpop.xlane.xlu0 %2924  ;;  %v5854_v60 = vpop.eup %5853  ;;  %v4377_v35 = vld [vmem:[#allocation8 + $0x38] sm:$0xff] }
 0x599   : > { %v2991_v48 = vsub.f32 %v8099_v30, %v2925_v46  ;;  %v3432_v13 = vmul.f32 %v5854_v60, %v8143_v56  ;;  %4438 = vmatpush.msrb.mxu0 %v4377_v35  ;;  %v4376_v30 = vld [vmem:[#allocation8 + $0x30] sm:$0xff]  ;;  %v4374_v56 = vld [vmem:[#allocation8 + $0x20] sm:$0xff] }
 0x59a   : > { %5433 = vmatmul.msk.f32.vlgmr.msrb.gmra.mxu3 %vm2736_vm10, %v3431_v54  ;;  %v8333_v54 = vpop.f32.mrf.mxu3  ;;  %v4741_v60 = vld [vmem:[#allocation8 + $0x70] sm:$0xff]  ;;  %v4739_v35 = vld [vmem:[#allocation8 + $0x60] sm:$0xff] }
 0x59b   : > { %v3117_v3 = vmul.f32 1.442695, %v2991_v48  ;;  %4439 = vmatpush.msrb.mxu0 %v4376_v30 }
 0x59d   : > { %5855 = vpow2.f32 %v3117_v3  ;;  %4440 = vmatpush.msrb.mxu0 %v4375_v11  ;;  %v4742_v3 = vld [vmem:[#allocation8 + $0x78] sm:$0xff] }
 0x59e   : > { %4803 = vmatpush.msrb.mxu3 %v4742_v3 }
 0x59f   : > { %4441 = vmatpush.msrb.mxu0 %v4374_v56 }
 0x5a0   : > { %v3815_v53 = vpop.f32.mrf.mxu0  ;;  %4804 = vmatpush.msrb.mxu3 %v4741_v60  ;;  %v5873_v60 = vld [vmem:[%s6251_s16] sm:$0xff] }
 0x5a2   : > { %5434 = vmatmul.msk.f32.gmra.mxu3 %vm2736_vm10, %v3432_v13  ;;  %v3783_v13 = vpop.f32.mrf.mxu3 }
 0x5a3   : > { %v8276_v18 = vpop.eup %5855 }
 0x5a4   : > { %v3307_v14 = vsel %vm2736_vm10, %v8276_v18, 0.0 }
 0x5a5   : > { %3308 = vadd.xlane.f32.xlu2 %v3307_v14  ;;  %v4740_v14 = vld [vmem:[#allocation8 + $0x68] sm:$0xff] }
 0x5a6   : > { %4805 = vmatpush.msrb.mxu3 %v4740_v14 }
 0x5a8   : > { %v3928_v42 = vpop.f32.mrf.mxu0  ;;  %4806 = vmatpush.msrb.mxu3 %v4739_v35 }
 0x5ae   : > { %v3786_v11 = vpop.f32.mrf.mxu3 }
 0x5b0   : > { %v3931_v48 = vpop.f32.mrf.mxu0 }
 0x5b9   : > { %v4044_v56 = vpop.f32.mrf.mxu0 }
 0x5c0   : > { %v3291_v47 = vpop.xlane.xlu2 %3290 }
 0x5c1   : > { %5857 = vrcp.f32 %v3291_v47 }
 0x5c7   : > { %v5858_v33 = vpop.eup %5857 }
 0x5c8   : > { %v3433_v1 = vmul.f32 %v5858_v33, %v8207_v39  ;;  %v4370_v39 = vld [vmem:[#allocation8 + $0x8] sm:$0xff] }
 0x5c9   : > { %4553 = vmatpush.msrb.mxu1 %v4370_v39 }
 0x5ca   : > { %5435 = vmatmul.msk.f32.vlgmr.msra.gmra.mxu0 %vm2736_vm10, %v3433_v1 }
 0x5cb   : > { %4554 = vmatpush.msrb.mxu1 %v4369_v17 }
 0x5d0   : > { %v3294_v36 = vpop.xlane.xlu0 %3293 }
 0x5d1   : > { %5859 = vrcp.f32 %v3294_v36  ;;  %v3899_v36 = vpop.f32.mrf.mxu3 }
 0x5d7   : > { %v5860_v15 = vpop.eup %5859 }
 0x5d8   : > { %v3434_v28 = vmul.f32 %v5860_v15, %v8227_v29  ;;  %v4606_v29 = vld [vmem:[#allocation8 + $0x48] sm:$0xff] }
 0x5d9   : > { %4671 = vmatpush.msrb.mxu2 %v4606_v29  ;;  %v3902_v31 = vpop.f32.mrf.mxu3 }
 0x5da   : > { %5436 = vmatmul.msk.f32.gmra.mxu0 %vm2736_vm10, %v3434_v28 }
 0x5db   : > { %4672 = vmatpush.msrb.mxu2 %v4605_v19 }
 0x5e1   : > { %v3297_v52 = vpop.xlane.xlu1 %3296 }
 0x5e2   : > { %5861 = vrcp.f32 %v3297_v52  ;;  %5443 = vmatmul.msk.f32.vlgmr.msrb.gmra.mxu0 %vm339_vm0, %v3696_v4  ;;  %v4015_v4 = vpop.f32.mrf.mxu3 }
 0x5e8   : > { %v5862_v63 = vpop.eup %5861 }
 0x5e9   : > { %v3435_v59 = vmul.f32 %v5862_v63, %v8247_v55  ;;  %v3300_v61 = vpop.xlane.xlu2 %3299 }
 0x5ea   : > { %5863 = vrcp.f32 %v3300_v61  ;;  %v3303_v38 = vpop.xlane.xlu0 %3302  ;;  %5444 = vmatmul.msk.f32.gmra.mxu0 %vm339_vm0, %v3699_v40  ;;  %v4018_v12 = vpop.f32.mrf.mxu3 }
 0x5eb   : > { %5865 = vrcp.f32 %v3303_v38  ;;  %5437 = vmatmul.msk.f32.vlgmr.msra.gmra.mxu1 %vm2736_vm10, %v3435_v59 }
 0x5f0   : > { %v5864_v9 = vpop.eup %5863 }
 0x5f1   : > { %v5866_v22 = vpop.eup %5865  ;;  %v3306_v44 = vpop.xlane.xlu1 %3305  ;;  %v3436_v25 = vmul.f32 %v5864_v9, %v8254_v16 }
 0x5f2   : > { %v3437_v55 = vmul.f32 %v5866_v22, %v8256_v7  ;;  %5867 = vrcp.f32 %v3306_v44  ;;  %5445 = vmatmul.msk.f32.gmra.mxu0 %vm339_vm0, %v3725_v62  ;;  %v3754_v16 = vpop.f32.mrf.mxu2  ;;  %v3841_v7 = vpop.f32.mrf.mxu1 }
 0x5f3   : > { %5438 = vmatmul.msk.f32.gmra.mxu1 %vm2736_vm10, %v3436_v25 }
 0x5f4   : > { %5439 = vmatmul.msk.f32.vlgmr.msra.gmra.mxu2 %vm2736_vm10, %v3437_v55 }
 0x5f8   : > { %v5868_v43 = vpop.eup %5867 }
 0x5f9   : > { %v3438_v58 = vmul.f32 %v5868_v43, %v8263_v49 }
 0x5fa   : > { %5446 = vmatmul.msk.f32.gmra.mxu0 %vm339_vm0, %v3728_v21  ;;  %v3757_v49 = vpop.f32.mrf.mxu2  ;;  %v3844_v46 = vpop.f32.mrf.mxu1 }
 0x5fb   : > { %5459 = vmatmul.msk.f32.vlgmr.msrb.gmra.mxu1 %vm339_vm0, %v8280_v20  ;;  %v3312_v33 = vpop.xlane.xlu0 %3311 }
 0x5fc   : > { %5440 = vmatmul.msk.f32.gmra.mxu2 %vm2736_vm10, %v3438_v58 }
 0x602   : > { %5447 = vmatmul.msk.f32.gmra.mxu0 %vm339_vm0, %v3754_v16  ;;  %v3870_v20 = vpop.f32.mrf.mxu2  ;;  %v3957_v30 = vpop.f32.mrf.mxu1 }
 0x603   : > { %5460 = vmatmul.msk.f32.gmra.mxu1 %vm339_vm0, %v8282_v8 }
 0x604   : > { %5475 = vmatmul.msk.f32.vlgmr.msrb.gmra.mxu2 %vm339_vm0, %v3928_v42  ;;  %v8414_v42 = vld [vmem:[%s8523_s5] ss:$0 sm:$0xff] }
 0x60a   : > { %5448 = vmatmul.msk.f32.gmra.mxu0 %vm339_vm0, %v3757_v49  ;;  %v3873_v47 = vpop.f32.mrf.mxu2 }
 0x60b   : > { %5461 = vmatmul.msk.f32.gmra.mxu1 %vm339_vm0, %v8284_v32  ;;  %v3960_v32 = vpop.f32.mrf.mxu1 }
 0x60c   : > { %5476 = vmatmul.msk.f32.gmra.mxu2 %vm339_vm0, %v3931_v48 }
 0x612   : > { %5449 = vmatmul.msk.f32.gmra.mxu0 %vm339_vm0, %v3783_v13  ;;  %v3986_v37 = vpop.f32.mrf.mxu2 }
 0x613   : > { %5462 = vmatmul.msk.f32.gmra.mxu1 %vm339_vm0, %v8290_v24  ;;  %v4073_v39 = vpop.f32.mrf.mxu1 }
 0x614   : > { %5477 = vmatmul.msk.f32.gmra.mxu2 %vm339_vm0, %v3957_v30 }
 0x618   : > { %v3309_v8 = vpop.xlane.xlu2 %3308 }
 0x619   : > { %5869 = vrcp.f32 %v3309_v8 }
 0x61a   : > { %5450 = vmatmul.msk.f32.gmra.mxu0 %vm339_vm0, %v3786_v11  ;;  %5871 = vrcp.f32 %v3312_v33 }
 0x61b   : > { %5463 = vmatmul.msk.f32.gmra.mxu1 %vm339_vm0, %v8294_v50  ;;  %v4047_v50 = vpop.f32.mrf.mxu0 }
 0x61c   : > { %5478 = vmatmul.msk.f32.gmra.mxu2 %vm339_vm0, %v3960_v32  ;;  %v5874_v32 = vld [vmem:[%s6251_s16 + $0x8] sm:$0xff] }
 0x61f   : > { %v5870_v1 = vpop.eup %5869 }
 0x620   : > { %v3439_v24 = vmul.f32 %v5870_v1, %v8276_v18  ;;  %v5872_v15 = vpop.eup %5871  ;;  %v3989_v18 = vpop.f32.mrf.mxu2 }
 0x621   : > { %v3440_v28 = vmul.f32 %v5872_v15, %v8267_v51  ;;  %v4076_v51 = vpop.f32.mrf.mxu1 }
 0x622   : > { %5441 = vmatmul.msk.f32.vlgmr.msra.gmra.mxu3 %vm2736_vm10, %v3439_v24  ;;  %5451 = vmatmul.msk.f32.gmra.mxu0 %vm339_vm0, %v8312_v27 }
 0x623   : > { %5464 = vmatmul.msk.f32.gmra.mxu1 %vm339_vm0, %v8300_v23  ;;  %v4160_v17 = vpop.f32.mrf.mxu0 }
 0x624   : > { %5479 = vmatmul.msk.f32.gmra.mxu2 %vm339_vm0, %v3986_v37 }
 0x628   : > { %v4102_v23 = vpop.f32.mrf.mxu2 }
 0x629   : > { %v4189_v52 = vpop.f32.mrf.mxu1 }
 0x62a   : > { %5442 = vmatmul.msk.f32.gmra.mxu3 %vm2736_vm10, %v3440_v28  ;;  %5452 = vmatmul.msk.f32.gmra.mxu0 %vm339_vm0, %v3815_v53 }
 0x62b   : > { %5465 = vmatmul.msk.f32.gmra.mxu1 %vm339_vm0, %v8305_v0  ;;  %v4163_v6 = vpop.f32.mrf.mxu0 }
 0x62c   : > { %5480 = vmatmul.msk.f32.gmra.mxu2 %vm339_vm0, %v3989_v18  ;;  %v5875_v18 = vld [vmem:[%s6251_s16 + $0x10] sm:$0xff] }
 0x630   : > { %v4105_v29 = vpop.f32.mrf.mxu2 }
 0x631   : > { %v4192_v19 = vpop.f32.mrf.mxu1 }
 0x632   : > { %5453 = vmatmul.msk.f32.gmra.mxu0 %vm339_vm0, %v3841_v7  ;;  %5491 = vmatmul.msk.f32.vlgmr.msrb.gmra.mxu3 %vm339_vm0, %v4160_v17 }
 0x633   : > { %5466 = vmatmul.msk.f32.gmra.mxu1 %vm339_vm0, %v8314_v34 }
 0x634   : > { %5481 = vmatmul.msk.f32.gmra.mxu2 %vm339_vm0, %v4015_v4 }
 0x638   : > { %v4218_v40 = vpop.f32.mrf.mxu2 }
 0x63a   : > { %5454 = vmatmul.msk.f32.gmra.mxu0 %vm339_vm0, %v3844_v46  ;;  %5492 = vmatmul.msk.f32.gmra.mxu3 %vm339_vm0, %v4163_v6 }
 0x63b   : > { %5467 = vmatmul.msk.f32.gmra.mxu1 %vm339_vm0, %v8287_v5  ;;  %v4131_v5 = vpop.f32.mrf.mxu3 }
 0x63c   : > { %5482 = vmatmul.msk.f32.gmra.mxu2 %vm339_vm0, %v4018_v12 }
 0x640   : > { %v4221_v63 = vpop.f32.mrf.mxu2 }
 0x642   : > { %5455 = vmatmul.msk.f32.gmra.mxu0 %vm339_vm0, %v3870_v20  ;;  %5493 = vmatmul.msk.f32.gmra.mxu3 %vm339_vm0, %v4189_v52 }
 0x643   : > { %5468 = vmatmul.msk.f32.gmra.mxu1 %vm339_vm0, %v8292_v26  ;;  %v4134_v26 = vpop.f32.mrf.mxu3 }
 0x644   : > { %5483 = vmatmul.msk.f32.gmra.mxu2 %vm339_vm0, %v4044_v56 }
 0x647   : > { %v4276_v0 = vpop.f32.mrf.mxu0 }
 0x64a   : > { %5456 = vmatmul.msk.f32.gmra.mxu0 %vm339_vm0, %v3873_v47  ;;  %5494 = vmatmul.msk.f32.gmra.mxu3 %vm339_vm0, %v4192_v19 }
 0x64b   : > { %5469 = vmatmul.msk.f32.gmra.mxu1 %vm339_vm0, %v8298_v41  ;;  %v4247_v41 = vpop.f32.mrf.mxu3 }
 0x64c   : > { %5484 = vmatmul.msk.f32.gmra.mxu2 %vm339_vm0, %v4047_v50 }
 0x652   : > { %5457 = vmatmul.msk.f32.gmra.mxu0 %vm339_vm0, %v3899_v36  ;;  %5495 = vmatmul.msk.f32.gmra.mxu3 %vm339_vm0, %v4218_v40 }
 0x653   : > { %5470 = vmatmul.msk.f32.gmra.mxu1 %vm339_vm0, %v8303_v45  ;;  %v4250_v45 = vpop.f32.mrf.mxu3 }
 0x654   : > { %5485 = vmatmul.msk.f32.gmra.mxu2 %vm339_vm0, %v4073_v39 }
 0x65a   : > { %5458 = vmatmul.msk.f32.gmra.mxu0 %vm339_vm0, %v3902_v31  ;;  %5496 = vmatmul.msk.f32.gmra.mxu3 %vm339_vm0, %v4221_v63 }
 0x65b   : > { %5471 = vmatmul.msk.f32.gmra.mxu1 %vm339_vm0, %v8307_v57  ;;  %v4279_v57 = vpop.f32.mrf.mxu0 }
 0x65c   : > { %5486 = vmatmul.msk.f32.gmra.mxu2 %vm339_vm0, %v4076_v51 }
 0x662   : > { %5497 = vmatmul.msk.f32.gmra.mxu3 %vm339_vm0, %v4247_v41 }
 0x663   : > { %5472 = vmatmul.msk.f32.gmra.mxu1 %vm339_vm0, %v8319_v2  ;;  %v4443_v9 = vpop.f32.mrf.mxu0 }
 0x664   : > { %5487 = vmatmul.msk.f32.gmra.mxu2 %vm339_vm0, %v4102_v23 }
 0x668   : > { %v4305_v59 = vpop.f32.mrf.mxu1 }
 0x66a   : > { %5498 = vmatmul.msk.f32.gmra.mxu3 %vm339_vm0, %v4250_v45 }
 0x66b   : > { %5473 = vmatmul.msk.f32.gmra.mxu1 %vm339_vm0, %v8324_v10  ;;  %v4446_v44 = vpop.f32.mrf.mxu0 }
 0x66c   : > { %5488 = vmatmul.msk.f32.gmra.mxu2 %vm339_vm0, %v4105_v29  ;;  %v5876_v29 = vld [vmem:[%s6251_s16 + $0x18] sm:$0xff] }
 0x670   : > { %v4308_v38 = vpop.f32.mrf.mxu1 }
 0x672   : > { %5499 = vmatmul.msk.f32.gmra.mxu3 %vm339_vm0, %v4276_v0  ;;  %v5877_v0 = vld [vmem:[%s6251_s16 + $0x20] sm:$0xff] }
 0x673   : > { %5474 = vmatmul.msk.f32.gmra.mxu1 %vm339_vm0, %v8333_v54  ;;  %v4449_v21 = vpop.f32.mrf.mxu0 }
 0x674   : > { %5489 = vmatmul.msk.f32.gmra.mxu2 %vm339_vm0, %v4131_v5 }
 0x677   : > { %v4334_v61 = vpop.f32.mrf.mxu2 }
 0x678   : > { %v4556_v27 = vpop.f32.mrf.mxu1 }
 0x679   : > { %v4557_v58 = vadd.f32 %v4556_v27, %v4443_v9 }
 0x67a   : > { %5500 = vmatmul.msk.f32.gmra.mxu3 %vm339_vm0, %v4279_v57 }
 0x67b   : > { %v4452_v16 = vpop.f32.mrf.mxu0 }
 0x67c   : > { %5490 = vmatmul.msk.f32.gmra.mxu2 %vm339_vm0, %v4134_v26 }
 0x67f   : > { %v4337_v62 = vpop.f32.mrf.mxu2 }
 0x680   : > { %v4559_v22 = vpop.f32.mrf.mxu1 }
 0x681   : > { %v4560_v3 = vadd.f32 %v4559_v22, %v4446_v44  ;;  %v5878_v44 = vld [vmem:[%s6251_s16 + $0x28] sm:$0xff] }
 0x682   : > { %5501 = vmatmul.msk.f32.gmra.mxu3 %vm339_vm0, %v4305_v59 }
 0x683   : > { %v4455_v30 = vpop.f32.mrf.mxu0 }
 0x687   : > { %v4674_v34 = vpop.f32.mrf.mxu2 }
 0x688   : > { %v4562_v2 = vpop.f32.mrf.mxu1  ;;  %v4722_v7 = vadd.f32 %v4674_v34, %v4557_v58 }
 0x689   : > { %v4563_v56 = vadd.f32 %v4562_v2, %v4449_v21 }
 0x68a   : > { %5502 = vmatmul.msk.f32.gmra.mxu3 %vm339_vm0, %v4308_v38 }
 0x68b   : > { %v4458_v15 = vpop.f32.mrf.mxu0 }
 0x68f   : > { %v4677_v25 = vpop.f32.mrf.mxu2 }
 0x690   : > { %v4565_v10 = vpop.f32.mrf.mxu1  ;;  %v4723_v14 = vadd.f32 %v4677_v25, %v4560_v3 }
 0x691   : > { %v4566_v31 = vadd.f32 %v4565_v10, %v4452_v16 }
 0x692   : > { %5503 = vmatmul.msk.f32.gmra.mxu3 %vm339_vm0, %v4334_v61 }
 0x693   : > { %v4461_v12 = vpop.f32.mrf.mxu0 }
 0x697   : > { %v4680_v53 = vpop.f32.mrf.mxu2 }
 0x698   : > { %v4568_v20 = vpop.f32.mrf.mxu1  ;;  %v4724_v1 = vadd.f32 %v4680_v53, %v4563_v56 }
 0x699   : > { %v4569_v52 = vadd.f32 %v4568_v20, %v4455_v30 }
 0x69a   : > { %5504 = vmatmul.msk.f32.gmra.mxu3 %vm339_vm0, %v4337_v62 }
 0x69b   : > { %v4464_v61 = vpop.f32.mrf.mxu0 }
 0x69f   : > { %v4683_v54 = vpop.f32.mrf.mxu2 }
 0x6a0   : > { %v4571_v37 = vpop.f32.mrf.mxu1  ;;  %v4725_v17 = vadd.f32 %v4683_v54, %v4566_v31 }
 0x6a1   : > { %v4572_v45 = vadd.f32 %v4571_v37, %v4458_v15 }
 0x6a3   : > { %v4467_v53 = vpop.f32.mrf.mxu0 }
 0x6a5   : > { %v4363_v55 = vpop.f32.mrf.mxu3 }
 0x6a6   : > { %5505 = vmatmul.msk.f32.gmra.mxu3 %vm339_vm0, %v4363_v55 }
 0x6a7   : > { %v4686_v8 = vpop.f32.mrf.mxu2 }
 0x6a8   : > { %v4574_v23 = vpop.f32.mrf.mxu1  ;;  %v4726_v40 = vadd.f32 %v4686_v8, %v4569_v52 }
 0x6a9   : > { %v4575_v22 = vadd.f32 %v4574_v23, %v4461_v12 }
 0x6ad   : > { %v4366_v43 = vpop.f32.mrf.mxu3 }
 0x6ae   : > { %5506 = vmatmul.msk.f32.gmra.mxu3 %vm339_vm0, %v4366_v43 }
 0x6af   : > { %v4689_v28 = vpop.f32.mrf.mxu2 }
 0x6b0   : > { %v4577_v59 = vpop.f32.mrf.mxu1  ;;  %v4727_v38 = vadd.f32 %v4689_v28, %v4572_v45 }
 0x6b1   : > { %v4578_v16 = vadd.f32 %v4577_v59, %v4464_v61 }
 0x6b5   : > { %v4808_v49 = vpop.f32.mrf.mxu3 }
 0x6b6   : > { %v4856_v46 = vadd.f32 %v4808_v49, %v4722_v7  ;;  %v5879_v7 = vld [vmem:[%s6251_s16 + $0x30] sm:$0xff] }
 0x6b7   : > { %v4692_v5 = vpop.f32.mrf.mxu2 }
 0x6b8   : > { %v4876_v48 = vadd.f32 %v8414_v42, %v4856_v46  ;;  %v4728_v55 = vadd.f32 %v4692_v5, %v4575_v22  ;;  %v4580_v2 = vpop.f32.mrf.mxu1  ;;  %v5883_v5 = vld [vmem:[%s6251_s16 + $0x50] sm:$0xff] }
 0x6b9   : > { %v4581_v20 = vadd.f32 %v4580_v2, %v4467_v53 }
 0x6ba   : > { %v4892_v13 = vadd.f32 %v5873_v60, %v4876_v48  ;;  %v4470_v60 = vpop.f32.mrf.mxu0 }
 0x6bc   : > { %4908 = vst.msk [vmem:[%s8420_s9] sm:$0xff] %vm339_vm0, %v4892_v13 }
 0x6bd   : > { %v4811_v35 = vpop.f32.mrf.mxu3 }
 0x6be   : > { %v4857_v11 = vadd.f32 %v4811_v35, %v4723_v14  ;;  %v5880_v35 = vld [vmem:[%s6251_s16 + $0x38] sm:$0xff] }
 0x6bf   : > { %v4695_v62 = vpop.f32.mrf.mxu2 }
 0x6c0   : > { %v4877_v47 = vadd.f32 %v8414_v42, %v4857_v11  ;;  %v4729_v49 = vadd.f32 %v4695_v62, %v4578_v16  ;;  %v4583_v3 = vpop.f32.mrf.mxu1 }
 0x6c2   : > { %v4893_v33 = vadd.f32 %v5874_v32, %v4877_v47 }
 0x6c4   : > { %4909 = vst.msk [vmem:[%s8420_s9 + $0x8] sm:$0xff] %vm339_vm0, %v4893_v33  ;;  %v4473_v33 = vpop.f32.mrf.mxu0 }
 0x6c5   : > { %v4814_v36 = vpop.f32.mrf.mxu3 }
 0x6c6   : > { %v4858_v24 = vadd.f32 %v4814_v36, %v4724_v1  ;;  %v4584_v1 = vadd.f32 %v4583_v3, %v4470_v60  ;;  %v5881_v36 = vld [vmem:[%s6251_s16 + $0x40] sm:$0xff] }
 0x6c7   : > { %v4698_v58 = vpop.f32.mrf.mxu2 }
 0x6c8   : > { %v4878_v50 = vadd.f32 %v8414_v42, %v4858_v24  ;;  %v4730_v11 = vadd.f32 %v4698_v58, %v4581_v20  ;;  %v4586_v32 = vpop.f32.mrf.mxu1 }
 0x6ca   : > { %v4894_v39 = vadd.f32 %v5875_v18, %v4878_v50  ;;  %v4587_v18 = vadd.f32 %v4586_v32, %v4473_v33 }
 0x6cc   : > { %4910 = vst.msk [vmem:[%s8420_s9 + $0x10] sm:$0xff] %vm339_vm0, %v4894_v39  ;;  %v5882_v39 = vld [vmem:[%s6251_s16 + $0x48] sm:$0xff] }
 0x6cd   : > { %v4817_v4 = vpop.f32.mrf.mxu3 }
 0x6ce   : > { %v4859_v51 = vadd.f32 %v4817_v4, %v4725_v17 }
 0x6cf   : > { %v4701_v14 = vpop.f32.mrf.mxu2 }
 0x6d0   : > { %v4879_v6 = vadd.f32 %v8414_v42, %v4859_v51  ;;  %v4731_v15 = vadd.f32 %v4701_v14, %v4584_v1  ;;  %v4589_v4 = vpop.f32.mrf.mxu1  ;;  %v4476_v51 = vpop.f32.mrf.mxu0 }
 0x6d2   : > { %v4895_v19 = vadd.f32 %v5876_v29, %v4879_v6 }
 0x6d4   : > { %4911 = vst.msk [vmem:[%s8420_s9 + $0x18] sm:$0xff] %vm339_vm0, %v4895_v19  ;;  %v4590_v19 = vadd.f32 %v4589_v4, %v4476_v51 }
 0x6d5   : > { %v4820_v26 = vpop.f32.mrf.mxu3 }
 0x6d6   : > { %v4860_v63 = vadd.f32 %v4820_v26, %v4726_v40 }
 0x6d7   : > { %v4704_v37 = vpop.f32.mrf.mxu2 }
 0x6d8   : > { %v4880_v41 = vadd.f32 %v8414_v42, %v4860_v63  ;;  %v4732_v6 = vadd.f32 %v4704_v37, %v4587_v18  ;;  %v4592_v63 = vpop.f32.mrf.mxu1 }
 0x6da   : > { %v4896_v57 = vadd.f32 %v5877_v0, %v4880_v41  ;;  %v4479_v0 = vpop.f32.mrf.mxu0 }
 0x6db   : > { %v4593_v61 = vadd.f32 %v4592_v63, %v4479_v0 }
 0x6dc   : > { %4912 = vst.msk [vmem:[%s8420_s9 + $0x20] sm:$0xff] %vm339_vm0, %v4896_v57 }
 0x6dd   : > { %v4823_v27 = vpop.f32.mrf.mxu3 }
 0x6de   : > { %v4861_v9 = vadd.f32 %v4823_v27, %v4727_v38  ;;  %v5884_v38 = vld [vmem:[%s6251_s16 + $0x58] sm:$0xff] }
 0x6df   : > { %v4707_v23 = vpop.f32.mrf.mxu2 }
 0x6e0   : > { %v4881_v34 = vadd.f32 %v8414_v42, %v4861_v9  ;;  %v4733_v26 = vadd.f32 %v4707_v23, %v4590_v19  ;;  %v4595_v22 = vpop.f32.mrf.mxu1 }
 0x6e2   : > { %v4897_v25 = vadd.f32 %v5878_v44, %v4881_v34 }
 0x6e4   : > { %4913 = vst.msk [vmem:[%s8420_s9 + $0x28] sm:$0xff] %vm339_vm0, %v4897_v25  ;;  %v4482_v25 = vpop.f32.mrf.mxu0 }
 0x6e5   : > { %v4826_v21 = vpop.f32.mrf.mxu3  ;;  %v4596_v2 = vadd.f32 %v4595_v22, %v4482_v25 }
 0x6e6   : > { %v4862_v43 = vadd.f32 %v4826_v21, %v4728_v55  ;;  %v5885_v21 = vld [vmem:[%s6251_s16 + $0x60] sm:$0xff] }
 0x6e7   : > { %v4710_v57 = vpop.f32.mrf.mxu2 }
 0x6e8   : > { %v4882_v10 = vadd.f32 %v8414_v42, %v4862_v43  ;;  %v4734_v27 = vadd.f32 %v4710_v57, %v4593_v61 }
 0x6ea   : > { %v4898_v54 = vadd.f32 %v5879_v7, %v4882_v10  ;;  %v4598_v7 = vpop.f32.mrf.mxu1 }
 0x6ec   : > { %4914 = vst.msk [vmem:[%s8420_s9 + $0x30] sm:$0xff] %vm339_vm0, %v4898_v54  ;;  %v5886_v54 = vld [vmem:[%s6251_s16 + $0x68] sm:$0xff] }
 0x6ed   : > { %v4829_v46 = vpop.f32.mrf.mxu3 }
 0x6ee   : > { %v4863_v48 = vadd.f32 %v4829_v46, %v4729_v49  ;;  %v4485_v46 = vpop.f32.mrf.mxu0 }
 0x6ef   : > { %v4713_v55 = vpop.f32.mrf.mxu2  ;;  %v4599_v3 = vadd.f32 %v4598_v7, %v4485_v46 }
 0x6f0   : > { %v4883_v13 = vadd.f32 %v8414_v42, %v4863_v48  ;;  %v4735_v43 = vadd.f32 %v4713_v55, %v4596_v2 }
 0x6f2   : > { %v4899_v30 = vadd.f32 %v5880_v35, %v4883_v13  ;;  %v4601_v20 = vpop.f32.mrf.mxu1 }
 0x6f4   : > { %4915 = vst.msk [vmem:[%s8420_s9 + $0x38] sm:$0xff] %vm339_vm0, %v4899_v30 }
 0x6f5   : > { %v4832_v8 = vpop.f32.mrf.mxu3 }
 0x6f6   : > { %v4864_v47 = vadd.f32 %v4832_v8, %v4730_v11  ;;  %v4488_v30 = vpop.f32.mrf.mxu0 }
 0x6f7   : > { %v4716_v48 = vpop.f32.mrf.mxu2  ;;  %v4602_v8 = vadd.f32 %v4601_v20, %v4488_v30 }
 0x6f8   : > { %v4884_v56 = vadd.f32 %v8414_v42, %v4864_v47  ;;  %v4736_v60 = vadd.f32 %v4716_v48, %v4599_v3  ;;  %v5887_v47 = vld [vmem:[%s6251_s16 + $0x70] sm:$0xff] }
 0x6fa   : > { %v4900_v24 = vadd.f32 %v5881_v36, %v4884_v56 }
 0x6fc   : > { %4916 = vst.msk [vmem:[%s8420_s9 + $0x40] sm:$0xff] %vm339_vm0, %v4900_v24  ;;  %v5888_v24 = vld [vmem:[%s6251_s16 + $0x78] sm:$0xff] }
 0x6fd   : > { %v4835_v50 = vpop.f32.mrf.mxu3 }
 0x6fe   : > { %v4865_v28 = vadd.f32 %v4835_v50, %v4731_v15 }
 0x6ff   : > { %v4719_v11 = vpop.f32.mrf.mxu2 }
 0x700   : > { %v4885_v31 = vadd.f32 %v8414_v42, %v4865_v28  ;;  %v4737_v32 = vadd.f32 %v4719_v11, %v4602_v8 }
 0x702   : > { %v4901_v17 = vadd.f32 %v5882_v39, %v4885_v31 }
 0x704   : > { %4917 = vst.msk [vmem:[%s8420_s9 + $0x48] sm:$0xff] %vm339_vm0, %v4901_v17 }
 0x705   : > { %v4838_v12 = vpop.f32.mrf.mxu3 }
 0x706   : > { %v4866_v52 = vadd.f32 %v4838_v12, %v4732_v6 }
 0x708   : > { %v4886_v29 = vadd.f32 %v8414_v42, %v4866_v52 }
 0x70a   : > { %v4902_v40 = vadd.f32 %v5883_v5, %v4886_v29 }
 0x70c   : > { %4918 = vst.msk [vmem:[%s8420_s9 + $0x50] sm:$0xff] %vm339_vm0, %v4902_v40 }
 0x70d   : > { %v4841_v41 = vpop.f32.mrf.mxu3 }
 0x70e   : > { %v4867_v45 = vadd.f32 %v4841_v41, %v4733_v26 }
 0x710   : > { %v4887_v59 = vadd.f32 %v8414_v42, %v4867_v45 }
 0x712   : > { %v4903_v62 = vadd.f32 %v5884_v38, %v4887_v59 }
 0x714   : > { %4919 = vst.msk [vmem:[%s8420_s9 + $0x58] sm:$0xff] %vm339_vm0, %v4903_v62 }
 0x715   : > { %v4844_v9 = vpop.f32.mrf.mxu3 }
 0x716   : > { %v4868_v34 = vadd.f32 %v4844_v9, %v4734_v27 }
 0x718   : > { %v4888_v44 = vadd.f32 %v8414_v42, %v4868_v34 }
 0x71a   : > { %v4904_v53 = vadd.f32 %v5885_v21, %v4888_v44 }
 0x71c   : > { %4920 = vst.msk [vmem:[%s8420_s9 + $0x60] sm:$0xff] %vm339_vm0, %v4904_v53 }
 0x71d   : > { %v4847_v58 = vpop.f32.mrf.mxu3 }
 0x71e   : > { %v4869_v10 = vadd.f32 %v4847_v58, %v4735_v43 }
 0x720   : > { %v4889_v16 = vadd.f32 %v8414_v42, %v4869_v10 }
 0x722   : > { %v4905_v49 = vadd.f32 %v5886_v54, %v4889_v16 }
 0x724   : > { %4921 = vst.msk [vmem:[%s8420_s9 + $0x68] sm:$0xff] %vm339_vm0, %v4905_v49 }
 0x729   : > { %v4850_v13 = vpop.f32.mrf.mxu3 }
 0x72a   : > { %v4870_v14 = vadd.f32 %v4850_v13, %v4736_v60 }
 0x72c   : > { %v4890_v35 = vadd.f32 %v8414_v42, %v4870_v14 }
 0x72e   : > { %v4906_v56 = vadd.f32 %v5887_v47, %v4890_v35 }
 0x730   : > { %4922 = vst.msk [vmem:[%s8420_s9 + $0x70] sm:$0xff] %vm339_vm0, %v4906_v56 }
 0x731   : > { %v4853_v33 = vpop.f32.mrf.mxu3 }
 0x732   : > { %v4871_v1 = vadd.f32 %v4853_v33, %v4737_v32 }
 0x734   : > { %v4891_v36 = vadd.f32 %v8414_v42, %v4871_v1 }
 0x736   : > { %v4907_v37 = vadd.f32 %v5888_v24, %v4891_v36 }
 0x738   : > { %4923 = vst.msk [vmem:[%s8420_s9 + $0x78] sm:$0xff] %vm339_vm0, %v4907_v37 }
 0x739   : > { %6036 = shalt.err (!%p6033_p11)
}
 0x73a   : > { %s6090_s14 = smov 128   ;;  %s6091_s16 = smov 8  }
 0x73b   : > { %5531 = dma.vmem_to_hbm [thread:$0]  (%p6215_p3), %s4939_s13, 2048, %s4941_s25, %s4925_s29, %s6090_s14, %s6090_s14, %s6091_s16  }
 0x73c PF: > { %s4955_s9 = sand.u32 1, %s6071_s21   ;;  %p8769_p12 = scmp.ge.s32.totalorder %s6083_s24, 2 }
 0x73d   : > { %s4956_s15 = scalar_lea.sflag [#allocation4], %s4955_s9 }
 0x73e   : > { %p5548_p13 = pnand %p8769_p12, %p6162_p6 }
 0x740   : > { %p5549_p0 = pneg %p5548_p13 }
 0x742   : > { %6066 = dma.done.wait (%p5549_p0), %s4956_s15, 2048  }
 0x743   : > { %6068 = vsyncadd (%p5549_p0), %s4956_s15, 4294965248  ;;  %p21_p5 = scmp.ge.s32.totalorder %s6202_s7, 4   ;;  %s8770_s21 = smov %s6075_s22 }
 0x744   : > { %s8771_s22 = smov %s6079_s23  ;;  %s8772_s23 = smov %s6211_s11 }
 0x745   : > { %s8773_s24 = smov %s6202_s7  ;;  %23 = sbr.rel (!%p21_p5) target bundleno = 7 (0x7), region = 104 }
 0x74a   :  { %4962 = vsyncpa [#allocation3], 1 }
 0x74b   :  { %4964 = vsyncpa [#allocation3 + $0x1], 1 }
 0x74c   :  { %4965 = vsyncpa [#allocation6], 1 }
 0x74d   :  { %4966 = vsyncpa [#allocation9], 1 }
 0x74e   :  { %4967 = vsyncpa [#allocation4], 1 }
 0x74f   :  { %4969 = vsyncpa [#allocation4 + $0x1], 1 }

</bundles_post_ra>
